<compile_context>
chip_gen: v7x
topology: tpu7x:2x2x1
jax: 0.10.0
libtpu: 0.0.40
codegen_flags: <defaults>
</compile_context>

<pallas_src>
import functools

import jax
import jax.numpy as jnp
from jax.experimental import pallas as pl
from jax.experimental.pallas import tpu as pltpu


# ----------------------------------------------------------------------------
# Small helpers
# ----------------------------------------------------------------------------

def _round_up(x, m):
    return ((x + m - 1) // m) * m


def _lane_tile(m, cap=2048):
    """Largest power-of-two tile <= cap that divides m (m multiple of 128)."""
    t = cap
    while m % t:
        t //= 2
    return t


def _leaky(x, slope=0.1):
    return jnp.where(x >= 0, x, slope * x)


# ----------------------------------------------------------------------------
# Conv = im2col + lane-dense Pallas MXU matmul with fused epilogue
# ----------------------------------------------------------------------------

def _conv_mm_kernel(w_ref, x_ref, b_ref, *refs, act, slope, has_res):
    if has_res:
        r_ref, o_ref = refs
    else:
        (o_ref,) = refs
    acc = jnp.dot(w_ref[...], x_ref[...], preferred_element_type=jnp.float32)
    acc = acc + b_ref[...]                                  # fused bias
    if has_res:
        acc = acc + r_ref[...].astype(jnp.float32)          # fused residual add
    if act == "leaky":
        acc = _leaky(acc, slope)
    elif act == "tanh":
        acc = jnp.tanh(acc)
    o_ref[...] = acc


def conv_matmul(wmat, cols, bias, act=None, slope=0.1, residual=None):
    """(Cout,K) @ (K,M) -> (Cout,M) f32, bf16 MXU inputs, fused epilogue.

    Lane axis M is padded to a multiple of 128 and Cout to a multiple of 8 so
    every store is a full, unmasked tile; padding is sliced off on return.
    """
    Cout, K = wmat.shape
    M = cols.shape[1]
    Mp = _round_up(M, 128)
    Cp = _round_up(Cout, 8)
    tm = _lane_tile(Mp, 2048)

    cols = cols.astype(jnp.bfloat16)
    if Mp != M:
        cols = jnp.pad(cols, ((0, 0), (0, Mp - M)))
    wmat = wmat.astype(jnp.bfloat16)
    bias = bias.astype(jnp.float32)
    if Cp != Cout:
        wmat = jnp.pad(wmat, ((0, Cp - Cout), (0, 0)))
        bias = jnp.pad(bias, (0, Cp - Cout))

    args = [wmat, cols, bias.reshape(Cp, 1)]
    in_specs = [pl.BlockSpec((Cp, K), lambda i: (0, 0)),
                pl.BlockSpec((K, tm), lambda i: (0, i)),
                pl.BlockSpec((Cp, 1), lambda i: (0, 0))]
    if residual is not None:
        res = residual.astype(jnp.bfloat16)                 # bf16 side stream
        if Mp != M:
            res = jnp.pad(res, ((0, 0), (0, Mp - M)))
        if Cp != Cout:
            res = jnp.pad(res, ((0, Cp - Cout), (0, 0)))
        in_specs.append(pl.BlockSpec((Cp, tm), lambda i: (0, i)))
        args.append(res)

    out = pl.pallas_call(
        functools.partial(_conv_mm_kernel, act=act, slope=slope,
                          has_res=residual is not None),
        out_shape=jax.ShapeDtypeStruct((Cp, Mp), jnp.float32),
        grid=(Mp // tm,),
        in_specs=in_specs,
        out_specs=pl.BlockSpec((Cp, tm), lambda i: (0, i)),
        compiler_params=pltpu.CompilerParams(
            dimension_semantics=("parallel",),
            vmem_limit_bytes=32 * 1024 * 1024),
    )(*args)
    return out[:Cout, :M]


def conv2d(x, w, b, stride=1, padding=1, act=None, residual=None, slope=0.1):
    """x:(Cin,N,H,W) channel-major, w:(Cout,Cin,kh,kw) -> (Cout,N,Ho,Wo) f32.

    Any preceding BN-affine / LeakyReLU is applied by the caller in f32 and
    fuses into this bf16 im2col under jit (no separate f32 round trip).
    TODO(synk): fold im2col / upsample into the matmul's index_map in-kernel.
    """
    Cin, N, H, W = x.shape
    Cout, _, kh, kw = w.shape
    xb = x.astype(jnp.bfloat16)
    if padding > 0:
        xb = jnp.pad(xb, ((0, 0), (0, 0), (padding, padding),
                          (padding, padding)))
    Ho = (H + 2 * padding - kh) // stride + 1
    Wo = (W + 2 * padding - kw) // stride + 1
    if kh == 1 and kw == 1 and stride == 1 and padding == 0:
        cols = xb.reshape(Cin, N * Ho * Wo)
    else:
        patches = [xb[:, :, dy:dy + stride * Ho:stride,
                      dx:dx + stride * Wo:stride]
                   for dy in range(kh) for dx in range(kw)]
        cols = jnp.stack(patches, axis=1).reshape(Cin * kh * kw, N * Ho * Wo)
    wmat = w.reshape(Cout, Cin * kh * kw)
    res = None if residual is None else residual.reshape(Cout, N * Ho * Wo)
    out = conv_matmul(wmat, cols, b, act=act, slope=slope, residual=res)
    return out.reshape(Cout, N, Ho, Wo)


# ----------------------------------------------------------------------------
# BatchNorm(+LeakyReLU): stats via XLA reduction, affine+act folded into the
# consumer conv's bf16 im2col (no standalone f32 BN round trip).
# ----------------------------------------------------------------------------

def bn_leaky_fold(x, gamma, beta, slope=0.1, eps=1e-5):
    """Training-mode BatchNorm2d + LeakyReLU on channel-major (C,N,H,W) in f32.

    TODO(synk): eval-mode running statistics are not modeled.
    """
    C = x.shape[0]
    xf = x.astype(jnp.float32)
    flat = xf.reshape(C, -1)
    mean = jnp.mean(flat, axis=1)
    var = jnp.var(flat, axis=1)                             # biased, as torch BN
    scale = gamma * jax.lax.rsqrt(var + eps)
    shift = beta - mean * scale
    y = xf * scale.reshape(C, 1, 1, 1) + shift.reshape(C, 1, 1, 1)
    return _leaky(y, slope)


# ----------------------------------------------------------------------------
# Bilinear warp (warp_flow): direct 4-corner weighted gather
# ----------------------------------------------------------------------------

def bilinear_warp(feat_cm, flow, H, W):
    """Bilinear warp (grid_sample, zero padding, align_corners=True).

    feat_cm: (C, N*H*W) channel-major source features (bf16 ok).
    flow:    (N, 2, H, W) pixel-space displacements.
    Returns  (C, N*H*W) f32 warped features.
    """
    N = flow.shape[0]
    gx = jnp.arange(W, dtype=jnp.float32)[None, None, :]
    gy = jnp.arange(H, dtype=jnp.float32)[None, :, None]
    sx = gx + flow[:, 0]
    sy = gy + flow[:, 1]
    x0 = jnp.floor(sx)
    y0 = jnp.floor(sy)
    wx1 = sx - x0
    wy1 = sy - y0
    wx0 = 1.0 - wx1
    wy0 = 1.0 - wy1
    base = (jnp.arange(N, dtype=jnp.int32) * (H * W)).reshape(N, 1, 1)
    out = jnp.zeros((feat_cm.shape[0], N * H * W), jnp.float32)
    for yi, xi, wv in ((y0, x0, wy0 * wx0), (y0, x0 + 1, wy0 * wx1),
                       (y0 + 1, x0, wy1 * wx0), (y0 + 1, x0 + 1, wy1 * wx1)):
        valid = (yi >= 0) & (yi <= H - 1) & (xi >= 0) & (xi <= W - 1)
        flat = (base + jnp.clip(yi, 0, H - 1).astype(jnp.int32) * W
                + jnp.clip(xi, 0, W - 1).astype(jnp.int32)).reshape(N * H * W)
        wflat = jnp.where(valid, wv, 0.0).reshape(1, N * H * W)
        out = out + jnp.take(feat_cm, flat, axis=1).astype(jnp.float32) * wflat
    return out


# ----------------------------------------------------------------------------
# Fused softmax-over-attentions + flow merge + pose output (Pallas)
# ----------------------------------------------------------------------------

def _softmax_merge_kernel(logit_ref, feat_ref, warp_ref,
                          normed_ref, merge_ref, pose_ref, *, K):
    logits = logit_ref[...]                                 # (K+1, t) f32
    m = jnp.max(logits, axis=0, keepdims=True)
    e = jnp.exp(logits - m)
    normed = e / jnp.sum(e, axis=0, keepdims=True)
    merge = normed[0:1] * feat_ref[...].astype(jnp.float32)  # (C, t)
    for k in range(K):                                      # static unroll
        merge = merge + warp_ref[k].astype(jnp.float32) * normed[k + 1:k + 2]
    normed_ref[...] = normed
    merge_ref[...] = merge
    pose_ref[...] = normed[0:1] * merge                     # attn0 * merged out


def softmax_merge(logits, out_feat, warped):
    """logits:(K+1,M) f32, out_feat:(C,M), warped:(K,C,M); M = N*H*W."""
    Kp1, M = logits.shape
    K = Kp1 - 1
    C = out_feat.shape[0]
    Mp = _round_up(M, 128)
    pad = Mp - M
    logits = logits.astype(jnp.float32)
    out_feat = out_feat.astype(jnp.bfloat16)                # bf16 side streams
    warped = warped.astype(jnp.bfloat16)
    if pad:
        logits = jnp.pad(logits, ((0, 0), (0, pad)))
        out_feat = jnp.pad(out_feat, ((0, 0), (0, pad)))
        warped = jnp.pad(warped, ((0, 0), (0, 0), (0, pad)))
    t = _lane_tile(Mp, 1024)
    normed, merge, pose = pl.pallas_call(
        functools.partial(_softmax_merge_kernel, K=K),
        out_shape=(jax.ShapeDtypeStruct((Kp1, Mp), jnp.float32),
                   jax.ShapeDtypeStruct((C, Mp), jnp.float32),
                   jax.ShapeDtypeStruct((C, Mp), jnp.float32)),
        grid=(Mp // t,),
        in_specs=[pl.BlockSpec((Kp1, t), lambda i: (0, i)),
                  pl.BlockSpec((C, t), lambda i: (0, i)),
                  pl.BlockSpec((K, C, t), lambda i: (0, 0, i))],
        out_specs=(pl.BlockSpec((Kp1, t), lambda i: (0, i)),
                   pl.BlockSpec((C, t), lambda i: (0, i)),
                   pl.BlockSpec((C, t), lambda i: (0, i))),
        compiler_params=pltpu.CompilerParams(
            dimension_semantics=("parallel",),
            vmem_limit_bytes=32 * 1024 * 1024),
    )(logits, out_feat, warped)
    return normed[:, :M], merge[:, :M], pose[:, :M]


# ----------------------------------------------------------------------------
# Blocks (reconstructed GFLA-style submodules), channel-major activations
# ----------------------------------------------------------------------------

def encoder_block(p, x):
    # BN -> LReLU(0.1) -> Conv4x4 s2 p1 -> BN -> LReLU(0.1) -> Conv3x3
    h = bn_leaky_fold(x, p["bn0"]["gamma"], p["bn0"]["beta"])
    h = conv2d(h, p["conv1"]["w"], p["conv1"]["b"], stride=2, padding=1)
    h = bn_leaky_fold(h, p["bn1"]["gamma"], p["bn1"]["beta"])
    return conv2d(h, p["conv2"]["w"], p["conv2"]["b"], stride=1, padding=1)


def res_block2d(p, x):
    # pre-activation residual block; `+ x` fused into conv2's matmul epilogue.
    h = bn_leaky_fold(x, p["bn0"]["gamma"], p["bn0"]["beta"])
    h = conv2d(h, p["conv1"]["w"], p["conv1"]["b"], 1, 1)
    h = bn_leaky_fold(h, p["bn1"]["gamma"], p["bn1"]["beta"])
    return conv2d(h, p["conv2"]["w"], p["conv2"]["b"], 1, 1, residual=x)


def upsample2x(x):
    # TODO(synk): fold the nearest 2x upsample into the next conv's im2col
    # indexing instead of materializing the 4x tensor.
    return jnp.repeat(jnp.repeat(x, 2, axis=2), 2, axis=3)


def res_block_up(p, x):
    # main: BN -> LReLU -> up2x -> Conv3x3 -> BN -> LReLU -> Conv3x3
    # shortcut: Conv1x1 then up2x (1x1 conv commutes with nearest upsample, so
    # it runs on the 4x-smaller tensor); `+ s` fused into conv2's epilogue.
    s = upsample2x(conv2d(x, p["short"]["w"], p["short"]["b"], 1, 0))
    h = bn_leaky_fold(x, p["bn0"]["gamma"], p["bn0"]["beta"])
    h = upsample2x(h)
    h = conv2d(h, p["conv1"]["w"], p["conv1"]["b"], 1, 1)
    h = bn_leaky_fold(h, p["bn1"]["gamma"], p["bn1"]["beta"])
    return conv2d(h, p["conv2"]["w"], p["conv2"]["b"], 1, 1, residual=s)


def output_block(p, x):
    # LReLU(0.1) -> ReflectionPad(1) -> Conv3x3(pad 0) -> Tanh.
    # Pre-act done in f32 before the bf16 cast; Tanh fused in the conv epilogue.
    h = _leaky(x.astype(jnp.float32), 0.1)
    hp = jnp.pad(h, ((0, 0), (0, 0), (1, 1), (1, 1)), mode="reflect")
    return conv2d(hp, p["conv"]["w"], p["conv"]["b"], 1, 0, act="tanh")


# ----------------------------------------------------------------------------
# Parameter init (deterministic, synthetic)
# ----------------------------------------------------------------------------

def init_conv(key, cout, cin, kh, kw, scale=0.1):
    k1, k2 = jax.random.split(key)
    return {"w": scale * jax.random.normal(k1, (cout, cin, kh, kw), jnp.float32),
            "b": scale * jax.random.normal(k2, (cout,), jnp.float32)}


def init_bn(key, c):
    k1, k2 = jax.random.split(key)
    return {"gamma": 1.0 + 0.1 * jax.random.normal(k1, (c,), jnp.float32),
            "beta": 0.1 * jax.random.normal(k2, (c,), jnp.float32)}


def init_params(key, structure_nc, ngf, max_nc, n_decode_layers, output_nc,
                flow_layers):
    keys = iter(jax.random.split(key, 64))
    P = {}

    def enc(cin, cout):
        return {"bn0": init_bn(next(keys), cin),
                "conv1": init_conv(next(keys), cout, cin, 4, 4),
                "bn1": init_bn(next(keys), cout),
                "conv2": init_conv(next(keys), cout, cout, 3, 3)}

    P["block0"] = enc(structure_nc, ngf)
    mult = 1
    for i in range(1, n_decode_layers):
        mult_prev = mult
        mult = min(2 ** i, max_nc // ngf)
        P[f"encoder{i}"] = enc(ngf * mult_prev, ngf * mult)

    mult = min(2 ** (n_decode_layers - 1), max_nc // ngf)
    for i in range(n_decode_layers):
        mult_prev = mult
        mult = (min(2 ** (n_decode_layers - i - 2), max_nc // ngf)
                if i != n_decode_layers - 1 else 1)
        cin, cout = ngf * mult_prev, ngf * mult
        if n_decode_layers - i in flow_layers:
            P[f"so{i}"] = init_conv(next(keys), 1, cin, 3, 3)
        P[f"decoder{i}"] = {
            "res": {"bn0": init_bn(next(keys), cin),
                    "conv1": init_conv(next(keys), cin, cin, 3, 3),
                    "bn1": init_bn(next(keys), cin),
                    "conv2": init_conv(next(keys), cin, cin, 3, 3)},
            "up": {"bn0": init_bn(next(keys), cin),
                   "conv1": init_conv(next(keys), cout, cin, 3, 3),
                   "bn1": init_bn(next(keys), cout),
                   "conv2": init_conv(next(keys), cout, cout, 3, 3),
                   "short": init_conv(next(keys), cout, cin, 1, 1)},
        }
    P["outconv"] = {"conv": init_conv(next(keys), output_nc, ngf, 3, 3)}
    return P


# ----------------------------------------------------------------------------
# PoseSODecoder forward
# ----------------------------------------------------------------------------

def pose_so_decoder_forward(P, g_y, source_features, flows, attns,
                            n_decode_layers=3, flow_layers=(2, 3),
                            align_corners=True):
    # TODO(synk): only align_corners=True grid_sample semantics with pixel-space
    # flow displacements and zero padding are implemented.
    del align_corners
    out = jnp.transpose(g_y, (1, 0, 2, 3)).astype(jnp.float32)  # channel-major
    out = encoder_block(P["block0"], out)
    for i in range(1, n_decode_layers):
        out = encoder_block(P[f"encoder{i}"], out)

    counter = 0
    K = len(source_features)
    normed_attns, pose_out = [], []
    for i in range(n_decode_layers):
        if n_decode_layers - i in flow_layers:
            so = P[f"so{i}"]
            C, N, h, w = out.shape
            M = N * h * w
            attn_p = conv2d(out, so["w"], so["b"], 1, 1)            # (1,N,h,w)
            logits = jnp.concatenate(
                [attn_p.reshape(1, M)]
                + [attns[k][counter].reshape(1, M) for k in range(K)],
                axis=0)                                             # (K+1, M)
            warped = []
            for k in range(K):
                feat_cm = jnp.transpose(source_features[k][i],
                                        (1, 0, 2, 3)).reshape(C, M)
                warped.append(bilinear_warp(feat_cm.astype(jnp.bfloat16),
                                            flows[k][counter], h, w))
            warped = jnp.stack(warped, axis=0)                      # (K, C, M)
            normed, merge, pose = softmax_merge(logits, out.reshape(C, M),
                                                warped)
            counter += 1
            out = merge.reshape(C, N, h, w)
            normed_attns.append(normed.reshape(K + 1, N, h, w))
            pose_out.append(pose.reshape(C, N, h, w))
        out = res_block2d(P[f"decoder{i}"]["res"], out)
        out = res_block_up(P[f"decoder{i}"]["up"], out)

    out_image = output_block(P["outconv"], out)
    # back to host NCHW layout
    out_image = jnp.transpose(out_image, (1, 0, 2, 3))
    normed_attns = [jnp.transpose(a, (1, 0, 2, 3)) for a in normed_attns]
    pose_out = [jnp.transpose(p_, (1, 0, 2, 3)) for p_ in pose_out]
    return out_image, normed_attns, pose_out


# ----------------------------------------------------------------------------
# Demo
# ----------------------------------------------------------------------------

if __name__ == "__main__":
    key = jax.random.PRNGKey(0)
    structure_nc, ngf, max_nc = 6, 8, 32
    n_decode_layers, output_nc = 3, 3
    flow_layers = (2, 3)
    N, H, W, K = 2, 32, 32, 2

    kp, kd = jax.random.split(key)
    P = init_params(kp, structure_nc, ngf, max_nc, n_decode_layers, output_nc,
                    list(flow_layers))

    dks = iter(jax.random.split(kd, 32))
    g_y = jax.random.normal(next(dks), (N, structure_nc, H, W), jnp.float32)

    # decoder-stage feature shapes: i=0 -> (ngf*4, H/8); i=1 -> (ngf*2, H/4)
    feat_specs = [(ngf * 4, H // 8), (ngf * 2, H // 4)]
    source_features, flows, attns = [], [], []
    for _k in range(K):
        source_features.append(
            [jax.random.normal(next(dks), (N, c, s, s), jnp.float32)
             for (c, s) in feat_specs])
        flows.append(
            [1.5 * jax.random.normal(next(dks), (N, 2, s, s), jnp.float32)
             for (_, s) in feat_specs])
        attns.append(
            [jax.random.normal(next(dks), (N, 1, s, s), jnp.float32)
             for (_, s) in feat_specs])

    fwd = jax.jit(functools.partial(
        pose_so_decoder_forward, n_decode_layers=n_decode_layers,
        flow_layers=flow_layers, align_corners=True))
    out_image, normed_attns, pose_out = fwd(P, g_y, source_features, flows,
                                            attns)

    jax.block_until_ready(out_image)
    for a in normed_attns + pose_out:
        jax.block_until_ready(a)

    assert out_image.shape == (N, output_nc, H, W)
    assert normed_attns[0].shape == (N, K + 1, H // 8, W // 8)
    assert normed_attns[1].shape == (N, K + 1, H // 4, W // 4)
    assert pose_out[0].shape == (N, ngf * 4, H // 8, W // 8)
    assert pose_out[1].shape == (N, ngf * 2, H // 4, W // 4)
    print("KERNEL_OK")
</pallas_src>

<mosaic_0001>
module attributes {stable_mosaic.version = 11 : i64} {
  func.func @_conv_mm_kernel(%arg0: i32, %arg1: memref<8x96xbf16, #tpu.memory_space<vmem>>, %arg2: memref<96x512xbf16, #tpu.memory_space<vmem>>, %arg3: memref<8x1xf32, #tpu.memory_space<vmem>>, %arg4: memref<8x512xf32, #tpu.memory_space<vmem>>) attributes {dimension_semantics = [#tpu.dimension_semantics<parallel>], iteration_bounds = array<i64: 1>, scalar_prefetch = 0 : i64, scratch_operands = 0 : i64, tpu.core_type = #tpu.core_type<tc>, window_params = [{pipeline_mode = #tpu.pipeline_mode<synchronous>, transform_indices = @transform_0, window_bounds = array<i64: 8, 96>}, {transform_indices = @transform_1, window_bounds = array<i64: 96, 512>}, {pipeline_mode = #tpu.pipeline_mode<synchronous>, transform_indices = @transform_2, window_bounds = array<i64: 8, 1>}, {transform_indices = @transform_3, window_bounds = array<i64: 8, 512>}]} {
    %c0 = arith.constant 0 : index
    %c0_0 = arith.constant 0 : index
    %0 = vector.load %arg1[%c0, %c0_0] : memref<8x96xbf16, #tpu.memory_space<vmem>>, vector<8x96xbf16>
    %c0_1 = arith.constant 0 : index
    %c0_2 = arith.constant 0 : index
    %1 = vector.load %arg2[%c0_1, %c0_2] : memref<96x512xbf16, #tpu.memory_space<vmem>>, vector<96x512xbf16>
    %cst = arith.constant dense<0.000000e+00> : vector<8x512xf32>
    %2 = tpu.matmul %0, %1, %cst {dimension_numbers = #tpu.dot_dimension_numbers<[1], [0], [0], [1], [0, 0, 1, 1], [], []>} : vector<8x96xbf16>, vector<96x512xbf16>, vector<8x512xf32> -> vector<8x512xf32>
    %c0_3 = arith.constant 0 : index
    %c0_4 = arith.constant 0 : index
    %3 = vector.load %arg3[%c0_3, %c0_4] : memref<8x1xf32, #tpu.memory_space<vmem>>, vector<8x1xf32>
    %4 = vector.broadcast %3 : vector<8x1xf32> to vector<8x512xf32>
    %5 = arith.addf %2, %4 : vector<8x512xf32>
    %c0_5 = arith.constant 0 : index
    %c0_6 = arith.constant 0 : index
    %6 = vector.load %arg4[%c0_5, %c0_6] : memref<8x512xf32, #tpu.memory_space<vmem>>, vector<8x512xf32>
    tpu.vector_store %arg4[%c0_5, %c0_6], %5 {strides = array<i32>} : memref<8x512xf32, #tpu.memory_space<vmem>>, vector<8x512xf32>,
    return
  }
  func.func @transform_0(%arg0: i32) -> (i32, i32) {
    %c0_i32 = arith.constant 0 : i32
    %c0_i32_0 = arith.constant 0 : i32
    %c0_i32_1 = arith.constant 0 : i32
    return %c0_i32, %c0_i32_0 : i32, i32
  }
  func.func @transform_1(%arg0: i32) -> (i32, i32) {
    %c0_i32 = arith.constant 0 : i32
    %c0_i32_0 = arith.constant 0 : i32
    return %c0_i32, %arg0 : i32, i32
  }
  func.func @transform_2(%arg0: i32) -> (i32, i32) {
    %c0_i32 = arith.constant 0 : i32
    %c0_i32_0 = arith.constant 0 : i32
    %c0_i32_1 = arith.constant 0 : i32
    return %c0_i32, %c0_i32_0 : i32, i32
  }
  func.func @transform_3(%arg0: i32) -> (i32, i32) {
    %c0_i32 = arith.constant 0 : i32
    %c0_i32_0 = arith.constant 0 : i32
    return %c0_i32, %arg0 : i32, i32
  }
}

module attributes {stable_mosaic.version = 11 : i64} {
  func.func @_conv_mm_kernel(%arg0: i32, %arg1: memref<8x72xbf16, #tpu.memory_space<vmem>>, %arg2: memref<72x512xbf16, #tpu.memory_space<vmem>>, %arg3: memref<8x1xf32, #tpu.memory_space<vmem>>, %arg4: memref<8x512xf32, #tpu.memory_space<vmem>>) attributes {dimension_semantics = [#tpu.dimension_semantics<parallel>], iteration_bounds = array<i64: 1>, scalar_prefetch = 0 : i64, scratch_operands = 0 : i64, tpu.core_type = #tpu.core_type<tc>, window_params = [{pipeline_mode = #tpu.pipeline_mode<synchronous>, transform_indices = @transform_0, window_bounds = array<i64: 8, 72>}, {transform_indices = @transform_1, window_bounds = array<i64: 72, 512>}, {pipeline_mode = #tpu.pipeline_mode<synchronous>, transform_indices = @transform_2, window_bounds = array<i64: 8, 1>}, {transform_indices = @transform_3, window_bounds = array<i64: 8, 512>}]} {
    %c0 = arith.constant 0 : index
    %c0_0 = arith.constant 0 : index
    %0 = vector.load %arg1[%c0, %c0_0] : memref<8x72xbf16, #tpu.memory_space<vmem>>, vector<8x72xbf16>
    %c0_1 = arith.constant 0 : index
    %c0_2 = arith.constant 0 : index
    %1 = vector.load %arg2[%c0_1, %c0_2] : memref<72x512xbf16, #tpu.memory_space<vmem>>, vector<72x512xbf16>
    %cst = arith.constant dense<0.000000e+00> : vector<8x512xf32>
    %2 = tpu.matmul %0, %1, %cst {dimension_numbers = #tpu.dot_dimension_numbers<[1], [0], [0], [1], [0, 0, 1, 1], [], []>} : vector<8x72xbf16>, vector<72x512xbf16>, vector<8x512xf32> -> vector<8x512xf32>
    %c0_3 = arith.constant 0 : index
    %c0_4 = arith.constant 0 : index
    %3 = vector.load %arg3[%c0_3, %c0_4] : memref<8x1xf32, #tpu.memory_space<vmem>>, vector<8x1xf32>
    %4 = vector.broadcast %3 : vector<8x1xf32> to vector<8x512xf32>
    %5 = arith.addf %2, %4 : vector<8x512xf32>
    %c0_5 = arith.constant 0 : index
    %c0_6 = arith.constant 0 : index
    %6 = vector.load %arg4[%c0_5, %c0_6] : memref<8x512xf32, #tpu.memory_space<vmem>>, vector<8x512xf32>
    tpu.vector_store %arg4[%c0_5, %c0_6], %5 {strides = array<i32>} : memref<8x512xf32, #tpu.memory_space<vmem>>, vector<8x512xf32>,
    return
  }
  func.func @transform_0(%arg0: i32) -> (i32, i32) {
    %c0_i32 = arith.constant 0 : i32
    %c0_i32_0 = arith.constant 0 : i32
    %c0_i32_1 = arith.constant 0 : i32
    return %c0_i32, %c0_i32_0 : i32, i32
  }
  func.func @transform_1(%arg0: i32) -> (i32, i32) {
    %c0_i32 = arith.constant 0 : i32
    %c0_i32_0 = arith.constant 0 : i32
    return %c0_i32, %arg0 : i32, i32
  }
  func.func @transform_2(%arg0: i32) -> (i32, i32) {
    %c0_i32 = arith.constant 0 : i32
    %c0_i32_0 = arith.constant 0 : i32
    %c0_i32_1 = arith.constant 0 : i32
    return %c0_i32, %c0_i32_0 : i32, i32
  }
  func.func @transform_3(%arg0: i32) -> (i32, i32) {
    %c0_i32 = arith.constant 0 : i32
    %c0_i32_0 = arith.constant 0 : i32
    return %c0_i32, %arg0 : i32, i32
  }
}

module attributes {stable_mosaic.version = 11 : i64} {
  func.func @_conv_mm_kernel(%arg0: i32, %arg1: memref<16x128xbf16, #tpu.memory_space<vmem>>, %arg2: memref<128x128xbf16, #tpu.memory_space<vmem>>, %arg3: memref<16x1xf32, #tpu.memory_space<vmem>>, %arg4: memref<16x128xf32, #tpu.memory_space<vmem>>) attributes {dimension_semantics = [#tpu.dimension_semantics<parallel>], iteration_bounds = array<i64: 1>, scalar_prefetch = 0 : i64, scratch_operands = 0 : i64, tpu.core_type = #tpu.core_type<tc>, window_params = [{pipeline_mode = #tpu.pipeline_mode<synchronous>, transform_indices = @transform_0, window_bounds = array<i64: 16, 128>}, {transform_indices = @transform_1, window_bounds = array<i64: 128, 128>}, {pipeline_mode = #tpu.pipeline_mode<synchronous>, transform_indices = @transform_2, window_bounds = array<i64: 16, 1>}, {transform_indices = @transform_3, window_bounds = array<i64: 16, 128>}]} {
    %c0 = arith.constant 0 : index
    %c0_0 = arith.constant 0 : index
    %0 = vector.load %arg1[%c0, %c0_0] : memref<16x128xbf16, #tpu.memory_space<vmem>>, vector<16x128xbf16>
    %c0_1 = arith.constant 0 : index
    %c0_2 = arith.constant 0 : index
    %1 = vector.load %arg2[%c0_1, %c0_2] : memref<128x128xbf16, #tpu.memory_space<vmem>>, vector<128x128xbf16>
    %cst = arith.constant dense<0.000000e+00> : vector<16x128xf32>
    %2 = tpu.matmul %0, %1, %cst {dimension_numbers = #tpu.dot_dimension_numbers<[1], [0], [0], [1], [0, 0, 1, 1], [], []>} : vector<16x128xbf16>, vector<128x128xbf16>, vector<16x128xf32> -> vector<16x128xf32>
    %c0_3 = arith.constant 0 : index
    %c0_4 = arith.constant 0 : index
    %3 = vector.load %arg3[%c0_3, %c0_4] : memref<16x1xf32, #tpu.memory_space<vmem>>, vector<16x1xf32>
    %4 = vector.broadcast %3 : vector<16x1xf32> to vector<16x128xf32>
    %5 = arith.addf %2, %4 : vector<16x128xf32>
    %c0_5 = arith.constant 0 : index
    %c0_6 = arith.constant 0 : index
    %6 = vector.load %arg4[%c0_5, %c0_6] : memref<16x128xf32, #tpu.memory_space<vmem>>, vector<16x128xf32>
    tpu.vector_store %arg4[%c0_5, %c0_6], %5 {strides = array<i32>} : memref<16x128xf32, #tpu.memory_space<vmem>>, vector<16x128xf32>,
    return
  }
  func.func @transform_0(%arg0: i32) -> (i32, i32) {
    %c0_i32 = arith.constant 0 : i32
    %c0_i32_0 = arith.constant 0 : i32
    %c0_i32_1 = arith.constant 0 : i32
    return %c0_i32, %c0_i32_0 : i32, i32
  }
  func.func @transform_1(%arg0: i32) -> (i32, i32) {
    %c0_i32 = arith.constant 0 : i32
    %c0_i32_0 = arith.constant 0 : i32
    return %c0_i32, %arg0 : i32, i32
  }
  func.func @transform_2(%arg0: i32) -> (i32, i32) {
    %c0_i32 = arith.constant 0 : i32
    %c0_i32_0 = arith.constant 0 : i32
    %c0_i32_1 = arith.constant 0 : i32
    return %c0_i32, %c0_i32_0 : i32, i32
  }
  func.func @transform_3(%arg0: i32) -> (i32, i32) {
    %c0_i32 = arith.constant 0 : i32
    %c0_i32_0 = arith.constant 0 : i32
    return %c0_i32, %arg0 : i32, i32
  }
}

module attributes {stable_mosaic.version = 11 : i64} {
  func.func @_conv_mm_kernel(%arg0: i32, %arg1: memref<16x144xbf16, #tpu.memory_space<vmem>>, %arg2: memref<144x128xbf16, #tpu.memory_space<vmem>>, %arg3: memref<16x1xf32, #tpu.memory_space<vmem>>, %arg4: memref<16x128xf32, #tpu.memory_space<vmem>>) attributes {dimension_semantics = [#tpu.dimension_semantics<parallel>], iteration_bounds = array<i64: 1>, scalar_prefetch = 0 : i64, scratch_operands = 0 : i64, tpu.core_type = #tpu.core_type<tc>, window_params = [{pipeline_mode = #tpu.pipeline_mode<synchronous>, transform_indices = @transform_0, window_bounds = array<i64: 16, 144>}, {transform_indices = @transform_1, window_bounds = array<i64: 144, 128>}, {pipeline_mode = #tpu.pipeline_mode<synchronous>, transform_indices = @transform_2, window_bounds = array<i64: 16, 1>}, {transform_indices = @transform_3, window_bounds = array<i64: 16, 128>}]} {
    %c0 = arith.constant 0 : index
    %c0_0 = arith.constant 0 : index
    %0 = vector.load %arg1[%c0, %c0_0] : memref<16x144xbf16, #tpu.memory_space<vmem>>, vector<16x144xbf16>
    %c0_1 = arith.constant 0 : index
    %c0_2 = arith.constant 0 : index
    %1 = vector.load %arg2[%c0_1, %c0_2] : memref<144x128xbf16, #tpu.memory_space<vmem>>, vector<144x128xbf16>
    %cst = arith.constant dense<0.000000e+00> : vector<16x128xf32>
    %2 = tpu.matmul %0, %1, %cst {dimension_numbers = #tpu.dot_dimension_numbers<[1], [0], [0], [1], [0, 0, 1, 1], [], []>} : vector<16x144xbf16>, vector<144x128xbf16>, vector<16x128xf32> -> vector<16x128xf32>
    %c0_3 = arith.constant 0 : index
    %c0_4 = arith.constant 0 : index
    %3 = vector.load %arg3[%c0_3, %c0_4] : memref<16x1xf32, #tpu.memory_space<vmem>>, vector<16x1xf32>
    %4 = vector.broadcast %3 : vector<16x1xf32> to vector<16x128xf32>
    %5 = arith.addf %2, %4 : vector<16x128xf32>
    %c0_5 = arith.constant 0 : index
    %c0_6 = arith.constant 0 : index
    %6 = vector.load %arg4[%c0_5, %c0_6] : memref<16x128xf32, #tpu.memory_space<vmem>>, vector<16x128xf32>
    tpu.vector_store %arg4[%c0_5, %c0_6], %5 {strides = array<i32>} : memref<16x128xf32, #tpu.memory_space<vmem>>, vector<16x128xf32>,
    return
  }
  func.func @transform_0(%arg0: i32) -> (i32, i32) {
    %c0_i32 = arith.constant 0 : i32
    %c0_i32_0 = arith.constant 0 : i32
    %c0_i32_1 = arith.constant 0 : i32
    return %c0_i32, %c0_i32_0 : i32, i32
  }
  func.func @transform_1(%arg0: i32) -> (i32, i32) {
    %c0_i32 = arith.constant 0 : i32
    %c0_i32_0 = arith.constant 0 : i32
    return %c0_i32, %arg0 : i32, i32
  }
  func.func @transform_2(%arg0: i32) -> (i32, i32) {
    %c0_i32 = arith.constant 0 : i32
    %c0_i32_0 = arith.constant 0 : i32
    %c0_i32_1 = arith.constant 0 : i32
    return %c0_i32, %c0_i32_0 : i32, i32
  }
  func.func @transform_3(%arg0: i32) -> (i32, i32) {
    %c0_i32 = arith.constant 0 : i32
    %c0_i32_0 = arith.constant 0 : i32
    return %c0_i32, %arg0 : i32, i32
  }
}

module attributes {stable_mosaic.version = 11 : i64} {
  func.func @_conv_mm_kernel(%arg0: i32, %arg1: memref<32x256xbf16, #tpu.memory_space<vmem>>, %arg2: memref<256x128xbf16, #tpu.memory_space<vmem>>, %arg3: memref<32x1xf32, #tpu.memory_space<vmem>>, %arg4: memref<32x128xf32, #tpu.memory_space<vmem>>) attributes {dimension_semantics = [#tpu.dimension_semantics<parallel>], iteration_bounds = array<i64: 1>, scalar_prefetch = 0 : i64, scratch_operands = 0 : i64, tpu.core_type = #tpu.core_type<tc>, window_params = [{pipeline_mode = #tpu.pipeline_mode<synchronous>, transform_indices = @transform_0, window_bounds = array<i64: 32, 256>}, {transform_indices = @transform_1, window_bounds = array<i64: 256, 128>}, {pipeline_mode = #tpu.pipeline_mode<synchronous>, transform_indices = @transform_2, window_bounds = array<i64: 32, 1>}, {transform_indices = @transform_3, window_bounds = array<i64: 32, 128>}]} {
    %c0 = arith.constant 0 : index
    %c0_0 = arith.constant 0 : index
    %0 = vector.load %arg1[%c0, %c0_0] : memref<32x256xbf16, #tpu.memory_space<vmem>>, vector<32x256xbf16>
    %c0_1 = arith.constant 0 : index
    %c0_2 = arith.constant 0 : index
    %1 = vector.load %arg2[%c0_1, %c0_2] : memref<256x128xbf16, #tpu.memory_space<vmem>>, vector<256x128xbf16>
    %cst = arith.constant dense<0.000000e+00> : vector<32x128xf32>
    %2 = tpu.matmul %0, %1, %cst {dimension_numbers = #tpu.dot_dimension_numbers<[1], [0], [0], [1], [0, 0, 1, 1], [], []>} : vector<32x256xbf16>, vector<256x128xbf16>, vector<32x128xf32> -> vector<32x128xf32>
    %c0_3 = arith.constant 0 : index
    %c0_4 = arith.constant 0 : index
    %3 = vector.load %arg3[%c0_3, %c0_4] : memref<32x1xf32, #tpu.memory_space<vmem>>, vector<32x1xf32>
    %4 = vector.broadcast %3 : vector<32x1xf32> to vector<32x128xf32>
    %5 = arith.addf %2, %4 : vector<32x128xf32>
    %c0_5 = arith.constant 0 : index
    %c0_6 = arith.constant 0 : index
    %6 = vector.load %arg4[%c0_5, %c0_6] : memref<32x128xf32, #tpu.memory_space<vmem>>, vector<32x128xf32>
    tpu.vector_store %arg4[%c0_5, %c0_6], %5 {strides = array<i32>} : memref<32x128xf32, #tpu.memory_space<vmem>>, vector<32x128xf32>,
    return
  }
  func.func @transform_0(%arg0: i32) -> (i32, i32) {
    %c0_i32 = arith.constant 0 : i32
    %c0_i32_0 = arith.constant 0 : i32
    %c0_i32_1 = arith.constant 0 : i32
    return %c0_i32, %c0_i32_0 : i32, i32
  }
  func.func @transform_1(%arg0: i32) -> (i32, i32) {
    %c0_i32 = arith.constant 0 : i32
    %c0_i32_0 = arith.constant 0 : i32
    return %c0_i32, %arg0 : i32, i32
  }
  func.func @transform_2(%arg0: i32) -> (i32, i32) {
    %c0_i32 = arith.constant 0 : i32
    %c0_i32_0 = arith.constant 0 : i32
    %c0_i32_1 = arith.constant 0 : i32
    return %c0_i32, %c0_i32_0 : i32, i32
  }
  func.func @transform_3(%arg0: i32) -> (i32, i32) {
    %c0_i32 = arith.constant 0 : i32
    %c0_i32_0 = arith.constant 0 : i32
    return %c0_i32, %arg0 : i32, i32
  }
}

module attributes {stable_mosaic.version = 11 : i64} {
  func.func @_conv_mm_kernel(%arg0: i32, %arg1: memref<32x288xbf16, #tpu.memory_space<vmem>>, %arg2: memref<288x128xbf16, #tpu.memory_space<vmem>>, %arg3: memref<32x1xf32, #tpu.memory_space<vmem>>, %arg4: memref<32x128xf32, #tpu.memory_space<vmem>>) attributes {dimension_semantics = [#tpu.dimension_semantics<parallel>], iteration_bounds = array<i64: 1>, scalar_prefetch = 0 : i64, scratch_operands = 0 : i64, tpu.core_type = #tpu.core_type<tc>, window_params = [{pipeline_mode = #tpu.pipeline_mode<synchronous>, transform_indices = @transform_0, window_bounds = array<i64: 32, 288>}, {transform_indices = @transform_1, window_bounds = array<i64: 288, 128>}, {pipeline_mode = #tpu.pipeline_mode<synchronous>, transform_indices = @transform_2, window_bounds = array<i64: 32, 1>}, {transform_indices = @transform_3, window_bounds = array<i64: 32, 128>}]} {
    %c0 = arith.constant 0 : index
    %c0_0 = arith.constant 0 : index
    %0 = vector.load %arg1[%c0, %c0_0] : memref<32x288xbf16, #tpu.memory_space<vmem>>, vector<32x288xbf16>
    %c0_1 = arith.constant 0 : index
    %c0_2 = arith.constant 0 : index
    %1 = vector.load %arg2[%c0_1, %c0_2] : memref<288x128xbf16, #tpu.memory_space<vmem>>, vector<288x128xbf16>
    %cst = arith.constant dense<0.000000e+00> : vector<32x128xf32>
    %2 = tpu.matmul %0, %1, %cst {dimension_numbers = #tpu.dot_dimension_numbers<[1], [0], [0], [1], [0, 0, 1, 1], [], []>} : vector<32x288xbf16>, vector<288x128xbf16>, vector<32x128xf32> -> vector<32x128xf32>
    %c0_3 = arith.constant 0 : index
    %c0_4 = arith.constant 0 : index
    %3 = vector.load %arg3[%c0_3, %c0_4] : memref<32x1xf32, #tpu.memory_space<vmem>>, vector<32x1xf32>
    %4 = vector.broadcast %3 : vector<32x1xf32> to vector<32x128xf32>
    %5 = arith.addf %2, %4 : vector<32x128xf32>
    %c0_5 = arith.constant 0 : index
    %c0_6 = arith.constant 0 : index
    %6 = vector.load %arg4[%c0_5, %c0_6] : memref<32x128xf32, #tpu.memory_space<vmem>>, vector<32x128xf32>
    tpu.vector_store %arg4[%c0_5, %c0_6], %5 {strides = array<i32>} : memref<32x128xf32, #tpu.memory_space<vmem>>, vector<32x128xf32>,
    return
  }
  func.func @transform_0(%arg0: i32) -> (i32, i32) {
    %c0_i32 = arith.constant 0 : i32
    %c0_i32_0 = arith.constant 0 : i32
    %c0_i32_1 = arith.constant 0 : i32
    return %c0_i32, %c0_i32_0 : i32, i32
  }
  func.func @transform_1(%arg0: i32) -> (i32, i32) {
    %c0_i32 = arith.constant 0 : i32
    %c0_i32_0 = arith.constant 0 : i32
    return %c0_i32, %arg0 : i32, i32
  }
  func.func @transform_2(%arg0: i32) -> (i32, i32) {
    %c0_i32 = arith.constant 0 : i32
    %c0_i32_0 = arith.constant 0 : i32
    %c0_i32_1 = arith.constant 0 : i32
    return %c0_i32, %c0_i32_0 : i32, i32
  }
  func.func @transform_3(%arg0: i32) -> (i32, i32) {
    %c0_i32 = arith.constant 0 : i32
    %c0_i32_0 = arith.constant 0 : i32
    return %c0_i32, %arg0 : i32, i32
  }
}

module attributes {stable_mosaic.version = 11 : i64} {
  func.func @_conv_mm_kernel(%arg0: i32, %arg1: memref<8x288xbf16, #tpu.memory_space<vmem>>, %arg2: memref<288x128xbf16, #tpu.memory_space<vmem>>, %arg3: memref<8x1xf32, #tpu.memory_space<vmem>>, %arg4: memref<8x128xf32, #tpu.memory_space<vmem>>) attributes {dimension_semantics = [#tpu.dimension_semantics<parallel>], iteration_bounds = array<i64: 1>, scalar_prefetch = 0 : i64, scratch_operands = 0 : i64, tpu.core_type = #tpu.core_type<tc>, window_params = [{pipeline_mode = #tpu.pipeline_mode<synchronous>, transform_indices = @transform_0, window_bounds = array<i64: 8, 288>}, {transform_indices = @transform_1, window_bounds = array<i64: 288, 128>}, {pipeline_mode = #tpu.pipeline_mode<synchronous>, transform_indices = @transform_2, window_bounds = array<i64: 8, 1>}, {transform_indices = @transform_3, window_bounds = array<i64: 8, 128>}]} {
    %c0 = arith.constant 0 : index
    %c0_0 = arith.constant 0 : index
    %0 = vector.load %arg1[%c0, %c0_0] : memref<8x288xbf16, #tpu.memory_space<vmem>>, vector<8x288xbf16>
    %c0_1 = arith.constant 0 : index
    %c0_2 = arith.constant 0 : index
    %1 = vector.load %arg2[%c0_1, %c0_2] : memref<288x128xbf16, #tpu.memory_space<vmem>>, vector<288x128xbf16>
    %cst = arith.constant dense<0.000000e+00> : vector<8x128xf32>
    %2 = tpu.matmul %0, %1, %cst {dimension_numbers = #tpu.dot_dimension_numbers<[1], [0], [0], [1], [0, 0, 1, 1], [], []>} : vector<8x288xbf16>, vector<288x128xbf16>, vector<8x128xf32> -> vector<8x128xf32>
    %c0_3 = arith.constant 0 : index
    %c0_4 = arith.constant 0 : index
    %3 = vector.load %arg3[%c0_3, %c0_4] : memref<8x1xf32, #tpu.memory_space<vmem>>, vector<8x1xf32>
    %4 = vector.broadcast %3 : vector<8x1xf32> to vector<8x128xf32>
    %5 = arith.addf %2, %4 : vector<8x128xf32>
    %c0_5 = arith.constant 0 : index
    %c0_6 = arith.constant 0 : index
    %6 = vector.load %arg4[%c0_5, %c0_6] : memref<8x128xf32, #tpu.memory_space<vmem>>, vector<8x128xf32>
    tpu.vector_store %arg4[%c0_5, %c0_6], %5 {strides = array<i32>} : memref<8x128xf32, #tpu.memory_space<vmem>>, vector<8x128xf32>,
    return
  }
  func.func @transform_0(%arg0: i32) -> (i32, i32) {
    %c0_i32 = arith.constant 0 : i32
    %c0_i32_0 = arith.constant 0 : i32
    %c0_i32_1 = arith.constant 0 : i32
    return %c0_i32, %c0_i32_0 : i32, i32
  }
  func.func @transform_1(%arg0: i32) -> (i32, i32) {
    %c0_i32 = arith.constant 0 : i32
    %c0_i32_0 = arith.constant 0 : i32
    return %c0_i32, %arg0 : i32, i32
  }
  func.func @transform_2(%arg0: i32) -> (i32, i32) {
    %c0_i32 = arith.constant 0 : i32
    %c0_i32_0 = arith.constant 0 : i32
    %c0_i32_1 = arith.constant 0 : i32
    return %c0_i32, %c0_i32_0 : i32, i32
  }
  func.func @transform_3(%arg0: i32) -> (i32, i32) {
    %c0_i32 = arith.constant 0 : i32
    %c0_i32_0 = arith.constant 0 : i32
    return %c0_i32, %arg0 : i32, i32
  }
}

module attributes {stable_mosaic.version = 11 : i64} {
  func.func @_conv_mm_kernel(%arg0: i32, %arg1: memref<32x288xbf16, #tpu.memory_space<vmem>>, %arg2: memref<288x128xbf16, #tpu.memory_space<vmem>>, %arg3: memref<32x1xf32, #tpu.memory_space<vmem>>, %arg4: memref<32x128xbf16, #tpu.memory_space<vmem>>, %arg5: memref<32x128xf32, #tpu.memory_space<vmem>>) attributes {dimension_semantics = [#tpu.dimension_semantics<parallel>], iteration_bounds = array<i64: 1>, scalar_prefetch = 0 : i64, scratch_operands = 0 : i64, tpu.core_type = #tpu.core_type<tc>, window_params = [{pipeline_mode = #tpu.pipeline_mode<synchronous>, transform_indices = @transform_0, window_bounds = array<i64: 32, 288>}, {transform_indices = @transform_1, window_bounds = array<i64: 288, 128>}, {pipeline_mode = #tpu.pipeline_mode<synchronous>, transform_indices = @transform_2, window_bounds = array<i64: 32, 1>}, {transform_indices = @transform_3, window_bounds = array<i64: 32, 128>}, {transform_indices = @transform_4, window_bounds = array<i64: 32, 128>}]} {
    %c0 = arith.constant 0 : index
    %c0_0 = arith.constant 0 : index
    %0 = vector.load %arg1[%c0, %c0_0] : memref<32x288xbf16, #tpu.memory_space<vmem>>, vector<32x288xbf16>
    %c0_1 = arith.constant 0 : index
    %c0_2 = arith.constant 0 : index
    %1 = vector.load %arg2[%c0_1, %c0_2] : memref<288x128xbf16, #tpu.memory_space<vmem>>, vector<288x128xbf16>
    %cst = arith.constant dense<0.000000e+00> : vector<32x128xf32>
    %2 = tpu.matmul %0, %1, %cst {dimension_numbers = #tpu.dot_dimension_numbers<[1], [0], [0], [1], [0, 0, 1, 1], [], []>} : vector<32x288xbf16>, vector<288x128xbf16>, vector<32x128xf32> -> vector<32x128xf32>
    %c0_3 = arith.constant 0 : index
    %c0_4 = arith.constant 0 : index
    %3 = vector.load %arg3[%c0_3, %c0_4] : memref<32x1xf32, #tpu.memory_space<vmem>>, vector<32x1xf32>
    %4 = vector.broadcast %3 : vector<32x1xf32> to vector<32x128xf32>
    %5 = arith.addf %2, %4 : vector<32x128xf32>
    %c0_5 = arith.constant 0 : index
    %c0_6 = arith.constant 0 : index
    %6 = vector.load %arg4[%c0_5, %c0_6] : memref<32x128xbf16, #tpu.memory_space<vmem>>, vector<32x128xbf16>
    %7 = arith.extf %6 : vector<32x128xbf16> to vector<32x128xf32>
    %8 = arith.addf %5, %7 : vector<32x128xf32>
    %c0_7 = arith.constant 0 : index
    %c0_8 = arith.constant 0 : index
    %9 = vector.load %arg5[%c0_7, %c0_8] : memref<32x128xf32, #tpu.memory_space<vmem>>, vector<32x128xf32>
    tpu.vector_store %arg5[%c0_7, %c0_8], %8 {strides = array<i32>} : memref<32x128xf32, #tpu.memory_space<vmem>>, vector<32x128xf32>,
    return
  }
  func.func @transform_0(%arg0: i32) -> (i32, i32) {
    %c0_i32 = arith.constant 0 : i32
    %c0_i32_0 = arith.constant 0 : i32
    %c0_i32_1 = arith.constant 0 : i32
    return %c0_i32, %c0_i32_0 : i32, i32
  }
  func.func @transform_1(%arg0: i32) -> (i32, i32) {
    %c0_i32 = arith.constant 0 : i32
    %c0_i32_0 = arith.constant 0 : i32
    return %c0_i32, %arg0 : i32, i32
  }
  func.func @transform_2(%arg0: i32) -> (i32, i32) {
    %c0_i32 = arith.constant 0 : i32
    %c0_i32_0 = arith.constant 0 : i32
    %c0_i32_1 = arith.constant 0 : i32
    return %c0_i32, %c0_i32_0 : i32, i32
  }
  func.func @transform_3(%arg0: i32) -> (i32, i32) {
    %c0_i32 = arith.constant 0 : i32
    %c0_i32_0 = arith.constant 0 : i32
    return %c0_i32, %arg0 : i32, i32
  }
  func.func @transform_4(%arg0: i32) -> (i32, i32) {
    %c0_i32 = arith.constant 0 : i32
    %c0_i32_0 = arith.constant 0 : i32
    return %c0_i32, %arg0 : i32, i32
  }
}

module attributes {stable_mosaic.version = 11 : i64} {
  func.func @_softmax_merge_kernel(%arg0: i32, %arg1: memref<3x128xf32, #tpu.memory_space<vmem>>, %arg2: memref<32x128xbf16, #tpu.memory_space<vmem>>, %arg3: memref<2x32x128xbf16, #tpu.memory_space<vmem>>, %arg4: memref<3x128xf32, #tpu.memory_space<vmem>>, %arg5: memref<32x128xf32, #tpu.memory_space<vmem>>, %arg6: memref<32x128xf32, #tpu.memory_space<vmem>>) attributes {dimension_semantics = [#tpu.dimension_semantics<parallel>], iteration_bounds = array<i64: 1>, scalar_prefetch = 0 : i64, scratch_operands = 0 : i64, tpu.core_type = #tpu.core_type<tc>, window_params = [{transform_indices = @transform_0, window_bounds = array<i64: 3, 128>}, {transform_indices = @transform_1, window_bounds = array<i64: 32, 128>}, {transform_indices = @transform_2, window_bounds = array<i64: 2, 32, 128>}, {transform_indices = @transform_3, window_bounds = array<i64: 3, 128>}, {transform_indices = @transform_4, window_bounds = array<i64: 32, 128>}, {transform_indices = @transform_5, window_bounds = array<i64: 32, 128>}]} {
    %c0 = arith.constant 0 : index
    %c0_0 = arith.constant 0 : index
    %0 = vector.load %arg1[%c0, %c0_0] : memref<3x128xf32, #tpu.memory_space<vmem>>, vector<3x128xf32>
    %cst = arith.constant dense<0xFF800000> : vector<128xf32>
    %1 = vector.multi_reduction <maximumf>, %0, %cst [0] : vector<3x128xf32> to vector<128xf32>
    %2 = vector.shape_cast %1 : vector<128xf32> to vector<1x128xf32>
    %3 = vector.broadcast %2 : vector<1x128xf32> to vector<3x128xf32>
    %4 = arith.subf %0, %3 : vector<3x128xf32>
    %5 = math.exp %4 : vector<3x128xf32>
    %cst_1 = arith.constant dense<0.000000e+00> : vector<128xf32>
    %6 = vector.multi_reduction <add>, %5, %cst_1 [0] : vector<3x128xf32> to vector<128xf32>
    %7 = vector.shape_cast %6 : vector<128xf32> to vector<1x128xf32>
    %8 = vector.broadcast %7 : vector<1x128xf32> to vector<3x128xf32>
    %9 = arith.divf %5, %8 : vector<3x128xf32>
    %10 = vector.extract_strided_slice %9 {offsets = [0, 0], sizes = [1, 128], strides = [1, 1]} : vector<3x128xf32> to vector<1x128xf32>
    %c0_2 = arith.constant 0 : index
    %c0_3 = arith.constant 0 : index
    %11 = vector.load %arg2[%c0_2, %c0_3] : memref<32x128xbf16, #tpu.memory_space<vmem>>, vector<32x128xbf16>
    %12 = arith.extf %11 : vector<32x128xbf16> to vector<32x128xf32>
    %13 = vector.broadcast %10 : vector<1x128xf32> to vector<32x128xf32>
    %14 = arith.mulf %13, %12 : vector<32x128xf32>
    %c0_4 = arith.constant 0 : index
    %c0_5 = arith.constant 0 : index
    %c0_6 = arith.constant 0 : index
    %15 = vector.load %arg3[%c0_4, %c0_5, %c0_6] : memref<2x32x128xbf16, #tpu.memory_space<vmem>>, vector<1x32x128xbf16>
    %16 = vector.shape_cast %15 : vector<1x32x128xbf16> to vector<32x128xbf16>
    %17 = arith.extf %16 : vector<32x128xbf16> to vector<32x128xf32>
    %18 = vector.extract_strided_slice %9 {offsets = [1, 0], sizes = [1, 128], strides = [1, 1]} : vector<3x128xf32> to vector<1x128xf32>
    %19 = vector.broadcast %18 : vector<1x128xf32> to vector<32x128xf32>
    %20 = arith.mulf %17, %19 : vector<32x128xf32>
    %21 = arith.addf %14, %20 : vector<32x128xf32>
    %c1 = arith.constant 1 : index
    %c0_7 = arith.constant 0 : index
    %c0_8 = arith.constant 0 : index
    %22 = vector.load %arg3[%c1, %c0_7, %c0_8] : memref<2x32x128xbf16, #tpu.memory_space<vmem>>, vector<1x32x128xbf16>
    %23 = vector.shape_cast %22 : vector<1x32x128xbf16> to vector<32x128xbf16>
    %24 = arith.extf %23 : vector<32x128xbf16> to vector<32x128xf32>
    %25 = vector.extract_strided_slice %9 {offsets = [2, 0], sizes = [1, 128], strides = [1, 1]} : vector<3x128xf32> to vector<1x128xf32>
    %26 = vector.broadcast %25 : vector<1x128xf32> to vector<32x128xf32>
    %27 = arith.mulf %24, %26 : vector<32x128xf32>
    %28 = arith.addf %21, %27 : vector<32x128xf32>
    %c0_9 = arith.constant 0 : index
    %c0_10 = arith.constant 0 : index
    %29 = vector.load %arg4[%c0_9, %c0_10] : memref<3x128xf32, #tpu.memory_space<vmem>>, vector<3x128xf32>
    tpu.vector_store %arg4[%c0_9, %c0_10], %9 {strides = array<i32>} : memref<3x128xf32, #tpu.memory_space<vmem>>, vector<3x128xf32>,
    %c0_11 = arith.constant 0 : index
    %c0_12 = arith.constant 0 : index
    %30 = vector.load %arg5[%c0_11, %c0_12] : memref<32x128xf32, #tpu.memory_space<vmem>>, vector<32x128xf32>
    tpu.vector_store %arg5[%c0_11, %c0_12], %28 {strides = array<i32>} : memref<32x128xf32, #tpu.memory_space<vmem>>, vector<32x128xf32>,
    %31 = vector.extract_strided_slice %9 {offsets = [0, 0], sizes = [1, 128], strides = [1, 1]} : vector<3x128xf32> to vector<1x128xf32>
    %32 = vector.broadcast %31 : vector<1x128xf32> to vector<32x128xf32>
    %33 = arith.mulf %32, %28 : vector<32x128xf32>
    %c0_13 = arith.constant 0 : index
    %c0_14 = arith.constant 0 : index
    %34 = vector.load %arg6[%c0_13, %c0_14] : memref<32x128xf32, #tpu.memory_space<vmem>>, vector<32x128xf32>
    tpu.vector_store %arg6[%c0_13, %c0_14], %33 {strides = array<i32>} : memref<32x128xf32, #tpu.memory_space<vmem>>, vector<32x128xf32>,
    return
  }
  func.func @transform_0(%arg0: i32) -> (i32, i32) {
    %c0_i32 = arith.constant 0 : i32
    %c0_i32_0 = arith.constant 0 : i32
    return %c0_i32, %arg0 : i32, i32
  }
  func.func @transform_1(%arg0: i32) -> (i32, i32) {
    %c0_i32 = arith.constant 0 : i32
    %c0_i32_0 = arith.constant 0 : i32
    return %c0_i32, %arg0 : i32, i32
  }
  func.func @transform_2(%arg0: i32) -> (i32, i32, i32) {
    %c0_i32 = arith.constant 0 : i32
    %c0_i32_0 = arith.constant 0 : i32
    %c0_i32_1 = arith.constant 0 : i32
    return %c0_i32, %c0_i32_0, %arg0 : i32, i32, i32
  }
  func.func @transform_3(%arg0: i32) -> (i32, i32) {
    %c0_i32 = arith.constant 0 : i32
    %c0_i32_0 = arith.constant 0 : i32
    return %c0_i32, %arg0 : i32, i32
  }
  func.func @transform_4(%arg0: i32) -> (i32, i32) {
    %c0_i32 = arith.constant 0 : i32
    %c0_i32_0 = arith.constant 0 : i32
    return %c0_i32, %arg0 : i32, i32
  }
  func.func @transform_5(%arg0: i32) -> (i32, i32) {
    %c0_i32 = arith.constant 0 : i32
    %c0_i32_0 = arith.constant 0 : i32
    return %c0_i32, %arg0 : i32, i32
  }
}

module attributes {stable_mosaic.version = 11 : i64} {
  func.func @_conv_mm_kernel(%arg0: i32, %arg1: memref<16x288xbf16, #tpu.memory_space<vmem>>, %arg2: memref<288x128xbf16, #tpu.memory_space<vmem>>, %arg3: memref<16x1xf32, #tpu.memory_space<vmem>>, %arg4: memref<16x128xf32, #tpu.memory_space<vmem>>) attributes {dimension_semantics = [#tpu.dimension_semantics<parallel>], iteration_bounds = array<i64: 1>, scalar_prefetch = 0 : i64, scratch_operands = 0 : i64, tpu.core_type = #tpu.core_type<tc>, window_params = [{pipeline_mode = #tpu.pipeline_mode<synchronous>, transform_indices = @transform_0, window_bounds = array<i64: 16, 288>}, {transform_indices = @transform_1, window_bounds = array<i64: 288, 128>}, {pipeline_mode = #tpu.pipeline_mode<synchronous>, transform_indices = @transform_2, window_bounds = array<i64: 16, 1>}, {transform_indices = @transform_3, window_bounds = array<i64: 16, 128>}]} {
    %c0 = arith.constant 0 : index
    %c0_0 = arith.constant 0 : index
    %0 = vector.load %arg1[%c0, %c0_0] : memref<16x288xbf16, #tpu.memory_space<vmem>>, vector<16x288xbf16>
    %c0_1 = arith.constant 0 : index
    %c0_2 = arith.constant 0 : index
    %1 = vector.load %arg2[%c0_1, %c0_2] : memref<288x128xbf16, #tpu.memory_space<vmem>>, vector<288x128xbf16>
    %cst = arith.constant dense<0.000000e+00> : vector<16x128xf32>
    %2 = tpu.matmul %0, %1, %cst {dimension_numbers = #tpu.dot_dimension_numbers<[1], [0], [0], [1], [0, 0, 1, 1], [], []>} : vector<16x288xbf16>, vector<288x128xbf16>, vector<16x128xf32> -> vector<16x128xf32>
    %c0_3 = arith.constant 0 : index
    %c0_4 = arith.constant 0 : index
    %3 = vector.load %arg3[%c0_3, %c0_4] : memref<16x1xf32, #tpu.memory_space<vmem>>, vector<16x1xf32>
    %4 = vector.broadcast %3 : vector<16x1xf32> to vector<16x128xf32>
    %5 = arith.addf %2, %4 : vector<16x128xf32>
    %c0_5 = arith.constant 0 : index
    %c0_6 = arith.constant 0 : index
    %6 = vector.load %arg4[%c0_5, %c0_6] : memref<16x128xf32, #tpu.memory_space<vmem>>, vector<16x128xf32>
    tpu.vector_store %arg4[%c0_5, %c0_6], %5 {strides = array<i32>} : memref<16x128xf32, #tpu.memory_space<vmem>>, vector<16x128xf32>,
    return
  }
  func.func @transform_0(%arg0: i32) -> (i32, i32) {
    %c0_i32 = arith.constant 0 : i32
    %c0_i32_0 = arith.constant 0 : i32
    %c0_i32_1 = arith.constant 0 : i32
    return %c0_i32, %c0_i32_0 : i32, i32
  }
  func.func @transform_1(%arg0: i32) -> (i32, i32) {
    %c0_i32 = arith.constant 0 : i32
    %c0_i32_0 = arith.constant 0 : i32
    return %c0_i32, %arg0 : i32, i32
  }
  func.func @transform_2(%arg0: i32) -> (i32, i32) {
    %c0_i32 = arith.constant 0 : i32
    %c0_i32_0 = arith.constant 0 : i32
    %c0_i32_1 = arith.constant 0 : i32
    return %c0_i32, %c0_i32_0 : i32, i32
  }
  func.func @transform_3(%arg0: i32) -> (i32, i32) {
    %c0_i32 = arith.constant 0 : i32
    %c0_i32_0 = arith.constant 0 : i32
    return %c0_i32, %arg0 : i32, i32
  }
}

module attributes {stable_mosaic.version = 11 : i64} {
  func.func @_conv_mm_kernel(%arg0: i32, %arg1: memref<16x32xbf16, #tpu.memory_space<vmem>>, %arg2: memref<32x128xbf16, #tpu.memory_space<vmem>>, %arg3: memref<16x1xf32, #tpu.memory_space<vmem>>, %arg4: memref<16x128xf32, #tpu.memory_space<vmem>>) attributes {dimension_semantics = [#tpu.dimension_semantics<parallel>], iteration_bounds = array<i64: 1>, scalar_prefetch = 0 : i64, scratch_operands = 0 : i64, tpu.core_type = #tpu.core_type<tc>, window_params = [{pipeline_mode = #tpu.pipeline_mode<synchronous>, transform_indices = @transform_0, window_bounds = array<i64: 16, 32>}, {transform_indices = @transform_1, window_bounds = array<i64: 32, 128>}, {pipeline_mode = #tpu.pipeline_mode<synchronous>, transform_indices = @transform_2, window_bounds = array<i64: 16, 1>}, {transform_indices = @transform_3, window_bounds = array<i64: 16, 128>}]} {
    %c0 = arith.constant 0 : index
    %c0_0 = arith.constant 0 : index
    %0 = vector.load %arg1[%c0, %c0_0] : memref<16x32xbf16, #tpu.memory_space<vmem>>, vector<16x32xbf16>
    %c0_1 = arith.constant 0 : index
    %c0_2 = arith.constant 0 : index
    %1 = vector.load %arg2[%c0_1, %c0_2] : memref<32x128xbf16, #tpu.memory_space<vmem>>, vector<32x128xbf16>
    %cst = arith.constant dense<0.000000e+00> : vector<16x128xf32>
    %2 = tpu.matmul %0, %1, %cst {dimension_numbers = #tpu.dot_dimension_numbers<[1], [0], [0], [1], [0, 0, 1, 1], [], []>} : vector<16x32xbf16>, vector<32x128xbf16>, vector<16x128xf32> -> vector<16x128xf32>
    %c0_3 = arith.constant 0 : index
    %c0_4 = arith.constant 0 : index
    %3 = vector.load %arg3[%c0_3, %c0_4] : memref<16x1xf32, #tpu.memory_space<vmem>>, vector<16x1xf32>
    %4 = vector.broadcast %3 : vector<16x1xf32> to vector<16x128xf32>
    %5 = arith.addf %2, %4 : vector<16x128xf32>
    %c0_5 = arith.constant 0 : index
    %c0_6 = arith.constant 0 : index
    %6 = vector.load %arg4[%c0_5, %c0_6] : memref<16x128xf32, #tpu.memory_space<vmem>>, vector<16x128xf32>
    tpu.vector_store %arg4[%c0_5, %c0_6], %5 {strides = array<i32>} : memref<16x128xf32, #tpu.memory_space<vmem>>, vector<16x128xf32>,
    return
  }
  func.func @transform_0(%arg0: i32) -> (i32, i32) {
    %c0_i32 = arith.constant 0 : i32
    %c0_i32_0 = arith.constant 0 : i32
    %c0_i32_1 = arith.constant 0 : i32
    return %c0_i32, %c0_i32_0 : i32, i32
  }
  func.func @transform_1(%arg0: i32) -> (i32, i32) {
    %c0_i32 = arith.constant 0 : i32
    %c0_i32_0 = arith.constant 0 : i32
    return %c0_i32, %arg0 : i32, i32
  }
  func.func @transform_2(%arg0: i32) -> (i32, i32) {
    %c0_i32 = arith.constant 0 : i32
    %c0_i32_0 = arith.constant 0 : i32
    %c0_i32_1 = arith.constant 0 : i32
    return %c0_i32, %c0_i32_0 : i32, i32
  }
  func.func @transform_3(%arg0: i32) -> (i32, i32) {
    %c0_i32 = arith.constant 0 : i32
    %c0_i32_0 = arith.constant 0 : i32
    return %c0_i32, %arg0 : i32, i32
  }
}

module attributes {stable_mosaic.version = 11 : i64} {
  func.func @_conv_mm_kernel(%arg0: i32, %arg1: memref<16x144xbf16, #tpu.memory_space<vmem>>, %arg2: memref<144x128xbf16, #tpu.memory_space<vmem>>, %arg3: memref<16x1xf32, #tpu.memory_space<vmem>>, %arg4: memref<16x128xbf16, #tpu.memory_space<vmem>>, %arg5: memref<16x128xf32, #tpu.memory_space<vmem>>) attributes {dimension_semantics = [#tpu.dimension_semantics<parallel>], iteration_bounds = array<i64: 1>, scalar_prefetch = 0 : i64, scratch_operands = 0 : i64, tpu.core_type = #tpu.core_type<tc>, window_params = [{pipeline_mode = #tpu.pipeline_mode<synchronous>, transform_indices = @transform_0, window_bounds = array<i64: 16, 144>}, {transform_indices = @transform_1, window_bounds = array<i64: 144, 128>}, {pipeline_mode = #tpu.pipeline_mode<synchronous>, transform_indices = @transform_2, window_bounds = array<i64: 16, 1>}, {transform_indices = @transform_3, window_bounds = array<i64: 16, 128>}, {transform_indices = @transform_4, window_bounds = array<i64: 16, 128>}]} {
    %c0 = arith.constant 0 : index
    %c0_0 = arith.constant 0 : index
    %0 = vector.load %arg1[%c0, %c0_0] : memref<16x144xbf16, #tpu.memory_space<vmem>>, vector<16x144xbf16>
    %c0_1 = arith.constant 0 : index
    %c0_2 = arith.constant 0 : index
    %1 = vector.load %arg2[%c0_1, %c0_2] : memref<144x128xbf16, #tpu.memory_space<vmem>>, vector<144x128xbf16>
    %cst = arith.constant dense<0.000000e+00> : vector<16x128xf32>
    %2 = tpu.matmul %0, %1, %cst {dimension_numbers = #tpu.dot_dimension_numbers<[1], [0], [0], [1], [0, 0, 1, 1], [], []>} : vector<16x144xbf16>, vector<144x128xbf16>, vector<16x128xf32> -> vector<16x128xf32>
    %c0_3 = arith.constant 0 : index
    %c0_4 = arith.constant 0 : index
    %3 = vector.load %arg3[%c0_3, %c0_4] : memref<16x1xf32, #tpu.memory_space<vmem>>, vector<16x1xf32>
    %4 = vector.broadcast %3 : vector<16x1xf32> to vector<16x128xf32>
    %5 = arith.addf %2, %4 : vector<16x128xf32>
    %c0_5 = arith.constant 0 : index
    %c0_6 = arith.constant 0 : index
    %6 = vector.load %arg4[%c0_5, %c0_6] : memref<16x128xbf16, #tpu.memory_space<vmem>>, vector<16x128xbf16>
    %7 = arith.extf %6 : vector<16x128xbf16> to vector<16x128xf32>
    %8 = arith.addf %5, %7 : vector<16x128xf32>
    %c0_7 = arith.constant 0 : index
    %c0_8 = arith.constant 0 : index
    %9 = vector.load %arg5[%c0_7, %c0_8] : memref<16x128xf32, #tpu.memory_space<vmem>>, vector<16x128xf32>
    tpu.vector_store %arg5[%c0_7, %c0_8], %8 {strides = array<i32>} : memref<16x128xf32, #tpu.memory_space<vmem>>, vector<16x128xf32>,
    return
  }
  func.func @transform_0(%arg0: i32) -> (i32, i32) {
    %c0_i32 = arith.constant 0 : i32
    %c0_i32_0 = arith.constant 0 : i32
    %c0_i32_1 = arith.constant 0 : i32
    return %c0_i32, %c0_i32_0 : i32, i32
  }
  func.func @transform_1(%arg0: i32) -> (i32, i32) {
    %c0_i32 = arith.constant 0 : i32
    %c0_i32_0 = arith.constant 0 : i32
    return %c0_i32, %arg0 : i32, i32
  }
  func.func @transform_2(%arg0: i32) -> (i32, i32) {
    %c0_i32 = arith.constant 0 : i32
    %c0_i32_0 = arith.constant 0 : i32
    %c0_i32_1 = arith.constant 0 : i32
    return %c0_i32, %c0_i32_0 : i32, i32
  }
  func.func @transform_3(%arg0: i32) -> (i32, i32) {
    %c0_i32 = arith.constant 0 : i32
    %c0_i32_0 = arith.constant 0 : i32
    return %c0_i32, %arg0 : i32, i32
  }
  func.func @transform_4(%arg0: i32) -> (i32, i32) {
    %c0_i32 = arith.constant 0 : i32
    %c0_i32_0 = arith.constant 0 : i32
    return %c0_i32, %arg0 : i32, i32
  }
}

module attributes {stable_mosaic.version = 11 : i64} {
  func.func @_conv_mm_kernel(%arg0: i32, %arg1: memref<8x144xbf16, #tpu.memory_space<vmem>>, %arg2: memref<144x128xbf16, #tpu.memory_space<vmem>>, %arg3: memref<8x1xf32, #tpu.memory_space<vmem>>, %arg4: memref<8x128xf32, #tpu.memory_space<vmem>>) attributes {dimension_semantics = [#tpu.dimension_semantics<parallel>], iteration_bounds = array<i64: 1>, scalar_prefetch = 0 : i64, scratch_operands = 0 : i64, tpu.core_type = #tpu.core_type<tc>, window_params = [{pipeline_mode = #tpu.pipeline_mode<synchronous>, transform_indices = @transform_0, window_bounds = array<i64: 8, 144>}, {transform_indices = @transform_1, window_bounds = array<i64: 144, 128>}, {pipeline_mode = #tpu.pipeline_mode<synchronous>, transform_indices = @transform_2, window_bounds = array<i64: 8, 1>}, {transform_indices = @transform_3, window_bounds = array<i64: 8, 128>}]} {
    %c0 = arith.constant 0 : index
    %c0_0 = arith.constant 0 : index
    %0 = vector.load %arg1[%c0, %c0_0] : memref<8x144xbf16, #tpu.memory_space<vmem>>, vector<8x144xbf16>
    %c0_1 = arith.constant 0 : index
    %c0_2 = arith.constant 0 : index
    %1 = vector.load %arg2[%c0_1, %c0_2] : memref<144x128xbf16, #tpu.memory_space<vmem>>, vector<144x128xbf16>
    %cst = arith.constant dense<0.000000e+00> : vector<8x128xf32>
    %2 = tpu.matmul %0, %1, %cst {dimension_numbers = #tpu.dot_dimension_numbers<[1], [0], [0], [1], [0, 0, 1, 1], [], []>} : vector<8x144xbf16>, vector<144x128xbf16>, vector<8x128xf32> -> vector<8x128xf32>
    %c0_3 = arith.constant 0 : index
    %c0_4 = arith.constant 0 : index
    %3 = vector.load %arg3[%c0_3, %c0_4] : memref<8x1xf32, #tpu.memory_space<vmem>>, vector<8x1xf32>
    %4 = vector.broadcast %3 : vector<8x1xf32> to vector<8x128xf32>
    %5 = arith.addf %2, %4 : vector<8x128xf32>
    %c0_5 = arith.constant 0 : index
    %c0_6 = arith.constant 0 : index
    %6 = vector.load %arg4[%c0_5, %c0_6] : memref<8x128xf32, #tpu.memory_space<vmem>>, vector<8x128xf32>
    tpu.vector_store %arg4[%c0_5, %c0_6], %5 {strides = array<i32>} : memref<8x128xf32, #tpu.memory_space<vmem>>, vector<8x128xf32>,
    return
  }
  func.func @transform_0(%arg0: i32) -> (i32, i32) {
    %c0_i32 = arith.constant 0 : i32
    %c0_i32_0 = arith.constant 0 : i32
    %c0_i32_1 = arith.constant 0 : i32
    return %c0_i32, %c0_i32_0 : i32, i32
  }
  func.func @transform_1(%arg0: i32) -> (i32, i32) {
    %c0_i32 = arith.constant 0 : i32
    %c0_i32_0 = arith.constant 0 : i32
    return %c0_i32, %arg0 : i32, i32
  }
  func.func @transform_2(%arg0: i32) -> (i32, i32) {
    %c0_i32 = arith.constant 0 : i32
    %c0_i32_0 = arith.constant 0 : i32
    %c0_i32_1 = arith.constant 0 : i32
    return %c0_i32, %c0_i32_0 : i32, i32
  }
  func.func @transform_3(%arg0: i32) -> (i32, i32) {
    %c0_i32 = arith.constant 0 : i32
    %c0_i32_0 = arith.constant 0 : i32
    return %c0_i32, %arg0 : i32, i32
  }
}

module attributes {stable_mosaic.version = 11 : i64} {
  func.func @_softmax_merge_kernel(%arg0: i32, %arg1: memref<3x128xf32, #tpu.memory_space<vmem>>, %arg2: memref<16x128xbf16, #tpu.memory_space<vmem>>, %arg3: memref<2x16x128xbf16, #tpu.memory_space<vmem>>, %arg4: memref<3x128xf32, #tpu.memory_space<vmem>>, %arg5: memref<16x128xf32, #tpu.memory_space<vmem>>, %arg6: memref<16x128xf32, #tpu.memory_space<vmem>>) attributes {dimension_semantics = [#tpu.dimension_semantics<parallel>], iteration_bounds = array<i64: 1>, scalar_prefetch = 0 : i64, scratch_operands = 0 : i64, tpu.core_type = #tpu.core_type<tc>, window_params = [{transform_indices = @transform_0, window_bounds = array<i64: 3, 128>}, {transform_indices = @transform_1, window_bounds = array<i64: 16, 128>}, {transform_indices = @transform_2, window_bounds = array<i64: 2, 16, 128>}, {transform_indices = @transform_3, window_bounds = array<i64: 3, 128>}, {transform_indices = @transform_4, window_bounds = array<i64: 16, 128>}, {transform_indices = @transform_5, window_bounds = array<i64: 16, 128>}]} {
    %c0 = arith.constant 0 : index
    %c0_0 = arith.constant 0 : index
    %0 = vector.load %arg1[%c0, %c0_0] : memref<3x128xf32, #tpu.memory_space<vmem>>, vector<3x128xf32>
    %cst = arith.constant dense<0xFF800000> : vector<128xf32>
    %1 = vector.multi_reduction <maximumf>, %0, %cst [0] : vector<3x128xf32> to vector<128xf32>
    %2 = vector.shape_cast %1 : vector<128xf32> to vector<1x128xf32>
    %3 = vector.broadcast %2 : vector<1x128xf32> to vector<3x128xf32>
    %4 = arith.subf %0, %3 : vector<3x128xf32>
    %5 = math.exp %4 : vector<3x128xf32>
    %cst_1 = arith.constant dense<0.000000e+00> : vector<128xf32>
    %6 = vector.multi_reduction <add>, %5, %cst_1 [0] : vector<3x128xf32> to vector<128xf32>
    %7 = vector.shape_cast %6 : vector<128xf32> to vector<1x128xf32>
    %8 = vector.broadcast %7 : vector<1x128xf32> to vector<3x128xf32>
    %9 = arith.divf %5, %8 : vector<3x128xf32>
    %10 = vector.extract_strided_slice %9 {offsets = [0, 0], sizes = [1, 128], strides = [1, 1]} : vector<3x128xf32> to vector<1x128xf32>
    %c0_2 = arith.constant 0 : index
    %c0_3 = arith.constant 0 : index
    %11 = vector.load %arg2[%c0_2, %c0_3] : memref<16x128xbf16, #tpu.memory_space<vmem>>, vector<16x128xbf16>
    %12 = arith.extf %11 : vector<16x128xbf16> to vector<16x128xf32>
    %13 = vector.broadcast %10 : vector<1x128xf32> to vector<16x128xf32>
    %14 = arith.mulf %13, %12 : vector<16x128xf32>
    %c0_4 = arith.constant 0 : index
    %c0_5 = arith.constant 0 : index
    %c0_6 = arith.constant 0 : index
    %15 = vector.load %arg3[%c0_4, %c0_5, %c0_6] : memref<2x16x128xbf16, #tpu.memory_space<vmem>>, vector<1x16x128xbf16>
    %16 = vector.shape_cast %15 : vector<1x16x128xbf16> to vector<16x128xbf16>
    %17 = arith.extf %16 : vector<16x128xbf16> to vector<16x128xf32>
    %18 = vector.extract_strided_slice %9 {offsets = [1, 0], sizes = [1, 128], strides = [1, 1]} : vector<3x128xf32> to vector<1x128xf32>
    %19 = vector.broadcast %18 : vector<1x128xf32> to vector<16x128xf32>
    %20 = arith.mulf %17, %19 : vector<16x128xf32>
    %21 = arith.addf %14, %20 : vector<16x128xf32>
    %c1 = arith.constant 1 : index
    %c0_7 = arith.constant 0 : index
    %c0_8 = arith.constant 0 : index
    %22 = vector.load %arg3[%c1, %c0_7, %c0_8] : memref<2x16x128xbf16, #tpu.memory_space<vmem>>, vector<1x16x128xbf16>
    %23 = vector.shape_cast %22 : vector<1x16x128xbf16> to vector<16x128xbf16>
    %24 = arith.extf %23 : vector<16x128xbf16> to vector<16x128xf32>
    %25 = vector.extract_strided_slice %9 {offsets = [2, 0], sizes = [1, 128], strides = [1, 1]} : vector<3x128xf32> to vector<1x128xf32>
    %26 = vector.broadcast %25 : vector<1x128xf32> to vector<16x128xf32>
    %27 = arith.mulf %24, %26 : vector<16x128xf32>
    %28 = arith.addf %21, %27 : vector<16x128xf32>
    %c0_9 = arith.constant 0 : index
    %c0_10 = arith.constant 0 : index
    %29 = vector.load %arg4[%c0_9, %c0_10] : memref<3x128xf32, #tpu.memory_space<vmem>>, vector<3x128xf32>
    tpu.vector_store %arg4[%c0_9, %c0_10], %9 {strides = array<i32>} : memref<3x128xf32, #tpu.memory_space<vmem>>, vector<3x128xf32>,
    %c0_11 = arith.constant 0 : index
    %c0_12 = arith.constant 0 : index
    %30 = vector.load %arg5[%c0_11, %c0_12] : memref<16x128xf32, #tpu.memory_space<vmem>>, vector<16x128xf32>
    tpu.vector_store %arg5[%c0_11, %c0_12], %28 {strides = array<i32>} : memref<16x128xf32, #tpu.memory_space<vmem>>, vector<16x128xf32>,
    %31 = vector.extract_strided_slice %9 {offsets = [0, 0], sizes = [1, 128], strides = [1, 1]} : vector<3x128xf32> to vector<1x128xf32>
    %32 = vector.broadcast %31 : vector<1x128xf32> to vector<16x128xf32>
    %33 = arith.mulf %32, %28 : vector<16x128xf32>
    %c0_13 = arith.constant 0 : index
    %c0_14 = arith.constant 0 : index
    %34 = vector.load %arg6[%c0_13, %c0_14] : memref<16x128xf32, #tpu.memory_space<vmem>>, vector<16x128xf32>
    tpu.vector_store %arg6[%c0_13, %c0_14], %33 {strides = array<i32>} : memref<16x128xf32, #tpu.memory_space<vmem>>, vector<16x128xf32>,
    return
  }
  func.func @transform_0(%arg0: i32) -> (i32, i32) {
    %c0_i32 = arith.constant 0 : i32
    %c0_i32_0 = arith.constant 0 : i32
    return %c0_i32, %arg0 : i32, i32
  }
  func.func @transform_1(%arg0: i32) -> (i32, i32) {
    %c0_i32 = arith.constant 0 : i32
    %c0_i32_0 = arith.constant 0 : i32
    return %c0_i32, %arg0 : i32, i32
  }
  func.func @transform_2(%arg0: i32) -> (i32, i32, i32) {
    %c0_i32 = arith.constant 0 : i32
    %c0_i32_0 = arith.constant 0 : i32
    %c0_i32_1 = arith.constant 0 : i32
    return %c0_i32, %c0_i32_0, %arg0 : i32, i32, i32
  }
  func.func @transform_3(%arg0: i32) -> (i32, i32) {
    %c0_i32 = arith.constant 0 : i32
    %c0_i32_0 = arith.constant 0 : i32
    return %c0_i32, %arg0 : i32, i32
  }
  func.func @transform_4(%arg0: i32) -> (i32, i32) {
    %c0_i32 = arith.constant 0 : i32
    %c0_i32_0 = arith.constant 0 : i32
    return %c0_i32, %arg0 : i32, i32
  }
  func.func @transform_5(%arg0: i32) -> (i32, i32) {
    %c0_i32 = arith.constant 0 : i32
    %c0_i32_0 = arith.constant 0 : i32
    return %c0_i32, %arg0 : i32, i32
  }
}

module attributes {stable_mosaic.version = 11 : i64} {
  func.func @_conv_mm_kernel(%arg0: i32, %arg1: memref<8x144xbf16, #tpu.memory_space<vmem>>, %arg2: memref<144x512xbf16, #tpu.memory_space<vmem>>, %arg3: memref<8x1xf32, #tpu.memory_space<vmem>>, %arg4: memref<8x512xf32, #tpu.memory_space<vmem>>) attributes {dimension_semantics = [#tpu.dimension_semantics<parallel>], iteration_bounds = array<i64: 1>, scalar_prefetch = 0 : i64, scratch_operands = 0 : i64, tpu.core_type = #tpu.core_type<tc>, window_params = [{pipeline_mode = #tpu.pipeline_mode<synchronous>, transform_indices = @transform_0, window_bounds = array<i64: 8, 144>}, {transform_indices = @transform_1, window_bounds = array<i64: 144, 512>}, {pipeline_mode = #tpu.pipeline_mode<synchronous>, transform_indices = @transform_2, window_bounds = array<i64: 8, 1>}, {transform_indices = @transform_3, window_bounds = array<i64: 8, 512>}]} {
    %c0 = arith.constant 0 : index
    %c0_0 = arith.constant 0 : index
    %0 = vector.load %arg1[%c0, %c0_0] : memref<8x144xbf16, #tpu.memory_space<vmem>>, vector<8x144xbf16>
    %c0_1 = arith.constant 0 : index
    %c0_2 = arith.constant 0 : index
    %1 = vector.load %arg2[%c0_1, %c0_2] : memref<144x512xbf16, #tpu.memory_space<vmem>>, vector<144x512xbf16>
    %cst = arith.constant dense<0.000000e+00> : vector<8x512xf32>
    %2 = tpu.matmul %0, %1, %cst {dimension_numbers = #tpu.dot_dimension_numbers<[1], [0], [0], [1], [0, 0, 1, 1], [], []>} : vector<8x144xbf16>, vector<144x512xbf16>, vector<8x512xf32> -> vector<8x512xf32>
    %c0_3 = arith.constant 0 : index
    %c0_4 = arith.constant 0 : index
    %3 = vector.load %arg3[%c0_3, %c0_4] : memref<8x1xf32, #tpu.memory_space<vmem>>, vector<8x1xf32>
    %4 = vector.broadcast %3 : vector<8x1xf32> to vector<8x512xf32>
    %5 = arith.addf %2, %4 : vector<8x512xf32>
    %c0_5 = arith.constant 0 : index
    %c0_6 = arith.constant 0 : index
    %6 = vector.load %arg4[%c0_5, %c0_6] : memref<8x512xf32, #tpu.memory_space<vmem>>, vector<8x512xf32>
    tpu.vector_store %arg4[%c0_5, %c0_6], %5 {strides = array<i32>} : memref<8x512xf32, #tpu.memory_space<vmem>>, vector<8x512xf32>,
    return
  }
  func.func @transform_0(%arg0: i32) -> (i32, i32) {
    %c0_i32 = arith.constant 0 : i32
    %c0_i32_0 = arith.constant 0 : i32
    %c0_i32_1 = arith.constant 0 : i32
    return %c0_i32, %c0_i32_0 : i32, i32
  }
  func.func @transform_1(%arg0: i32) -> (i32, i32) {
    %c0_i32 = arith.constant 0 : i32
    %c0_i32_0 = arith.constant 0 : i32
    return %c0_i32, %arg0 : i32, i32
  }
  func.func @transform_2(%arg0: i32) -> (i32, i32) {
    %c0_i32 = arith.constant 0 : i32
    %c0_i32_0 = arith.constant 0 : i32
    %c0_i32_1 = arith.constant 0 : i32
    return %c0_i32, %c0_i32_0 : i32, i32
  }
  func.func @transform_3(%arg0: i32) -> (i32, i32) {
    %c0_i32 = arith.constant 0 : i32
    %c0_i32_0 = arith.constant 0 : i32
    return %c0_i32, %arg0 : i32, i32
  }
}

module attributes {stable_mosaic.version = 11 : i64} {
  func.func @_conv_mm_kernel(%arg0: i32, %arg1: memref<8x16xbf16, #tpu.memory_space<vmem>>, %arg2: memref<16x128xbf16, #tpu.memory_space<vmem>>, %arg3: memref<8x1xf32, #tpu.memory_space<vmem>>, %arg4: memref<8x128xf32, #tpu.memory_space<vmem>>) attributes {dimension_semantics = [#tpu.dimension_semantics<parallel>], iteration_bounds = array<i64: 1>, scalar_prefetch = 0 : i64, scratch_operands = 0 : i64, tpu.core_type = #tpu.core_type<tc>, window_params = [{pipeline_mode = #tpu.pipeline_mode<synchronous>, transform_indices = @transform_0, window_bounds = array<i64: 8, 16>}, {transform_indices = @transform_1, window_bounds = array<i64: 16, 128>}, {pipeline_mode = #tpu.pipeline_mode<synchronous>, transform_indices = @transform_2, window_bounds = array<i64: 8, 1>}, {transform_indices = @transform_3, window_bounds = array<i64: 8, 128>}]} {
    %c0 = arith.constant 0 : index
    %c0_0 = arith.constant 0 : index
    %0 = vector.load %arg1[%c0, %c0_0] : memref<8x16xbf16, #tpu.memory_space<vmem>>, vector<8x16xbf16>
    %c0_1 = arith.constant 0 : index
    %c0_2 = arith.constant 0 : index
    %1 = vector.load %arg2[%c0_1, %c0_2] : memref<16x128xbf16, #tpu.memory_space<vmem>>, vector<16x128xbf16>
    %cst = arith.constant dense<0.000000e+00> : vector<8x128xf32>
    %2 = tpu.matmul %0, %1, %cst {dimension_numbers = #tpu.dot_dimension_numbers<[1], [0], [0], [1], [0, 0, 1, 1], [], []>} : vector<8x16xbf16>, vector<16x128xbf16>, vector<8x128xf32> -> vector<8x128xf32>
    %c0_3 = arith.constant 0 : index
    %c0_4 = arith.constant 0 : index
    %3 = vector.load %arg3[%c0_3, %c0_4] : memref<8x1xf32, #tpu.memory_space<vmem>>, vector<8x1xf32>
    %4 = vector.broadcast %3 : vector<8x1xf32> to vector<8x128xf32>
    %5 = arith.addf %2, %4 : vector<8x128xf32>
    %c0_5 = arith.constant 0 : index
    %c0_6 = arith.constant 0 : index
    %6 = vector.load %arg4[%c0_5, %c0_6] : memref<8x128xf32, #tpu.memory_space<vmem>>, vector<8x128xf32>
    tpu.vector_store %arg4[%c0_5, %c0_6], %5 {strides = array<i32>} : memref<8x128xf32, #tpu.memory_space<vmem>>, vector<8x128xf32>,
    return
  }
  func.func @transform_0(%arg0: i32) -> (i32, i32) {
    %c0_i32 = arith.constant 0 : i32
    %c0_i32_0 = arith.constant 0 : i32
    %c0_i32_1 = arith.constant 0 : i32
    return %c0_i32, %c0_i32_0 : i32, i32
  }
  func.func @transform_1(%arg0: i32) -> (i32, i32) {
    %c0_i32 = arith.constant 0 : i32
    %c0_i32_0 = arith.constant 0 : i32
    return %c0_i32, %arg0 : i32, i32
  }
  func.func @transform_2(%arg0: i32) -> (i32, i32) {
    %c0_i32 = arith.constant 0 : i32
    %c0_i32_0 = arith.constant 0 : i32
    %c0_i32_1 = arith.constant 0 : i32
    return %c0_i32, %c0_i32_0 : i32, i32
  }
  func.func @transform_3(%arg0: i32) -> (i32, i32) {
    %c0_i32 = arith.constant 0 : i32
    %c0_i32_0 = arith.constant 0 : i32
    return %c0_i32, %arg0 : i32, i32
  }
}

module attributes {stable_mosaic.version = 11 : i64} {
  func.func @_conv_mm_kernel(%arg0: i32, %arg1: memref<8x72xbf16, #tpu.memory_space<vmem>>, %arg2: memref<72x512xbf16, #tpu.memory_space<vmem>>, %arg3: memref<8x1xf32, #tpu.memory_space<vmem>>, %arg4: memref<8x512xbf16, #tpu.memory_space<vmem>>, %arg5: memref<8x512xf32, #tpu.memory_space<vmem>>) attributes {dimension_semantics = [#tpu.dimension_semantics<parallel>], iteration_bounds = array<i64: 1>, scalar_prefetch = 0 : i64, scratch_operands = 0 : i64, tpu.core_type = #tpu.core_type<tc>, window_params = [{pipeline_mode = #tpu.pipeline_mode<synchronous>, transform_indices = @transform_0, window_bounds = array<i64: 8, 72>}, {transform_indices = @transform_1, window_bounds = array<i64: 72, 512>}, {pipeline_mode = #tpu.pipeline_mode<synchronous>, transform_indices = @transform_2, window_bounds = array<i64: 8, 1>}, {transform_indices = @transform_3, window_bounds = array<i64: 8, 512>}, {transform_indices = @transform_4, window_bounds = array<i64: 8, 512>}]} {
    %c0 = arith.constant 0 : index
    %c0_0 = arith.constant 0 : index
    %0 = vector.load %arg1[%c0, %c0_0] : memref<8x72xbf16, #tpu.memory_space<vmem>>, vector<8x72xbf16>
    %c0_1 = arith.constant 0 : index
    %c0_2 = arith.constant 0 : index
    %1 = vector.load %arg2[%c0_1, %c0_2] : memref<72x512xbf16, #tpu.memory_space<vmem>>, vector<72x512xbf16>
    %cst = arith.constant dense<0.000000e+00> : vector<8x512xf32>
    %2 = tpu.matmul %0, %1, %cst {dimension_numbers = #tpu.dot_dimension_numbers<[1], [0], [0], [1], [0, 0, 1, 1], [], []>} : vector<8x72xbf16>, vector<72x512xbf16>, vector<8x512xf32> -> vector<8x512xf32>
    %c0_3 = arith.constant 0 : index
    %c0_4 = arith.constant 0 : index
    %3 = vector.load %arg3[%c0_3, %c0_4] : memref<8x1xf32, #tpu.memory_space<vmem>>, vector<8x1xf32>
    %4 = vector.broadcast %3 : vector<8x1xf32> to vector<8x512xf32>
    %5 = arith.addf %2, %4 : vector<8x512xf32>
    %c0_5 = arith.constant 0 : index
    %c0_6 = arith.constant 0 : index
    %6 = vector.load %arg4[%c0_5, %c0_6] : memref<8x512xbf16, #tpu.memory_space<vmem>>, vector<8x512xbf16>
    %7 = arith.extf %6 : vector<8x512xbf16> to vector<8x512xf32>
    %8 = arith.addf %5, %7 : vector<8x512xf32>
    %c0_7 = arith.constant 0 : index
    %c0_8 = arith.constant 0 : index
    %9 = vector.load %arg5[%c0_7, %c0_8] : memref<8x512xf32, #tpu.memory_space<vmem>>, vector<8x512xf32>
    tpu.vector_store %arg5[%c0_7, %c0_8], %8 {strides = array<i32>} : memref<8x512xf32, #tpu.memory_space<vmem>>, vector<8x512xf32>,
    return
  }
  func.func @transform_0(%arg0: i32) -> (i32, i32) {
    %c0_i32 = arith.constant 0 : i32
    %c0_i32_0 = arith.constant 0 : i32
    %c0_i32_1 = arith.constant 0 : i32
    return %c0_i32, %c0_i32_0 : i32, i32
  }
  func.func @transform_1(%arg0: i32) -> (i32, i32) {
    %c0_i32 = arith.constant 0 : i32
    %c0_i32_0 = arith.constant 0 : i32
    return %c0_i32, %arg0 : i32, i32
  }
  func.func @transform_2(%arg0: i32) -> (i32, i32) {
    %c0_i32 = arith.constant 0 : i32
    %c0_i32_0 = arith.constant 0 : i32
    %c0_i32_1 = arith.constant 0 : i32
    return %c0_i32, %c0_i32_0 : i32, i32
  }
  func.func @transform_3(%arg0: i32) -> (i32, i32) {
    %c0_i32 = arith.constant 0 : i32
    %c0_i32_0 = arith.constant 0 : i32
    return %c0_i32, %arg0 : i32, i32
  }
  func.func @transform_4(%arg0: i32) -> (i32, i32) {
    %c0_i32 = arith.constant 0 : i32
    %c0_i32_0 = arith.constant 0 : i32
    return %c0_i32, %arg0 : i32, i32
  }
}

module attributes {stable_mosaic.version = 11 : i64} {
  func.func @_conv_mm_kernel(%arg0: i32, %arg1: memref<8x72xbf16, #tpu.memory_space<vmem>>, %arg2: memref<72x2048xbf16, #tpu.memory_space<vmem>>, %arg3: memref<8x1xf32, #tpu.memory_space<vmem>>, %arg4: memref<8x2048xf32, #tpu.memory_space<vmem>>) attributes {dimension_semantics = [#tpu.dimension_semantics<parallel>], iteration_bounds = array<i64: 1>, scalar_prefetch = 0 : i64, scratch_operands = 0 : i64, tpu.core_type = #tpu.core_type<tc>, window_params = [{pipeline_mode = #tpu.pipeline_mode<synchronous>, transform_indices = @transform_0, window_bounds = array<i64: 8, 72>}, {transform_indices = @transform_1, window_bounds = array<i64: 72, 2048>}, {pipeline_mode = #tpu.pipeline_mode<synchronous>, transform_indices = @transform_2, window_bounds = array<i64: 8, 1>}, {transform_indices = @transform_3, window_bounds = array<i64: 8, 2048>}]} {
    %c0 = arith.constant 0 : index
    %c0_0 = arith.constant 0 : index
    %0 = vector.load %arg1[%c0, %c0_0] : memref<8x72xbf16, #tpu.memory_space<vmem>>, vector<8x72xbf16>
    %c0_1 = arith.constant 0 : index
    %c0_2 = arith.constant 0 : index
    %1 = vector.load %arg2[%c0_1, %c0_2] : memref<72x2048xbf16, #tpu.memory_space<vmem>>, vector<72x2048xbf16>
    %cst = arith.constant dense<0.000000e+00> : vector<8x2048xf32>
    %2 = tpu.matmul %0, %1, %cst {dimension_numbers = #tpu.dot_dimension_numbers<[1], [0], [0], [1], [0, 0, 1, 1], [], []>} : vector<8x72xbf16>, vector<72x2048xbf16>, vector<8x2048xf32> -> vector<8x2048xf32>
    %c0_3 = arith.constant 0 : index
    %c0_4 = arith.constant 0 : index
    %3 = vector.load %arg3[%c0_3, %c0_4] : memref<8x1xf32, #tpu.memory_space<vmem>>, vector<8x1xf32>
    %4 = vector.broadcast %3 : vector<8x1xf32> to vector<8x2048xf32>
    %5 = arith.addf %2, %4 : vector<8x2048xf32>
    %c0_5 = arith.constant 0 : index
    %c0_6 = arith.constant 0 : index
    %6 = vector.load %arg4[%c0_5, %c0_6] : memref<8x2048xf32, #tpu.memory_space<vmem>>, vector<8x2048xf32>
    tpu.vector_store %arg4[%c0_5, %c0_6], %5 {strides = array<i32>} : memref<8x2048xf32, #tpu.memory_space<vmem>>, vector<8x2048xf32>,
    return
  }
  func.func @transform_0(%arg0: i32) -> (i32, i32) {
    %c0_i32 = arith.constant 0 : i32
    %c0_i32_0 = arith.constant 0 : i32
    %c0_i32_1 = arith.constant 0 : i32
    return %c0_i32, %c0_i32_0 : i32, i32
  }
  func.func @transform_1(%arg0: i32) -> (i32, i32) {
    %c0_i32 = arith.constant 0 : i32
    %c0_i32_0 = arith.constant 0 : i32
    return %c0_i32, %arg0 : i32, i32
  }
  func.func @transform_2(%arg0: i32) -> (i32, i32) {
    %c0_i32 = arith.constant 0 : i32
    %c0_i32_0 = arith.constant 0 : i32
    %c0_i32_1 = arith.constant 0 : i32
    return %c0_i32, %c0_i32_0 : i32, i32
  }
  func.func @transform_3(%arg0: i32) -> (i32, i32) {
    %c0_i32 = arith.constant 0 : i32
    %c0_i32_0 = arith.constant 0 : i32
    return %c0_i32, %arg0 : i32, i32
  }
}

module attributes {stable_mosaic.version = 11 : i64} {
  func.func @_conv_mm_kernel(%arg0: i32, %arg1: memref<8x8xbf16, #tpu.memory_space<vmem>>, %arg2: memref<8x512xbf16, #tpu.memory_space<vmem>>, %arg3: memref<8x1xf32, #tpu.memory_space<vmem>>, %arg4: memref<8x512xf32, #tpu.memory_space<vmem>>) attributes {dimension_semantics = [#tpu.dimension_semantics<parallel>], iteration_bounds = array<i64: 1>, scalar_prefetch = 0 : i64, scratch_operands = 0 : i64, tpu.core_type = #tpu.core_type<tc>, window_params = [{pipeline_mode = #tpu.pipeline_mode<synchronous>, transform_indices = @transform_0, window_bounds = array<i64: 8, 8>}, {transform_indices = @transform_1, window_bounds = array<i64: 8, 512>}, {pipeline_mode = #tpu.pipeline_mode<synchronous>, transform_indices = @transform_2, window_bounds = array<i64: 8, 1>}, {transform_indices = @transform_3, window_bounds = array<i64: 8, 512>}]} {
    %c0 = arith.constant 0 : index
    %c0_0 = arith.constant 0 : index
    %0 = vector.load %arg1[%c0, %c0_0] : memref<8x8xbf16, #tpu.memory_space<vmem>>, vector<8x8xbf16>
    %c0_1 = arith.constant 0 : index
    %c0_2 = arith.constant 0 : index
    %1 = vector.load %arg2[%c0_1, %c0_2] : memref<8x512xbf16, #tpu.memory_space<vmem>>, vector<8x512xbf16>
    %cst = arith.constant dense<0.000000e+00> : vector<8x512xf32>
    %2 = tpu.matmul %0, %1, %cst {dimension_numbers = #tpu.dot_dimension_numbers<[1], [0], [0], [1], [0, 0, 1, 1], [], []>} : vector<8x8xbf16>, vector<8x512xbf16>, vector<8x512xf32> -> vector<8x512xf32>
    %c0_3 = arith.constant 0 : index
    %c0_4 = arith.constant 0 : index
    %3 = vector.load %arg3[%c0_3, %c0_4] : memref<8x1xf32, #tpu.memory_space<vmem>>, vector<8x1xf32>
    %4 = vector.broadcast %3 : vector<8x1xf32> to vector<8x512xf32>
    %5 = arith.addf %2, %4 : vector<8x512xf32>
    %c0_5 = arith.constant 0 : index
    %c0_6 = arith.constant 0 : index
    %6 = vector.load %arg4[%c0_5, %c0_6] : memref<8x512xf32, #tpu.memory_space<vmem>>, vector<8x512xf32>
    tpu.vector_store %arg4[%c0_5, %c0_6], %5 {strides = array<i32>} : memref<8x512xf32, #tpu.memory_space<vmem>>, vector<8x512xf32>,
    return
  }
  func.func @transform_0(%arg0: i32) -> (i32, i32) {
    %c0_i32 = arith.constant 0 : i32
    %c0_i32_0 = arith.constant 0 : i32
    %c0_i32_1 = arith.constant 0 : i32
    return %c0_i32, %c0_i32_0 : i32, i32
  }
  func.func @transform_1(%arg0: i32) -> (i32, i32) {
    %c0_i32 = arith.constant 0 : i32
    %c0_i32_0 = arith.constant 0 : i32
    return %c0_i32, %arg0 : i32, i32
  }
  func.func @transform_2(%arg0: i32) -> (i32, i32) {
    %c0_i32 = arith.constant 0 : i32
    %c0_i32_0 = arith.constant 0 : i32
    %c0_i32_1 = arith.constant 0 : i32
    return %c0_i32, %c0_i32_0 : i32, i32
  }
  func.func @transform_3(%arg0: i32) -> (i32, i32) {
    %c0_i32 = arith.constant 0 : i32
    %c0_i32_0 = arith.constant 0 : i32
    return %c0_i32, %arg0 : i32, i32
  }
}

module attributes {stable_mosaic.version = 11 : i64} {
  func.func @_conv_mm_kernel(%arg0: i32, %arg1: memref<8x72xbf16, #tpu.memory_space<vmem>>, %arg2: memref<72x2048xbf16, #tpu.memory_space<vmem>>, %arg3: memref<8x1xf32, #tpu.memory_space<vmem>>, %arg4: memref<8x2048xbf16, #tpu.memory_space<vmem>>, %arg5: memref<8x2048xf32, #tpu.memory_space<vmem>>) attributes {dimension_semantics = [#tpu.dimension_semantics<parallel>], iteration_bounds = array<i64: 1>, scalar_prefetch = 0 : i64, scratch_operands = 0 : i64, tpu.core_type = #tpu.core_type<tc>, window_params = [{pipeline_mode = #tpu.pipeline_mode<synchronous>, transform_indices = @transform_0, window_bounds = array<i64: 8, 72>}, {transform_indices = @transform_1, window_bounds = array<i64: 72, 2048>}, {pipeline_mode = #tpu.pipeline_mode<synchronous>, transform_indices = @transform_2, window_bounds = array<i64: 8, 1>}, {transform_indices = @transform_3, window_bounds = array<i64: 8, 2048>}, {transform_indices = @transform_4, window_bounds = array<i64: 8, 2048>}]} {
    %c0 = arith.constant 0 : index
    %c0_0 = arith.constant 0 : index
    %0 = vector.load %arg1[%c0, %c0_0] : memref<8x72xbf16, #tpu.memory_space<vmem>>, vector<8x72xbf16>
    %c0_1 = arith.constant 0 : index
    %c0_2 = arith.constant 0 : index
    %1 = vector.load %arg2[%c0_1, %c0_2] : memref<72x2048xbf16, #tpu.memory_space<vmem>>, vector<72x2048xbf16>
    %cst = arith.constant dense<0.000000e+00> : vector<8x2048xf32>
    %2 = tpu.matmul %0, %1, %cst {dimension_numbers = #tpu.dot_dimension_numbers<[1], [0], [0], [1], [0, 0, 1, 1], [], []>} : vector<8x72xbf16>, vector<72x2048xbf16>, vector<8x2048xf32> -> vector<8x2048xf32>
    %c0_3 = arith.constant 0 : index
    %c0_4 = arith.constant 0 : index
    %3 = vector.load %arg3[%c0_3, %c0_4] : memref<8x1xf32, #tpu.memory_space<vmem>>, vector<8x1xf32>
    %4 = vector.broadcast %3 : vector<8x1xf32> to vector<8x2048xf32>
    %5 = arith.addf %2, %4 : vector<8x2048xf32>
    %c0_5 = arith.constant 0 : index
    %c0_6 = arith.constant 0 : index
    %6 = vector.load %arg4[%c0_5, %c0_6] : memref<8x2048xbf16, #tpu.memory_space<vmem>>, vector<8x2048xbf16>
    %7 = arith.extf %6 : vector<8x2048xbf16> to vector<8x2048xf32>
    %8 = arith.addf %5, %7 : vector<8x2048xf32>
    %c0_7 = arith.constant 0 : index
    %c0_8 = arith.constant 0 : index
    %9 = vector.load %arg5[%c0_7, %c0_8] : memref<8x2048xf32, #tpu.memory_space<vmem>>, vector<8x2048xf32>
    tpu.vector_store %arg5[%c0_7, %c0_8], %8 {strides = array<i32>} : memref<8x2048xf32, #tpu.memory_space<vmem>>, vector<8x2048xf32>,
    return
  }
  func.func @transform_0(%arg0: i32) -> (i32, i32) {
    %c0_i32 = arith.constant 0 : i32
    %c0_i32_0 = arith.constant 0 : i32
    %c0_i32_1 = arith.constant 0 : i32
    return %c0_i32, %c0_i32_0 : i32, i32
  }
  func.func @transform_1(%arg0: i32) -> (i32, i32) {
    %c0_i32 = arith.constant 0 : i32
    %c0_i32_0 = arith.constant 0 : i32
    return %c0_i32, %arg0 : i32, i32
  }
  func.func @transform_2(%arg0: i32) -> (i32, i32) {
    %c0_i32 = arith.constant 0 : i32
    %c0_i32_0 = arith.constant 0 : i32
    %c0_i32_1 = arith.constant 0 : i32
    return %c0_i32, %c0_i32_0 : i32, i32
  }
  func.func @transform_3(%arg0: i32) -> (i32, i32) {
    %c0_i32 = arith.constant 0 : i32
    %c0_i32_0 = arith.constant 0 : i32
    return %c0_i32, %arg0 : i32, i32
  }
  func.func @transform_4(%arg0: i32) -> (i32, i32) {
    %c0_i32 = arith.constant 0 : i32
    %c0_i32_0 = arith.constant 0 : i32
    return %c0_i32, %arg0 : i32, i32
  }
}

module attributes {stable_mosaic.version = 11 : i64} {
  func.func @_conv_mm_kernel(%arg0: i32, %arg1: memref<8x72xbf16, #tpu.memory_space<vmem>>, %arg2: memref<72x2048xbf16, #tpu.memory_space<vmem>>, %arg3: memref<8x1xf32, #tpu.memory_space<vmem>>, %arg4: memref<8x2048xf32, #tpu.memory_space<vmem>>) attributes {dimension_semantics = [#tpu.dimension_semantics<parallel>], iteration_bounds = array<i64: 1>, scalar_prefetch = 0 : i64, scratch_operands = 0 : i64, tpu.core_type = #tpu.core_type<tc>, window_params = [{pipeline_mode = #tpu.pipeline_mode<synchronous>, transform_indices = @transform_0, window_bounds = array<i64: 8, 72>}, {transform_indices = @transform_1, window_bounds = array<i64: 72, 2048>}, {pipeline_mode = #tpu.pipeline_mode<synchronous>, transform_indices = @transform_2, window_bounds = array<i64: 8, 1>}, {transform_indices = @transform_3, window_bounds = array<i64: 8, 2048>}]} {
    %c0 = arith.constant 0 : index
    %c0_0 = arith.constant 0 : index
    %0 = vector.load %arg1[%c0, %c0_0] : memref<8x72xbf16, #tpu.memory_space<vmem>>, vector<8x72xbf16>
    %c0_1 = arith.constant 0 : index
    %c0_2 = arith.constant 0 : index
    %1 = vector.load %arg2[%c0_1, %c0_2] : memref<72x2048xbf16, #tpu.memory_space<vmem>>, vector<72x2048xbf16>
    %cst = arith.constant dense<0.000000e+00> : vector<8x2048xf32>
    %2 = tpu.matmul %0, %1, %cst {dimension_numbers = #tpu.dot_dimension_numbers<[1], [0], [0], [1], [0, 0, 1, 1], [], []>} : vector<8x72xbf16>, vector<72x2048xbf16>, vector<8x2048xf32> -> vector<8x2048xf32>
    %c0_3 = arith.constant 0 : index
    %c0_4 = arith.constant 0 : index
    %3 = vector.load %arg3[%c0_3, %c0_4] : memref<8x1xf32, #tpu.memory_space<vmem>>, vector<8x1xf32>
    %4 = vector.broadcast %3 : vector<8x1xf32> to vector<8x2048xf32>
    %5 = arith.addf %2, %4 : vector<8x2048xf32>
    %6 = math.tanh %5 : vector<8x2048xf32>
    %c0_5 = arith.constant 0 : index
    %c0_6 = arith.constant 0 : index
    %7 = vector.load %arg4[%c0_5, %c0_6] : memref<8x2048xf32, #tpu.memory_space<vmem>>, vector<8x2048xf32>
    tpu.vector_store %arg4[%c0_5, %c0_6], %6 {strides = array<i32>} : memref<8x2048xf32, #tpu.memory_space<vmem>>, vector<8x2048xf32>,
    return
  }
  func.func @transform_0(%arg0: i32) -> (i32, i32) {
    %c0_i32 = arith.constant 0 : i32
    %c0_i32_0 = arith.constant 0 : i32
    %c0_i32_1 = arith.constant 0 : i32
    return %c0_i32, %c0_i32_0 : i32, i32
  }
  func.func @transform_1(%arg0: i32) -> (i32, i32) {
    %c0_i32 = arith.constant 0 : i32
    %c0_i32_0 = arith.constant 0 : i32
    return %c0_i32, %arg0 : i32, i32
  }
  func.func @transform_2(%arg0: i32) -> (i32, i32) {
    %c0_i32 = arith.constant 0 : i32
    %c0_i32_0 = arith.constant 0 : i32
    %c0_i32_1 = arith.constant 0 : i32
    return %c0_i32, %c0_i32_0 : i32, i32
  }
  func.func @transform_3(%arg0: i32) -> (i32, i32) {
    %c0_i32 = arith.constant 0 : i32
    %c0_i32_0 = arith.constant 0 : i32
    return %c0_i32, %arg0 : i32, i32
  }
}

</mosaic_0001>

<bundles_post_ra>
// kernel: pose_so_decoder_forward.26
= control target key start
LH: loop header
LB: loop body
LE: loop exit
PB: predicated region body
PF: predicated region fallthrough
CT: control target
= control target key end

     0   :  { %v324_v1 = vmov 0   ;;  %vm166_vm0 = vcmask 785408   ;;  %s435_s1 = inlined_call_operand.vmem [shape: bf16[96,512], index: 1, kind: input, shape index: {}]   ;;  %s436_s2 = inlined_call_operand.vmem [shape: f32[8,1], index: 2, kind: input, shape index: {}]   ;;  %s437_s0 = inlined_call_operand.vmem [shape: bf16[8,96], index: 0, kind: input, shape index: {}]   ;;  %s438_s3 = inlined_call_operand.vmem [shape: f32[8,512], index: 3, kind: output, shape index: {}]  }
   0x1   :  { %v288_v0 = vld [vmem:[%s435_s1 + $0x4] ss:$16 sps:$4 sm:$0xff]   ;;  %202 = vmatprep.mubr.bf16.mxu0 %v324_v1  ;;  %243 = vmatprep.mubr.bf16.mxu1 %v324_v1  ;;  %v290_v2 = vld [vmem:[%s435_s1 + $0xc] ss:$16 sps:$4 sm:$0xff]   ;;  %v292_v3 = vld [vmem:[%s435_s1] ss:$16 sps:$4 sm:$0xff]  }
   0x2   :  { %287 = vset.pattern.permute.xlu0 %v324_v1  ;;  %170 = vmatprep.subr.bf16.mxu0 %v288_v0  ;;  %v293_v4 = vld [vmem:[%s435_s1 + $0x8] ss:$16 sps:$4 sm:$0xff]   ;;  %v294_v5 = vld [vmem:[%s435_s1 + $0x24] ss:$16 sps:$4 sm:$0xff]   ;;  %v296_v6 = vld [vmem:[%s435_s1 + $0x2c] ss:$16 sps:$4 sm:$0xff]  }
   0x3   :  { %211 = vmatprep.subr.bf16.mxu1 %v290_v2  ;;  %171 = vmatpush1.bf16.msra.mxu0 %v292_v3  ;;  %v298_v7 = vld [vmem:[%s435_s1 + $0x20] ss:$16 sps:$4 sm:$0xff]   ;;  %v299_v8 = vld [vmem:[%s435_s1 + $0x28] ss:$16 sps:$4 sm:$0xff]   ;;  %v300_v9 = vld [vmem:[%s435_s1 + $0x44] ss:$16 sps:$4 sm:$0xff]  }
   0x4   :  { %212 = vmatpush1.bf16.msra.mxu1 %v293_v4  ;;  %172 = vmatprep.subr.bf16.mxu0 %v294_v5  ;;  %v302_v10 = vld [vmem:[%s435_s1 + $0x4c] ss:$16 sps:$4 sm:$0xff]   ;;  %v304_v11 = vld [vmem:[%s435_s1 + $0x40] ss:$16 sps:$4 sm:$0xff]   ;;  %v305_v12 = vld [vmem:[%s435_s1 + $0x48] ss:$16 sps:$4 sm:$0xff]  }
   0x5   :  { %213 = vmatprep.subr.bf16.mxu1 %v296_v6  ;;  %v306_v13 = vld [vmem:[%s435_s1 + $0x64] ss:$16 sps:$4 sm:$0xff]   ;;  %v308_v14 = vld [vmem:[%s435_s1 + $0x6c] ss:$16 sps:$4 sm:$0xff]   ;;  %v310_v15 = vld [vmem:[%s435_s1 + $0x60] ss:$16 sps:$4 sm:$0xff]  }
   0x6   :  { %v311_v16 = vld [vmem:[%s435_s1 + $0x68] ss:$16 sps:$4 sm:$0xff]   ;;  %v312_v17 = vld [vmem:[%s435_s1 + $0x84] ss:$16 sps:$4 sm:$0xff]   ;;  %v314_v18 = vld [vmem:[%s435_s1 + $0x8c] ss:$16 sps:$4 sm:$0xff]  }
   0x7   :  { %173 = vmatpush1.bf16.msra.mxu0 %v298_v7  ;;  %v316_v19 = vld [vmem:[%s435_s1 + $0x80] ss:$16 sps:$4 sm:$0xff]   ;;  %v317_v20 = vld [vmem:[%s435_s1 + $0x88] ss:$16 sps:$4 sm:$0xff]   ;;  %v318_v22 = vld [vmem:[%s435_s1 + $0xa4] ss:$16 sps:$4 sm:$0xff]  }
   0x8   :  { %214 = vmatpush1.bf16.msra.mxu1 %v299_v8  ;;  %174 = vmatprep.subr.bf16.mxu0 %v300_v9  ;;  %v40_v21 = vld [vmem:[%s436_s2] sm:$0xff]  ;;  %v320_v23 = vld [vmem:[%s435_s1 + $0xac] ss:$16 sps:$4 sm:$0xff]   ;;  %v323_v25 = vld [vmem:[%s435_s1 + $0xa8] ss:$16 sps:$4 sm:$0xff]  }
   0x9   :  { %215 = vmatprep.subr.bf16.mxu1 %v302_v10  ;;  %43 = vperm.xlu0 %287, %v40_v21   ;;  %v322_v24 = vld [vmem:[%s435_s1 + $0xa0] ss:$16 sps:$4 sm:$0xff]  }
   0xa   :  { %v15_v26 = vld [vmem:[%s437_s0] sm:$0xf] }
   0xb   :  { %175 = vmatpush1.bf16.msra.mxu0 %v304_v11 }
   0xc   :  { %216 = vmatpush1.bf16.msra.mxu1 %v305_v12  ;;  %176 = vmatprep.subr.bf16.mxu0 %v306_v13 }
   0xd   :  { %217 = vmatprep.subr.bf16.mxu1 %v308_v14 }
   0xf   :  { %177 = vmatpush1.bf16.msra.mxu0 %v310_v15 }
  0x10   :  { %218 = vmatpush1.bf16.msra.mxu1 %v311_v16  ;;  %178 = vmatprep.subr.bf16.mxu0 %v312_v17 }
  0x11   :  { %219 = vmatprep.subr.bf16.mxu1 %v314_v18 }
  0x13   :  { %179 = vmatpush1.bf16.msra.mxu0 %v316_v19 }
  0x14   :  { %220 = vmatpush1.bf16.msra.mxu1 %v317_v20  ;;  %180 = vmatprep.subr.bf16.mxu0 %v318_v22 }
  0x15   :  { %221 = vmatprep.subr.bf16.mxu1 %v320_v23 }
  0x17   :  { %181 = vmatpush1.bf16.msra.mxu0 %v322_v24 }
  0x18   :  { %222 = vmatpush1.bf16.msra.mxu1 %v323_v25 }
  0x1a   :  { %284 = vmatmul.mubr.msk.bf16.vlgmr.msra.gmra.mrb[0].mxu0 %vm166_vm0, %v15_v26 }
  0x1b   :  { %285 = vmatmul.mubr.msk.bf16.vlgmr.msra.gmra.mrb[0].mxu1 %vm166_vm0, %v15_v26 }
  0x88   :  { %v44_v27 = vpop.permute.xlu0 %43 }
  0xed   :  { %v204_v28 = vpop.f32.mrb[0].mxu0 }
  0xee   :  { %v245_v29 = vpop.f32.mrb[0].mxu1  ;;  %v205_v30 = vadd.f32 %v204_v28, %v44_v27  ;;  %v206_v32 = vpop.f32.mrb[1].mxu0 }
  0xef   :  { %v246_v31 = vadd.f32 %v245_v29, %v44_v27  ;;  %v247_v33 = vpop.f32.mrb[1].mxu1  ;;  %v207_v34 = vadd.f32 %v206_v32, %v44_v27  ;;  %v208_v36 = vpop.f32.mrb[2].mxu0 }
  0xf0   :  { %v248_v35 = vadd.f32 %v247_v33, %v44_v27  ;;  %v249_v37 = vpop.f32.mrb[2].mxu1  ;;  %252 = vst [vmem:[%s438_s3] sm:$0xff] %v205_v30  ;;  %v209_v38 = vpop.f32.mrb[3].mxu0 }
  0xf1   :  { %254 = vst [vmem:[%s438_s3 + $0x10] sm:$0xff] %v246_v31  ;;  %v250_v39 = vpop.f32.mrb[3].mxu1  ;;  %253 = vst [vmem:[%s438_s3 + $0x8] sm:$0xff] %v207_v34 }
  0xf2   :  { %255 = vst [vmem:[%s438_s3 + $0x18] sm:$0xff] %v248_v35 }

// kernel: pose_so_decoder_forward.27
= control target key start
LH: loop header
LB: loop body
LE: loop exit
PB: predicated region body
PF: predicated region fallthrough
CT: control target
= control target key end

     0   :  { %v291_v1 = vmov 0   ;;  %vm134_vm0 = vcmask 1043456   ;;  %vm130_vm1 = vcmask 588800   ;;  %s384_s1 = inlined_call_operand.vmem [shape: bf16[72,512], index: 1, kind: input, shape index: {}]   ;;  %s385_s2 = inlined_call_operand.vmem [shape: f32[8,1], index: 2, kind: input, shape index: {}]   ;;  %s386_s0 = inlined_call_operand.vmem [shape: bf16[8,72], index: 0, kind: input, shape index: {}]   ;;  %s387_s3 = inlined_call_operand.vmem [shape: f32[8,512], index: 3, kind: output, shape index: {}]  }
   0x1   :  { %v263_v0 = vld [vmem:[%s384_s1 + $0x4] ss:$16 sps:$4 sm:$0xff]   ;;  %179 = vmatprep.mubr.bf16.mxu0 %v291_v1  ;;  %220 = vmatprep.mubr.bf16.mxu1 %v291_v1  ;;  %v265_v2 = vld [vmem:[%s384_s1 + $0xc] ss:$16 sps:$4 sm:$0xff]   ;;  %v267_v3 = vld [vmem:[%s384_s1] ss:$16 sps:$4 sm:$0xff]  }
   0x2   :  { %262 = vset.pattern.permute.xlu0 %v291_v1  ;;  %147 = vmatprep.subr.bf16.mxu0 %v263_v0  ;;  %v268_v4 = vld [vmem:[%s384_s1 + $0x8] ss:$16 sps:$4 sm:$0xff]   ;;  %v269_v5 = vld [vmem:[%s384_s1 + $0x24] ss:$16 sps:$4 sm:$0xff]   ;;  %v271_v6 = vld [vmem:[%s384_s1 + $0x2c] ss:$16 sps:$4 sm:$0xff]  }
   0x3   :  { %188 = vmatprep.subr.bf16.mxu1 %v265_v2  ;;  %148 = vmatpush1.bf16.msra.mxu0 %v267_v3  ;;  %v273_v7 = vld [vmem:[%s384_s1 + $0x20] ss:$16 sps:$4 sm:$0xff]   ;;  %v274_v8 = vld [vmem:[%s384_s1 + $0x28] ss:$16 sps:$4 sm:$0xff]   ;;  %v275_v9 = vld [vmem:[%s384_s1 + $0x44] ss:$16 sps:$4 sm:$0xff]  }
   0x4   :  { %189 = vmatpush1.bf16.msra.mxu1 %v268_v4  ;;  %149 = vmatprep.subr.bf16.mxu0 %v269_v5  ;;  %v277_v10 = vld [vmem:[%s384_s1 + $0x4c] ss:$16 sps:$4 sm:$0xff]   ;;  %v279_v11 = vld [vmem:[%s384_s1 + $0x40] ss:$16 sps:$4 sm:$0xff]   ;;  %v280_v12 = vld [vmem:[%s384_s1 + $0x48] ss:$16 sps:$4 sm:$0xff]  }
   0x5   :  { %190 = vmatprep.subr.bf16.mxu1 %v271_v6  ;;  %v281_v13 = vld [vmem:[%s384_s1 + $0x64] ss:$16 sps:$4 sm:$0xff]   ;;  %v283_v14 = vld [vmem:[%s384_s1 + $0x6c] ss:$16 sps:$4 sm:$0xff]   ;;  %v285_v18 = vld [vmem:[%s384_s1 + $0x60] ss:$16 sps:$4 sm:$0xff]  }
   0x6   :  { %v32_v15 = vld [vmem:[%s384_s1 + $0x80] sm:$0xff]  ;;  %v33_v16 = vld [vmem:[%s384_s1 + $0x88] sm:$0xff] }
   0x7   :  { %150 = vmatpush1.bf16.msra.mxu0 %v273_v7  ;;  %v34_v17 = vld [vmem:[%s385_s2] sm:$0xff]  ;;  %v286_v19 = vld [vmem:[%s384_s1 + $0x68] ss:$16 sps:$4 sm:$0xff]   ;;  %v254_v20 = vcombine.high %v32_v15, %v32_v15  ;;  %v256_v21 = vcombine.high %v33_v16, %v33_v16  ;;  %v253_v22 = vcombine.low %v32_v15, %v32_v15  ;;  %v255_v23 = vcombine.low %v33_v16, %v33_v16 }
   0x8   :  { %191 = vmatpush1.bf16.msra.mxu1 %v274_v8  ;;  %151 = vmatprep.subr.bf16.mxu0 %v275_v9  ;;  %v15_v26 = vld [vmem:[%s386_s0] sm:$0xf] }
   0x9   :  { %192 = vmatprep.subr.bf16.mxu1 %v277_v10  ;;  %37 = vperm.xlu0 %262, %v34_v17   ;;  %v136_v24 = vsel %vm134_vm0, %v253_v22, 0  ;;  %v142_v25 = vsel %vm134_vm0, %v255_v23, 0 }
   0xb   :  { %152 = vmatpush1.bf16.msra.mxu0 %v279_v11 }
   0xc   :  { %193 = vmatpush1.bf16.msra.mxu1 %v280_v12  ;;  %153 = vmatprep.subr.bf16.mxu0 %v281_v13 }
   0xd   :  { %194 = vmatprep.subr.bf16.mxu1 %v283_v14 }
   0xf   :  { %154 = vmatpush1.bf16.msra.mxu0 %v285_v18 }
  0x10   :  { %195 = vmatpush1.bf16.msra.mxu1 %v286_v19  ;;  %257 = vmatprep.subr.msk.bf16.mxu0 %vm134_vm0, %v254_v20 }
  0x11   :  { %259 = vmatprep.subr.msk.bf16.mxu1 %vm134_vm0, %v256_v21 }
  0x13   :  { %156 = vmatpush1.bf16.msra.mxu0 %v136_v24 }
  0x14   :  { %197 = vmatpush1.bf16.msra.mxu1 %v142_v25 }
  0x16   :  { %258 = vmatmul.mubr.msk.bf16.vlgmr.msra.gmra.mrb[0].mxu0 %vm130_vm1, %v15_v26 }
  0x17   :  { %260 = vmatmul.mubr.msk.bf16.vlgmr.msra.gmra.mrb[0].mxu1 %vm130_vm1, %v15_v26 }
  0x88   :  { %v38_v27 = vpop.permute.xlu0 %37 }
  0xe9   :  { %v181_v28 = vpop.f32.mrb[0].mxu0 }
  0xea   :  { %v222_v29 = vpop.f32.mrb[0].mxu1  ;;  %v182_v30 = vadd.f32 %v181_v28, %v38_v27  ;;  %v183_v32 = vpop.f32.mrb[1].mxu0 }
  0xeb   :  { %v223_v31 = vadd.f32 %v222_v29, %v38_v27  ;;  %v224_v33 = vpop.f32.mrb[1].mxu1  ;;  %v184_v34 = vadd.f32 %v183_v32, %v38_v27  ;;  %v185_v36 = vpop.f32.mrb[2].mxu0 }
  0xec   :  { %v225_v35 = vadd.f32 %v224_v33, %v38_v27  ;;  %v226_v37 = vpop.f32.mrb[2].mxu1  ;;  %229 = vst [vmem:[%s387_s3] sm:$0xff] %v182_v30  ;;  %v186_v38 = vpop.f32.mrb[3].mxu0 }
  0xed   :  { %231 = vst [vmem:[%s387_s3 + $0x10] sm:$0xff] %v223_v31  ;;  %v227_v39 = vpop.f32.mrb[3].mxu1  ;;  %230 = vst [vmem:[%s387_s3 + $0x8] sm:$0xff] %v184_v34 }
  0xee   :  { %232 = vst [vmem:[%s387_s3 + $0x18] sm:$0xff] %v225_v35 }

// kernel: pose_so_decoder_forward.28
= control target key start
LH: loop header
LB: loop body
LE: loop exit
PB: predicated region body
PF: predicated region fallthrough
CT: control target
= control target key end

     0   :  { %v197_v0 = vmov 0.0   ;;  %vm198_vm0 = vmmov 0   ;;  %v199_v2 = vmov 0   ;;  %s259_s1 = inlined_call_operand.vmem [shape: bf16[128,128], index: 1, kind: input, shape index: {}]   ;;  %s260_s2 = inlined_call_operand.vmem [shape: f32[16,1], index: 2, kind: input, shape index: {}]   ;;  %s261_s0 = inlined_call_operand.vmem [shape: bf16[16,128], index: 0, kind: input, shape index: {}]   ;;  %s262_s3 = inlined_call_operand.vmem [shape: f32[16,128], index: 3, kind: output, shape index: {}]  }
   0x1   :  { %164 = vmatprep.subr.bf16.mxu0 %v197_v0  ;;  %v188_v1 = vld [vmem:[%s259_s1] sm:$0xff]   ;;  %180 = vmatprep.mubr.msk.bf16.mxu0 %vm198_vm0, %v197_v0  ;;  %v189_v3 = vld [vmem:[%s259_s1 + $0x8] sm:$0xff]   ;;  %v190_v4 = vld [vmem:[%s259_s1 + $0x10] sm:$0xff]  }
   0x2   :  { %187 = vset.pattern.permute.xlu0 %v199_v2  ;;  %165 = vmatpush3.bf16.msra.mxu0 %v188_v1  ;;  %v33_v5 = vld [vmem:[%s260_s2] sm:$0xff]  ;;  %v191_v6 = vld [vmem:[%s259_s1 + $0x18] sm:$0xff]   ;;  %v34_v7 = vld [vmem:[%s260_s2 + $0x8] sm:$0xff] }
   0x3   :  { %166 = vmatprep.subr.bf16.mxu0 %v197_v0  ;;  %37 = vperm.xlu0 %187, %v33_v5   ;;  %v192_v8 = vld [vmem:[%s259_s1 + $0x20] sm:$0xff]   ;;  %v193_v9 = vld [vmem:[%s259_s1 + $0x28] sm:$0xff]   ;;  %v194_v10 = vld [vmem:[%s259_s1 + $0x30] sm:$0xff]  }
   0x4   :  { %v195_v11 = vld [vmem:[%s259_s1 + $0x38] sm:$0xff]   ;;  %v196_v12 = vld [vmem:[%s261_s0] sm:$0xff]  }
   0x6   :  { %167 = vmatpush3.bf16.msra.mxu0 %v189_v3 }
   0x7   :  { %168 = vmatprep.subr.bf16.mxu0 %v197_v0  ;;  %42 = vperm.xlu0 %187, %v34_v7  }
   0xa   :  { %169 = vmatpush3.bf16.msra.mxu0 %v190_v4 }
   0xb   :  { %170 = vmatprep.subr.bf16.mxu0 %v197_v0 }
   0xe   :  { %171 = vmatpush3.bf16.msra.mxu0 %v191_v6 }
   0xf   :  { %172 = vmatprep.subr.bf16.mxu0 %v197_v0 }
  0x12   :  { %173 = vmatpush3.bf16.msra.mxu0 %v192_v8 }
  0x13   :  { %174 = vmatprep.subr.bf16.mxu0 %v197_v0 }
  0x16   :  { %175 = vmatpush3.bf16.msra.mxu0 %v193_v9 }
  0x17   :  { %176 = vmatprep.subr.bf16.mxu0 %v197_v0 }
  0x1a   :  { %177 = vmatpush3.bf16.msra.mxu0 %v194_v10 }
  0x1b   :  { %178 = vmatprep.subr.bf16.mxu0 %v197_v0 }
  0x1e   :  { %179 = vmatpush3.bf16.msra.mxu0 %v195_v11 }
  0x21   :  { %181 = vmatmul.mubr.bf16.vlgmr.msra.gmra.mrb[0].mxu0 %v196_v12 }
  0x82   :  { %v38_v13 = vpop.permute.xlu0 %37 }
  0x86   :  { %v43_v17 = vpop.permute.xlu0 %42 }
  0xf4   :  { %v133_v14 = vpop.f32.mrb[0].mxu0 }
  0xf5   :  { %v134_v15 = vadd.f32 %v133_v14, %v38_v13  ;;  %v182_v16 = vpop.f32.mrb[1].mxu0 }
  0xf6   :  { %v136_v18 = vpop.f32.mrb[2].mxu0 }
  0xf7   :  { %140 = vst [vmem:[%s262_s3] sm:$0xff] %v134_v15  ;;  %v137_v19 = vadd.f32 %v136_v18, %v43_v17  ;;  %v183_v20 = vpop.f32.mrb[3].mxu0 }
  0xf9   :  { %141 = vst [vmem:[%s262_s3 + $0x8] sm:$0xff] %v137_v19 }

// kernel: pose_so_decoder_forward.29
= control target key start
LH: loop header
LB: loop body
LE: loop exit
PB: predicated region body
PF: predicated region fallthrough
CT: control target
= control target key end

     0   :  { %v187_v0 = vmov 0   ;;  %vm110_vm0 = vcmask 130048   ;;  %s253_s1 = inlined_call_operand.vmem [shape: bf16[144,128], index: 1, kind: input, shape index: {}]   ;;  %s254_s0 = inlined_call_operand.vmem [shape: bf16[16,144], index: 0, kind: input, shape index: {}]   ;;  %s255_s2 = inlined_call_operand.vmem [shape: f32[16,1], index: 2, kind: input, shape index: {}]   ;;  %s256_s3 = inlined_call_operand.vmem [shape: f32[16,128], index: 3, kind: output, shape index: {}]  }
   0x1   :  { %114 = vmatprep.subr.bf16.mxu0 %v187_v0  ;;  %v175_v1 = vld [vmem:[%s253_s1] sm:$0xff]   ;;  %174 = vset.pattern.permute.xlu0 %v187_v0  ;;  %v176_v2 = vld [vmem:[%s253_s1 + $0x8] sm:$0xff]   ;;  %v177_v3 = vld [vmem:[%s253_s1 + $0x10] sm:$0xff]  }
   0x2   :  { %115 = vmatpush1.bf16.msra.mxu0 %v175_v1  ;;  %v178_v4 = vld [vmem:[%s253_s1 + $0x18] sm:$0xff]   ;;  %v186_v5 = vld [vmem:[%s254_s0 + $0x4] ss:$8 sps:$4 sm:$0xff]   ;;  %v181_v10 = vld [vmem:[%s253_s1 + $0x30] sm:$0xff]  }
   0x3   :  { %116 = vmatprep.subr.bf16.mxu0 %v187_v0  ;;  %v35_v6 = vld [vmem:[%s255_s2] sm:$0xff]  ;;  %172 = vmatprep.mubr.msk.bf16.mxu0 %vm110_vm0, %v186_v5  ;;  %v36_v7 = vld [vmem:[%s255_s2 + $0x8] sm:$0xff]  ;;  %v182_v11 = vld [vmem:[%s253_s1 + $0x38] sm:$0xff]  }
   0x4   :  { %39 = vperm.xlu0 %174, %v35_v6   ;;  %v179_v8 = vld [vmem:[%s253_s1 + $0x20] sm:$0xff]   ;;  %v180_v9 = vld [vmem:[%s253_s1 + $0x28] sm:$0xff]  }
   0x5   :  { %v183_v12 = vld [vmem:[%s253_s1 + $0x40] sm:$0xff]  }
   0x6   :  { %117 = vmatpush1.bf16.msra.mxu0 %v176_v2  ;;  %v184_v13 = vld [vmem:[%s254_s0] ss:$8 sps:$4 sm:$0xff]  }
   0x7   :  { %118 = vmatprep.subr.bf16.mxu0 %v187_v0 }
   0x8   :  { %44 = vperm.xlu0 %174, %v36_v7  }
   0xa   :  { %119 = vmatpush1.bf16.msra.mxu0 %v177_v3 }
   0xb   :  { %120 = vmatprep.subr.bf16.mxu0 %v187_v0 }
   0xe   :  { %121 = vmatpush1.bf16.msra.mxu0 %v178_v4 }
   0xf   :  { %122 = vmatprep.subr.bf16.mxu0 %v187_v0 }
  0x12   :  { %123 = vmatpush1.bf16.msra.mxu0 %v179_v8 }
  0x13   :  { %124 = vmatprep.subr.bf16.mxu0 %v187_v0 }
  0x16   :  { %125 = vmatpush1.bf16.msra.mxu0 %v180_v9 }
  0x17   :  { %126 = vmatprep.subr.bf16.mxu0 %v187_v0 }
  0x1a   :  { %127 = vmatpush1.bf16.msra.mxu0 %v181_v10 }
  0x1b   :  { %128 = vmatprep.subr.bf16.mxu0 %v187_v0 }
  0x1e   :  { %129 = vmatpush1.bf16.msra.mxu0 %v182_v11 }
  0x1f   :  { %130 = vmatprep.subr.bf16.mxu0 %v187_v0 }
  0x22   :  { %131 = vmatpush1.bf16.msra.mxu0 %v183_v12 }
  0x25   :  { %147 = vmatmul.mubr.bf16.vlgmr.msra.gmra.mrb[0].mxu0 %v184_v13 }
  0x83   :  { %v40_v14 = vpop.permute.xlu0 %39 }
  0x87   :  { %v45_v18 = vpop.permute.xlu0 %44 }
  0xf8   :  { %v148_v15 = vpop.f32.mrb[0].mxu0 }
  0xf9   :  { %v149_v16 = vadd.f32 %v148_v15, %v40_v14  ;;  %v150_v17 = vpop.f32.mrb[1].mxu0 }
  0xfa   :  { %v151_v19 = vpop.f32.mrb[2].mxu0 }
  0xfb   :  { %155 = vst [vmem:[%s256_s3] sm:$0xff] %v149_v16  ;;  %v152_v20 = vadd.f32 %v151_v19, %v45_v18  ;;  %v153_v21 = vpop.f32.mrb[3].mxu0 }
  0xfd   :  { %156 = vst [vmem:[%s256_s3 + $0x8] sm:$0xff] %v152_v20 }

// kernel: pose_so_decoder_forward.30
= control target key start
LH: loop header
LB: loop body
LE: loop exit
PB: predicated region body
PF: predicated region fallthrough
CT: control target
= control target key end

     0   :  { %v337_v1 = vmov 0   ;;  %s442_s1 = inlined_call_operand.vmem [shape: bf16[256,128], index: 1, kind: input, shape index: {}]   ;;  %s443_s0 = inlined_call_operand.vmem [shape: bf16[32,256], index: 0, kind: input, shape index: {}]   ;;  %s444_s2 = inlined_call_operand.vmem [shape: f32[32,1], index: 2, kind: input, shape index: {}]   ;;  %s445_s3 = inlined_call_operand.vmem [shape: f32[32,128], index: 3, kind: output, shape index: {}]  }
   0x1   :  { %v315_v0 = vld [vmem:[%s442_s1 + $0x40] sm:$0xff]   ;;  %314 = vset.pattern.permute.xlu1 %v337_v1  ;;  %313 = vset.pattern.permute.xlu0 %v337_v1  ;;  %v317_v3 = vld [vmem:[%s442_s1 + $0x48] sm:$0xff]   ;;  %v319_v5 = vld [vmem:[%s442_s1 + $0x50] sm:$0xff]  }
   0x2   :  { %v316_v2 = vld [vmem:[%s442_s1] sm:$0xff]   ;;  %268 = vmatprep.subr.bf16.mxu0 %v315_v0  ;;  %296 = vmatprep.subr.bf16.mxu1 %v315_v0  ;;  %v318_v4 = vld [vmem:[%s442_s1 + $0x8] sm:$0xff]   ;;  %v320_v6 = vld [vmem:[%s442_s1 + $0x10] sm:$0xff]  }
   0x3   :  { %269 = vmatpush3.bf16.msra.mxu0 %v316_v2  ;;  %304 = vmatpush3.bf16.msra.mxu1 %v316_v2  ;;  %v321_v7 = vld [vmem:[%s442_s1 + $0x58] sm:$0xff]   ;;  %v323_v9 = vld [vmem:[%s442_s1 + $0x60] sm:$0xff]   ;;  %v325_v11 = vld [vmem:[%s442_s1 + $0x68] sm:$0xff]  }
   0x4   :  { %270 = vmatprep.subr.bf16.mxu0 %v317_v3  ;;  %297 = vmatprep.subr.bf16.mxu1 %v317_v3  ;;  %v322_v8 = vld [vmem:[%s442_s1 + $0x18] sm:$0xff]   ;;  %v324_v10 = vld [vmem:[%s442_s1 + $0x20] sm:$0xff]   ;;  %v326_v14 = vld [vmem:[%s442_s1 + $0x28] sm:$0xff]  }
   0x5   :  { %v333_v12 = vld [vmem:[%s443_s0 + $0x4] ss:$8 sps:$4 sm:$0xff]   ;;  %v336_v13 = vld [vmem:[%s443_s0 + $0x14] ss:$8 sps:$4 sm:$0xff]   ;;  %v331_v23 = vld [vmem:[%s443_s0] ss:$8 sps:$4 sm:$0xff]  }
   0x6   :  { %v53_v15 = vld [vmem:[%s444_s2 + $0x10] sm:$0xff]  ;;  %v51_v16 = vld [vmem:[%s444_s2] sm:$0xff]  ;;  %223 = vmatprep.mubr.bf16.mxu0 %v333_v12  ;;  %231 = vmatprep.mubr.bf16.mxu1 %v336_v13  ;;  %v54_v19 = vld [vmem:[%s444_s2 + $0x18] sm:$0xff] }
   0x7   :  { %271 = vmatpush3.bf16.msra.mxu0 %v318_v4  ;;  %305 = vmatpush3.bf16.msra.mxu1 %v318_v4  ;;  %v327_v17 = vld [vmem:[%s442_s1 + $0x70] sm:$0xff]   ;;  %v52_v20 = vld [vmem:[%s444_s2 + $0x8] sm:$0xff]  ;;  %v329_v21 = vld [vmem:[%s442_s1 + $0x78] sm:$0xff]  }
   0x8   :  { %272 = vmatprep.subr.bf16.mxu0 %v319_v5  ;;  %298 = vmatprep.subr.bf16.mxu1 %v319_v5  ;;  %v328_v18 = vld [vmem:[%s442_s1 + $0x30] sm:$0xff]   ;;  %v330_v22 = vld [vmem:[%s442_s1 + $0x38] sm:$0xff]  }
   0x9   :  { %67 = vperm.xlu1 %314, %v53_v15   ;;  %57 = vperm.xlu0 %313, %v51_v16   ;;  %v334_v24 = vld [vmem:[%s443_s0 + $0x10] ss:$8 sps:$4 sm:$0xff]  }
   0xb   :  { %273 = vmatpush3.bf16.msra.mxu0 %v320_v6  ;;  %306 = vmatpush3.bf16.msra.mxu1 %v320_v6 }
   0xc   :  { %274 = vmatprep.subr.bf16.mxu0 %v321_v7  ;;  %299 = vmatprep.subr.bf16.mxu1 %v321_v7 }
   0xd   :  { %72 = vperm.xlu1 %314, %v54_v19   ;;  %62 = vperm.xlu0 %313, %v52_v20  }
   0xf   :  { %275 = vmatpush3.bf16.msra.mxu0 %v322_v8  ;;  %307 = vmatpush3.bf16.msra.mxu1 %v322_v8 }
  0x10   :  { %276 = vmatprep.subr.bf16.mxu0 %v323_v9  ;;  %300 = vmatprep.subr.bf16.mxu1 %v323_v9 }
  0x13   :  { %277 = vmatpush3.bf16.msra.mxu0 %v324_v10  ;;  %308 = vmatpush3.bf16.msra.mxu1 %v324_v10 }
  0x14   :  { %278 = vmatprep.subr.bf16.mxu0 %v325_v11  ;;  %301 = vmatprep.subr.bf16.mxu1 %v325_v11 }
  0x17   :  { %279 = vmatpush3.bf16.msra.mxu0 %v326_v14  ;;  %309 = vmatpush3.bf16.msra.mxu1 %v326_v14 }
  0x18   :  { %280 = vmatprep.subr.bf16.mxu0 %v327_v17  ;;  %302 = vmatprep.subr.bf16.mxu1 %v327_v17 }
  0x1b   :  { %281 = vmatpush3.bf16.msra.mxu0 %v328_v18  ;;  %310 = vmatpush3.bf16.msra.mxu1 %v328_v18 }
  0x1c   :  { %282 = vmatprep.subr.bf16.mxu0 %v329_v21  ;;  %303 = vmatprep.subr.bf16.mxu1 %v329_v21 }
  0x1f   :  { %283 = vmatpush3.bf16.msra.mxu0 %v330_v22  ;;  %311 = vmatpush3.bf16.msra.mxu1 %v330_v22 }
  0x22   :  { %224 = vmatmul.mubr.bf16.vlgmr.msra.gmra.mrb[0].mxu0 %v331_v23  ;;  %232 = vmatmul.mubr.bf16.vlgmr.msra.gmra.mrb[0].mxu1 %v334_v24 }
  0x88   :  { %v68_v25 = vpop.permute.xlu1 %67  ;;  %v58_v26 = vpop.permute.xlu0 %57 }
  0x8c   :  { %v73_v41 = vpop.permute.xlu1 %72  ;;  %v63_v42 = vpop.permute.xlu0 %62 }
  0xf5   :  { %v284_v27 = vpop.f32.mrb[0].mxu0  ;;  %v290_v28 = vpop.f32.mrb[0].mxu1 }
  0xf6   :  { %v285_v29 = vpop.f32.mrb[1].mxu0  ;;  %v291_v30 = vpop.f32.mrb[1].mxu1 }
  0xf7   :  { %v286_v31 = vadd.f32 %v285_v29, %v284_v27  ;;  %v292_v32 = vadd.f32 %v291_v30, %v290_v28  ;;  %v287_v33 = vpop.f32.mrb[2].mxu0  ;;  %v293_v34 = vpop.f32.mrb[2].mxu1 }
  0xf8   :  { %v288_v35 = vpop.f32.mrb[3].mxu0  ;;  %v294_v36 = vpop.f32.mrb[3].mxu1 }
  0xf9   :  { %v226_v37 = vadd.f32 %v286_v31, %v58_v26  ;;  %v234_v38 = vadd.f32 %v292_v32, %v68_v25  ;;  %v289_v39 = vadd.f32 %v288_v35, %v287_v33  ;;  %v295_v40 = vadd.f32 %v294_v36, %v293_v34 }
  0xfb   :  { %240 = vst [vmem:[%s445_s3] sm:$0xff] %v226_v37  ;;  %242 = vst [vmem:[%s445_s3 + $0x10] sm:$0xff] %v234_v38  ;;  %v229_v43 = vadd.f32 %v289_v39, %v63_v42  ;;  %v237_v44 = vadd.f32 %v295_v40, %v73_v41 }
  0xfd   :  { %241 = vst [vmem:[%s445_s3 + $0x8] sm:$0xff] %v229_v43  ;;  %243 = vst [vmem:[%s445_s3 + $0x18] sm:$0xff] %v237_v44 }

// kernel: pose_so_decoder_forward.31
= control target key start
LH: loop header
LB: loop body
LE: loop exit
PB: predicated region body
PF: predicated region fallthrough
CT: control target
= control target key end

     0   :  { %v429_v1 = vmov 0   ;;  %vm221_vm0 = vcmask 261120   ;;  %s548_s1 = inlined_call_operand.vmem [shape: bf16[288,128], index: 1, kind: input, shape index: {}]   ;;  %s549_s0 = inlined_call_operand.vmem [shape: bf16[32,288], index: 0, kind: input, shape index: {}]   ;;  %s550_s2 = inlined_call_operand.vmem [shape: f32[32,1], index: 2, kind: input, shape index: {}]   ;;  %s551_s3 = inlined_call_operand.vmem [shape: f32[32,128], index: 3, kind: output, shape index: {}]  }
   0x1   :  { %v403_v0 = vld [vmem:[%s548_s1 + $0x40] sm:$0xff]   ;;  %401 = vset.pattern.permute.xlu0 %v429_v1  ;;  %402 = vset.pattern.permute.xlu1 %v429_v1  ;;  %v405_v3 = vld [vmem:[%s548_s1 + $0x48] sm:$0xff]   ;;  %v407_v5 = vld [vmem:[%s548_s1 + $0x50] sm:$0xff]  }
   0x2   :  { %v404_v2 = vld [vmem:[%s548_s1] sm:$0xff]   ;;  %360 = vmatprep.subr.bf16.mxu0 %v403_v0  ;;  %v406_v4 = vld [vmem:[%s548_s1 + $0x8] sm:$0xff]   ;;  %v408_v6 = vld [vmem:[%s548_s1 + $0x10] sm:$0xff]  }
   0x3   :  { %361 = vmatpush3.bf16.msra.mxu0 %v404_v2  ;;  %v409_v7 = vld [vmem:[%s548_s1 + $0x58] sm:$0xff]   ;;  %v411_v9 = vld [vmem:[%s548_s1 + $0x60] sm:$0xff]   ;;  %v413_v12 = vld [vmem:[%s548_s1 + $0x68] sm:$0xff]  }
   0x4   :  { %362 = vmatprep.subr.bf16.mxu0 %v405_v3  ;;  %v410_v8 = vld [vmem:[%s548_s1 + $0x18] sm:$0xff]   ;;  %v412_v10 = vld [vmem:[%s548_s1 + $0x20] sm:$0xff]   ;;  %v414_v13 = vld [vmem:[%s548_s1 + $0x28] sm:$0xff]  }
   0x5   :  { %v418_v11 = vld [vmem:[%s548_s1 + $0x80] sm:$0xff]   ;;  %v415_v14 = vld [vmem:[%s548_s1 + $0x70] sm:$0xff]   ;;  %v423_v16 = vld [vmem:[%s548_s1 + $0x88] sm:$0xff]  }
   0x6   :  { %392 = vmatprep.subr.bf16.mxu1 %v418_v11  ;;  %v422_v15 = vld [vmem:[%s549_s0 + $0x4] ss:$12 sps:$4 sm:$0xff]   ;;  %v424_v17 = vld [vmem:[%s549_s0 + $0x8] ss:$12 sps:$4 sm:$0xff]   ;;  %v425_v18 = vld [vmem:[%s549_s0 + $0x20] ss:$12 sps:$4 sm:$0xff]  }
   0x7   :  { %363 = vmatpush3.bf16.msra.mxu0 %v406_v4  ;;  %393 = vmatpush3.bf16.msra.mxu1 %v418_v11  ;;  %v59_v19 = vld [vmem:[%s550_s2] sm:$0xff]  ;;  %v416_v20 = vld [vmem:[%s548_s1 + $0x30] sm:$0xff]   ;;  %v417_v22 = vld [vmem:[%s548_s1 + $0x78] sm:$0xff]  }
   0x8   :  { %364 = vmatprep.subr.bf16.mxu0 %v407_v5  ;;  %260 = vmatprep.mubr.bf16.mxu0 %v422_v15  ;;  %v61_v21 = vld [vmem:[%s550_s2 + $0x10] sm:$0xff]  ;;  %v60_v23 = vld [vmem:[%s550_s2 + $0x8] sm:$0xff]  ;;  %v62_v24 = vld [vmem:[%s550_s2 + $0x18] sm:$0xff] }
   0x9   :  { %394 = vmatprep.subr.bf16.mxu1 %v423_v16  ;;  %396 = vmatprep.mubr.msk.bf16.mxu1 %vm221_vm0, %v424_v17  ;;  %v419_v25 = vld [vmem:[%s548_s1 + $0x38] sm:$0xff]   ;;  %v420_v26 = vld [vmem:[%s549_s0] ss:$12 sps:$4 sm:$0xff]  }
   0xa   :  { %65 = vperm.xlu0 %401, %v59_v19   ;;  %75 = vperm.xlu1 %402, %v61_v21   ;;  %v426_v27 = vld [vmem:[%s549_s0 + $0x1c] ss:$12 sps:$4 sm:$0xff]   ;;  %v428_v28 = vld [vmem:[%s549_s0 + $0x18] ss:$12 sps:$4 sm:$0xff]  }
   0xb   :  { %365 = vmatpush3.bf16.msra.mxu0 %v408_v6  ;;  %395 = vmatpush3.bf16.msra.mxu1 %v423_v16 }
   0xc   :  { %366 = vmatprep.subr.bf16.mxu0 %v409_v7 }
   0xe   :  { %397 = vmatmul.mubr.msk.bf16.vlgmr.msra.gmra.mrb[0].mxu1 %vm221_vm0, %v425_v18  ;;  %70 = vperm.xlu0 %401, %v60_v23  }
   0xf   :  { %367 = vmatpush3.bf16.msra.mxu0 %v410_v8  ;;  %80 = vperm.xlu1 %402, %v62_v24  }
  0x10   :  { %368 = vmatprep.subr.bf16.mxu0 %v411_v9 }
  0x13   :  { %369 = vmatpush3.bf16.msra.mxu0 %v412_v10 }
  0x14   :  { %370 = vmatprep.subr.bf16.mxu0 %v413_v12 }
  0x17   :  { %371 = vmatpush3.bf16.msra.mxu0 %v414_v13 }
  0x18   :  { %372 = vmatprep.subr.bf16.mxu0 %v415_v14 }
  0x1b   :  { %373 = vmatpush3.bf16.msra.mxu0 %v416_v20 }
  0x1c   :  { %374 = vmatprep.subr.bf16.mxu0 %v417_v22 }
  0x1f   :  { %375 = vmatpush3.bf16.msra.mxu0 %v419_v25 }
  0x22   :  { %261 = vmatmul.mubr.bf16.vlgmr.msra.gmra.mrb[0].mxu0 %v420_v26 }
  0x23   :  { %268 = vmatprep.mubr.bf16.mxu0 %v426_v27 }
  0x2a   :  { %269 = vmatmul.mubr.bf16.gmra.mrb[4].mxu0 %v428_v28 }
  0x89   :  { %v66_v33 = vpop.permute.xlu0 %65  ;;  %v76_v44 = vpop.permute.xlu1 %75 }
  0x8d   :  { %v71_v39 = vpop.permute.xlu0 %70 }
  0x8e   :  { %v81_v53 = vpop.permute.xlu1 %80 }
  0xe1   :  { %v398_v29 = vpop.f32.mrb[0].mxu1 }
  0xe2   :  { %v311_v30 = vpop.f32.mrb[1].mxu1 }
  0xe3   :  { %v399_v31 = vpop.f32.mrb[2].mxu1 }
  0xe4   :  { %v314_v32 = vpop.f32.mrb[3].mxu1 }
  0xf5   :  { %v376_v34 = vpop.f32.mrb[0].mxu0 }
  0xf6   :  { %v377_v35 = vpop.f32.mrb[1].mxu0 }
  0xf7   :  { %v378_v36 = vadd.f32 %v377_v35, %v376_v34  ;;  %v379_v37 = vpop.f32.mrb[2].mxu0 }
  0xf8   :  { %v380_v38 = vpop.f32.mrb[3].mxu0 }
  0xf9   :  { %v381_v40 = vadd.f32 %v380_v38, %v379_v37  ;;  %v263_v41 = vadd.f32 %v378_v36, %v66_v33 }
  0xfb   :  { %v266_v42 = vadd.f32 %v381_v40, %v71_v39  ;;  %v312_v43 = vadd.f32 %v311_v30, %v263_v41 }
  0xfd   :  { %326 = vst [vmem:[%s551_s3] sm:$0xff] %v312_v43  ;;  %v315_v45 = vadd.f32 %v314_v32, %v266_v42  ;;  %v382_v46 = vpop.f32.mrb[4].mxu0 }
  0xfe   :  { %v383_v47 = vpop.f32.mrb[5].mxu0 }
  0xff   :  { %327 = vst [vmem:[%s551_s3 + $0x8] sm:$0xff] %v315_v45  ;;  %v384_v48 = vadd.f32 %v383_v47, %v382_v46  ;;  %v385_v49 = vpop.f32.mrb[6].mxu0 }
 0x100   :  { %v386_v50 = vpop.f32.mrb[7].mxu0 }
 0x101   :  { %v271_v51 = vadd.f32 %v384_v48, %v76_v44  ;;  %v387_v52 = vadd.f32 %v386_v50, %v385_v49 }
 0x103   :  { %v320_v54 = vadd.f32 %v398_v29, %v271_v51  ;;  %v274_v55 = vadd.f32 %v387_v52, %v81_v53 }
 0x105   :  { %328 = vst [vmem:[%s551_s3 + $0x10] sm:$0xff] %v320_v54  ;;  %v323_v56 = vadd.f32 %v399_v31, %v274_v55 }
 0x107   :  { %329 = vst [vmem:[%s551_s3 + $0x18] sm:$0xff] %v323_v56 }

// kernel: pose_so_decoder_forward.32
= control target key start
LH: loop header
LB: loop body
LE: loop exit
PB: predicated region body
PF: predicated region fallthrough
CT: control target
= control target key end

     0   :  { %v346_v1 = vmov 0.0   ;;  %vm347_vm0 = vmmov 0   ;;  %v348_v3 = vmov 0   ;;  %vm177_vm1 = vcmask 261120   ;;  %s435_s1 = inlined_call_operand.vmem [shape: bf16[288,128], index: 1, kind: input, shape index: {}]   ;;  %s436_s0 = inlined_call_operand.vmem [shape: bf16[8,288], index: 0, kind: input, shape index: {}]   ;;  %s437_s2 = inlined_call_operand.vmem [shape: f32[8,1], index: 2, kind: input, shape index: {}]   ;;  %s438_s3 = inlined_call_operand.vmem [shape: f32[8,128], index: 3, kind: output, shape index: {}]  }
   0x1   :  { %v325_v0 = vld [vmem:[%s435_s1 + $0x40] sm:$0xff]   ;;  %313 = vmatprep.subr.bf16.mxu1 %v346_v1  ;;  %317 = vmatprep.mubr.msk.bf16.mxu1 %vm347_vm0, %v346_v1  ;;  %v327_v4 = vld [vmem:[%s435_s1 + $0x48] sm:$0xff]   ;;  %v329_v6 = vld [vmem:[%s435_s1 + $0x50] sm:$0xff]  }
   0x2   :  { %v326_v2 = vld [vmem:[%s435_s1] sm:$0xff]   ;;  %324 = vset.pattern.permute.xlu0 %v348_v3  ;;  %288 = vmatprep.subr.bf16.mxu0 %v325_v0  ;;  %v328_v5 = vld [vmem:[%s435_s1 + $0x8] sm:$0xff]   ;;  %v330_v7 = vld [vmem:[%s435_s1 + $0x10] sm:$0xff]  }
   0x3   :  { %289 = vmatpush3.bf16.msra.mxu0 %v326_v2  ;;  %v331_v8 = vld [vmem:[%s435_s1 + $0x58] sm:$0xff]   ;;  %v333_v10 = vld [vmem:[%s435_s1 + $0x60] sm:$0xff]   ;;  %v335_v13 = vld [vmem:[%s435_s1 + $0x68] sm:$0xff]  }
   0x4   :  { %290 = vmatprep.subr.bf16.mxu0 %v327_v4  ;;  %v332_v9 = vld [vmem:[%s435_s1 + $0x18] sm:$0xff]   ;;  %v339_v11 = vld [vmem:[%s435_s1 + $0x80] sm:$0xff]   ;;  %v345_v16 = vld [vmem:[%s435_s1 + $0x88] sm:$0xff]  }
   0x5   :  { %v334_v12 = vld [vmem:[%s435_s1 + $0x20] sm:$0xff]   ;;  %314 = vmatpush3.bf16.msra.mxu1 %v339_v11  ;;  %v336_v17 = vld [vmem:[%s435_s1 + $0x28] sm:$0xff]   ;;  %v337_v19 = vld [vmem:[%s435_s1 + $0x70] sm:$0xff]  }
   0x6   :  { %315 = vmatprep.subr.bf16.mxu1 %v346_v1  ;;  %v15_v14 = vld [vmem:[%s436_s0] sm:$0xff]  ;;  %v344_v20 = vld [vmem:[%s436_s0 + $0x8] ss:$0 sps:$4 sm:$0xff]   ;;  %v338_v21 = vld [vmem:[%s435_s1 + $0x30] sm:$0xff]  }
   0x7   :  { %291 = vmatpush3.bf16.msra.mxu0 %v328_v5  ;;  %v267_v15 = vcombine.high %v15_v14, %v15_v14  ;;  %v53_v18 = vld [vmem:[%s437_s2] sm:$0xff]  ;;  %v340_v22 = vld [vmem:[%s435_s1 + $0x78] sm:$0xff]   ;;  %v266_v24 = vcombine.low %v15_v14, %v15_v14 }
   0x8   :  { %292 = vmatprep.subr.bf16.mxu0 %v329_v6  ;;  %56 = vperm.xlu0 %324, %v53_v18   ;;  %v341_v23 = vld [vmem:[%s435_s1 + $0x38] sm:$0xff]  }
   0x9   :  { %213 = vmatprep.mubr.bf16.mxu0 %v267_v15  ;;  %316 = vmatpush3.bf16.msra.mxu1 %v345_v16 }
   0xb   :  { %293 = vmatpush3.bf16.msra.mxu0 %v330_v7 }
   0xc   :  { %294 = vmatprep.subr.bf16.mxu0 %v331_v8  ;;  %318 = vmatmul.mubr.msk.bf16.vlgmr.msra.gmra.mrb[0].mxu1 %vm177_vm1, %v344_v20 }
   0xf   :  { %295 = vmatpush3.bf16.msra.mxu0 %v332_v9 }
  0x10   :  { %296 = vmatprep.subr.bf16.mxu0 %v333_v10 }
  0x13   :  { %297 = vmatpush3.bf16.msra.mxu0 %v334_v12 }
  0x14   :  { %298 = vmatprep.subr.bf16.mxu0 %v335_v13 }
  0x17   :  { %299 = vmatpush3.bf16.msra.mxu0 %v336_v17 }
  0x18   :  { %300 = vmatprep.subr.bf16.mxu0 %v337_v19 }
  0x1b   :  { %301 = vmatpush3.bf16.msra.mxu0 %v338_v21 }
  0x1c   :  { %302 = vmatprep.subr.bf16.mxu0 %v340_v22 }
  0x1f   :  { %303 = vmatpush3.bf16.msra.mxu0 %v341_v23 }
  0x22   :  { %214 = vmatmul.mubr.bf16.vlgmr.msra.gmra.mrb[0].mxu0 %v266_v24 }
  0x87   :  { %v57_v31 = vpop.permute.xlu0 %56 }
  0xdf   :  { %v255_v25 = vpop.f32.mrb[0].mxu1 }
  0xe0   :  { %v319_v26 = vpop.f32.mrb[1].mxu1 }
  0xe1   :  { %v258_v27 = vpop.f32.mrb[2].mxu1 }
  0xe2   :  { %v320_v28 = vpop.f32.mrb[3].mxu1 }
  0xf5   :  { %v304_v29 = vpop.f32.mrb[0].mxu0 }
  0xf6   :  { %v305_v30 = vpop.f32.mrb[1].mxu0 }
  0xf7   :  { %v306_v32 = vadd.f32 %v305_v30, %v304_v29  ;;  %v307_v33 = vpop.f32.mrb[2].mxu0 }
  0xf8   :  { %v308_v34 = vpop.f32.mrb[3].mxu0 }
  0xf9   :  { %v216_v35 = vadd.f32 %v306_v32, %v57_v31 }
  0xfb   :  { %v256_v36 = vadd.f32 %v255_v25, %v216_v35 }
  0xfd   :  { %261 = vst [vmem:[%s438_s3] sm:$0xff] %v256_v36 }

// kernel: pose_so_decoder_forward.35
= control target key start
LH: loop header
LB: loop body
LE: loop exit
PB: predicated region body
PF: predicated region fallthrough
CT: control target
= control target key end

     0   :  { %v453_v1 = vmov 0   ;;  %vm224_vm0 = vcmask 261120   ;;  %s583_s1 = inlined_call_operand.vmem [shape: bf16[288,128], index: 1, kind: input, shape index: {}]   ;;  %s584_s0 = inlined_call_operand.vmem [shape: bf16[32,288], index: 0, kind: input, shape index: {}]   ;;  %s585_s2 = inlined_call_operand.vmem [shape: f32[32,1], index: 2, kind: input, shape index: {}]   ;;  %s586_s3 = inlined_call_operand.vmem [shape: bf16[32,128], index: 3, kind: input, shape index: {}]   ;;  %s587_s4 = inlined_call_operand.vmem [shape: f32[32,128], index: 4, kind: output, shape index: {}]  }
   0x1   :  { %v427_v0 = vld [vmem:[%s583_s1 + $0x40] sm:$0xff]   ;;  %425 = vset.pattern.permute.xlu0 %v453_v1  ;;  %426 = vset.pattern.permute.xlu1 %v453_v1  ;;  %v429_v3 = vld [vmem:[%s583_s1 + $0x48] sm:$0xff]   ;;  %v431_v5 = vld [vmem:[%s583_s1 + $0x50] sm:$0xff]  }
   0x2   :  { %v428_v2 = vld [vmem:[%s583_s1] sm:$0xff]   ;;  %384 = vmatprep.subr.bf16.mxu0 %v427_v0  ;;  %v430_v4 = vld [vmem:[%s583_s1 + $0x8] sm:$0xff]   ;;  %v432_v6 = vld [vmem:[%s583_s1 + $0x10] sm:$0xff]  }
   0x3   :  { %385 = vmatpush3.bf16.msra.mxu0 %v428_v2  ;;  %v433_v7 = vld [vmem:[%s583_s1 + $0x58] sm:$0xff]   ;;  %v435_v9 = vld [vmem:[%s583_s1 + $0x60] sm:$0xff]   ;;  %v437_v12 = vld [vmem:[%s583_s1 + $0x68] sm:$0xff]  }
   0x4   :  { %386 = vmatprep.subr.bf16.mxu0 %v429_v3  ;;  %v434_v8 = vld [vmem:[%s583_s1 + $0x18] sm:$0xff]   ;;  %v436_v10 = vld [vmem:[%s583_s1 + $0x20] sm:$0xff]   ;;  %v438_v13 = vld [vmem:[%s583_s1 + $0x28] sm:$0xff]  }
   0x5   :  { %v442_v11 = vld [vmem:[%s583_s1 + $0x80] sm:$0xff]   ;;  %v439_v14 = vld [vmem:[%s583_s1 + $0x70] sm:$0xff]   ;;  %v447_v16 = vld [vmem:[%s583_s1 + $0x88] sm:$0xff]  }
   0x6   :  { %416 = vmatprep.subr.bf16.mxu1 %v442_v11  ;;  %v446_v15 = vld [vmem:[%s584_s0 + $0x4] ss:$12 sps:$4 sm:$0xff]   ;;  %v448_v17 = vld [vmem:[%s584_s0 + $0x8] ss:$12 sps:$4 sm:$0xff]   ;;  %v449_v18 = vld [vmem:[%s584_s0 + $0x20] ss:$12 sps:$4 sm:$0xff]  }
   0x7   :  { %387 = vmatpush3.bf16.msra.mxu0 %v430_v4  ;;  %417 = vmatpush3.bf16.msra.mxu1 %v442_v11  ;;  %v62_v19 = vld [vmem:[%s585_s2] sm:$0xff]  ;;  %v440_v20 = vld [vmem:[%s583_s1 + $0x30] sm:$0xff]   ;;  %v441_v22 = vld [vmem:[%s583_s1 + $0x78] sm:$0xff]  }
   0x8   :  { %388 = vmatprep.subr.bf16.mxu0 %v431_v5  ;;  %263 = vmatprep.mubr.bf16.mxu0 %v446_v15  ;;  %v64_v21 = vld [vmem:[%s585_s2 + $0x10] sm:$0xff]  ;;  %v63_v23 = vld [vmem:[%s585_s2 + $0x8] sm:$0xff]  ;;  %v65_v24 = vld [vmem:[%s585_s2 + $0x18] sm:$0xff] }
   0x9   :  { %418 = vmatprep.subr.bf16.mxu1 %v447_v16  ;;  %420 = vmatprep.mubr.msk.bf16.mxu1 %vm224_vm0, %v448_v17  ;;  %v443_v25 = vld [vmem:[%s583_s1 + $0x38] sm:$0xff]   ;;  %v444_v26 = vld [vmem:[%s584_s0] ss:$12 sps:$4 sm:$0xff]  }
   0xa   :  { %68 = vperm.xlu0 %425, %v62_v19   ;;  %78 = vperm.xlu1 %426, %v64_v21   ;;  %v450_v27 = vld [vmem:[%s584_s0 + $0x1c] ss:$12 sps:$4 sm:$0xff]   ;;  %v452_v28 = vld [vmem:[%s584_s0 + $0x18] ss:$12 sps:$4 sm:$0xff]  }
   0xb   :  { %389 = vmatpush3.bf16.msra.mxu0 %v432_v6  ;;  %419 = vmatpush3.bf16.msra.mxu1 %v447_v16  ;;  %v376_v36 = vld [vmem:[%s586_s3] sm:$0xff]   ;;  %v383_v51 = vld [vmem:[%s586_s3 + $0x8] sm:$0xff]  }
   0xc   :  { %390 = vmatprep.subr.bf16.mxu0 %v433_v7  ;;  %v377_v43 = vunpack.c.l.bf16 %v376_v36  ;;  %v378_v46 = vunpack.c.h.bf16 %v376_v36  ;;  %v381_v58 = vunpack.c.l.bf16 %v383_v51  ;;  %v382_v63 = vunpack.c.h.bf16 %v383_v51 }
   0xe   :  { %421 = vmatmul.mubr.msk.bf16.vlgmr.msra.gmra.mrb[0].mxu1 %vm224_vm0, %v449_v18  ;;  %73 = vperm.xlu0 %425, %v63_v23  }
   0xf   :  { %391 = vmatpush3.bf16.msra.mxu0 %v434_v8  ;;  %83 = vperm.xlu1 %426, %v65_v24  }
  0x10   :  { %392 = vmatprep.subr.bf16.mxu0 %v435_v9 }
  0x13   :  { %393 = vmatpush3.bf16.msra.mxu0 %v436_v10 }
  0x14   :  { %394 = vmatprep.subr.bf16.mxu0 %v437_v12 }
  0x17   :  { %395 = vmatpush3.bf16.msra.mxu0 %v438_v13 }
  0x18   :  { %396 = vmatprep.subr.bf16.mxu0 %v439_v14 }
  0x1b   :  { %397 = vmatpush3.bf16.msra.mxu0 %v440_v20 }
  0x1c   :  { %398 = vmatprep.subr.bf16.mxu0 %v441_v22 }
  0x1f   :  { %399 = vmatpush3.bf16.msra.mxu0 %v443_v25 }
  0x22   :  { %264 = vmatmul.mubr.bf16.vlgmr.msra.gmra.mrb[0].mxu0 %v444_v26 }
  0x23   :  { %271 = vmatprep.mubr.bf16.mxu0 %v450_v27 }
  0x2a   :  { %272 = vmatmul.mubr.bf16.gmra.mrb[4].mxu0 %v452_v28 }
  0x89   :  { %v69_v33 = vpop.permute.xlu0 %68  ;;  %v79_v47 = vpop.permute.xlu1 %78 }
  0x8d   :  { %v74_v40 = vpop.permute.xlu0 %73 }
  0x8e   :  { %v84_v60 = vpop.permute.xlu1 %83 }
  0xe1   :  { %v422_v29 = vpop.f32.mrb[0].mxu1 }
  0xe2   :  { %v314_v30 = vpop.f32.mrb[1].mxu1 }
  0xe3   :  { %v423_v31 = vpop.f32.mrb[2].mxu1 }
  0xe4   :  { %v317_v32 = vpop.f32.mrb[3].mxu1 }
  0xf5   :  { %v400_v34 = vpop.f32.mrb[0].mxu0 }
  0xf6   :  { %v401_v35 = vpop.f32.mrb[1].mxu0 }
  0xf7   :  { %v402_v37 = vadd.f32 %v401_v35, %v400_v34  ;;  %v403_v38 = vpop.f32.mrb[2].mxu0 }
  0xf8   :  { %v404_v39 = vpop.f32.mrb[3].mxu0 }
  0xf9   :  { %v405_v41 = vadd.f32 %v404_v39, %v403_v38  ;;  %v266_v42 = vadd.f32 %v402_v37, %v69_v33 }
  0xfb   :  { %v269_v44 = vadd.f32 %v405_v41, %v74_v40  ;;  %v315_v45 = vadd.f32 %v314_v30, %v266_v42 }
  0xfd   :  { %v337_v48 = vadd.f32 %v377_v43, %v315_v45  ;;  %v318_v49 = vadd.f32 %v317_v32, %v269_v44  ;;  %v406_v50 = vpop.f32.mrb[4].mxu0 }
  0xfe   :  { %v407_v52 = vpop.f32.mrb[5].mxu0 }
  0xff   :  { %341 = vst [vmem:[%s587_s4] sm:$0xff] %v337_v48  ;;  %v338_v53 = vadd.f32 %v378_v46, %v318_v49  ;;  %v408_v54 = vadd.f32 %v407_v52, %v406_v50  ;;  %v409_v55 = vpop.f32.mrb[6].mxu0 }
 0x100   :  { %v410_v56 = vpop.f32.mrb[7].mxu0 }
 0x101   :  { %342 = vst [vmem:[%s587_s4 + $0x8] sm:$0xff] %v338_v53  ;;  %v274_v57 = vadd.f32 %v408_v54, %v79_v47  ;;  %v411_v59 = vadd.f32 %v410_v56, %v409_v55 }
 0x103   :  { %v323_v61 = vadd.f32 %v422_v29, %v274_v57  ;;  %v277_v62 = vadd.f32 %v411_v59, %v84_v60 }
 0x105   :  { %v339_v0 = vadd.f32 %v381_v58, %v323_v61  ;;  %v326_v1 = vadd.f32 %v423_v31, %v277_v62 }
 0x107   :  { %343 = vst [vmem:[%s587_s4 + $0x10] sm:$0xff] %v339_v0  ;;  %v340_v2 = vadd.f32 %v382_v63, %v326_v1 }
 0x109   :  { %344 = vst [vmem:[%s587_s4 + $0x18] sm:$0xff] %v340_v2 }

// kernel: pose_so_decoder_forward.33
= control target key start
LH: loop header
LB: loop body
LE: loop exit
PB: predicated region body
PF: predicated region fallthrough
CT: control target
= control target key end

     0   :  { %vm18_vm0 = vcmask 1042432   ;;  %v46_v18 = vlaneseq  ;;  %s234_s0 = inlined_call_operand.vmem [shape: f32[3,128], index: 0, kind: input, shape index: {}]   ;;  %s235_s1 = inlined_call_operand.vmem [shape: bf16[32,128], index: 1, kind: input, shape index: {}]   ;;  %s236_s2 = inlined_call_operand.vmem [shape: bf16[2,32,128], index: 2, kind: input, shape index: {}]   ;;  %s237_s3 = inlined_call_operand.vmem [shape: f32[3,128], index: 3, kind: output, shape index: {0}]   ;;  %s238_s4 = inlined_call_operand.vmem [shape: f32[32,128], index: 4, kind: output, shape index: {1}]   ;;  %s239_s5 = inlined_call_operand.vmem [shape: f32[32,128], index: 5, kind: output, shape index: {2}]  }
   0x1   :  { %v17_v0 = vld [vmem:[%s234_s0] sm:$0x7]  ;;  %v150_v22 = vld [vmem:[%s236_s2 + $0x10] sm:$0xff]   ;;  %v148_v26 = vld [vmem:[%s235_s1 + $0x8] sm:$0xff]  }
   0x2   :  { %v19_v1 = vsel %vm18_vm0, %v17_v0, -inf  ;;  %v47_v19 = vshrl.u32 %v46_v18, 7  ;;  %v125_v20 = vld [vmem:[%s235_s1] sm:$0xff]   ;;  %v149_v27 = vld [vmem:[%s236_s2 + $0x8] sm:$0xff]   ;;  %v151_v28 = vld [vmem:[%s236_s2 + $0x18] sm:$0xff]   ;;  %v142_v32 = vunpack.c.l.bf16 %v150_v22  ;;  %v143_v36 = vunpack.c.h.bf16 %v150_v22 }
   0x3   :  { %v20_v2 = vrot.slane %v19_v1, 4  ;;  %v133_v21 = vld [vmem:[%s236_s2] sm:$0xff]   ;;  %v126_v30 = vunpack.c.l.bf16 %v125_v20  ;;  %v127_v34 = vunpack.c.h.bf16 %v125_v20  ;;  %v130_v37 = vunpack.c.l.bf16 %v148_v26 }
   0x4   :  { %v48_v23 = vsub.s32 0, %v47_v19  ;;  %v64_v24 = vsub.s32 1, %v47_v19  ;;  %v85_v25 = vsub.s32 2, %v47_v19  ;;  %v134_v31 = vunpack.c.l.bf16 %v133_v21 }
   0x5   :  { %v21_v3 = vmax.f32 %v19_v1, %v20_v2  ;;  %v135_v35 = vunpack.c.h.bf16 %v133_v21  ;;  %v138_v38 = vunpack.c.l.bf16 %v149_v27  ;;  %v146_v39 = vunpack.c.l.bf16 %v151_v28 }
   0x6   :  { %v131_v40 = vunpack.c.h.bf16 %v148_v26  ;;  %v139_v44 = vunpack.c.h.bf16 %v149_v27  ;;  %v147_v45 = vunpack.c.h.bf16 %v151_v28 }
   0x7   :  { %v22_v4 = vrot.slane %v21_v3, 2 }
   0x9   :  { %v23_v5 = vmax.f32 %v21_v3, %v22_v4 }
   0xb   :  { %v24_v6 = vrot.slane %v23_v5, 1 }
   0xd   :  { %v25_v7 = vmax.f32 %v23_v5, %v24_v6 }
   0xf   :  { %v26_v8 = vsub.f32 %v17_v0, %v25_v7 }
  0x11   :  { %v27_v9 = vmul.f32 1.442695, %v26_v8 }
  0x13   :  { %152 = vpow2.f32 %v27_v9 }
  0x1d   :  { %v153_v10 = vpop.eup %152 }
  0x1e   :  { %v29_v11 = vsel %vm18_vm0, %v153_v10, 0.0 }
  0x1f   :  { %v30_v12 = vrot.slane %v29_v11, 4 }
  0x21   :  { %v31_v13 = vadd.f32 %v30_v12, %v29_v11 }
  0x23   :  { %v32_v14 = vrot.slane %v31_v13, 2 }
  0x25   :  { %v33_v15 = vadd.f32 %v32_v14, %v31_v13 }
  0x27   :  { %v34_v16 = vrot.slane %v33_v15, 1 }
  0x29   :  { %v35_v17 = vadd.f32 %v34_v16, %v33_v15 }
  0x2b   :  { %154 = vrcp.f32 %v35_v17 }
  0x35   :  { %v155_v29 = vpop.eup %154 }
  0x36   :  { %v37_v33 = vmul.f32 %v155_v29, %v153_v10 }
  0x38   :  { %v49_v41 = vrot.slane %v37_v33, %v48_v23  ;;  %95 = vst [vmem:[%s237_s3] sm:$0x7] %v37_v33  ;;  %v65_v42 = vrot.slane %v37_v33, %v64_v24  ;;  %v86_v43 = vrot.slane %v37_v33, %v85_v25 }
  0x3a   :  { %v50_v46 = vmul.f32 %v126_v30, %v49_v41  ;;  %v66_v47 = vmul.f32 %v134_v31, %v65_v42  ;;  %v87_v48 = vmul.f32 %v142_v32, %v86_v43  ;;  %v51_v49 = vmul.f32 %v127_v34, %v49_v41 }
  0x3b   :  { %v67_v50 = vmul.f32 %v135_v35, %v65_v42  ;;  %v88_v51 = vmul.f32 %v143_v36, %v86_v43  ;;  %v52_v52 = vmul.f32 %v130_v37, %v49_v41  ;;  %v68_v53 = vmul.f32 %v138_v38, %v65_v42 }
  0x3c   :  { %v70_v54 = vadd.f32 %v66_v47, %v50_v46  ;;  %v89_v55 = vmul.f32 %v146_v39, %v86_v43  ;;  %v53_v56 = vmul.f32 %v131_v40, %v49_v41  ;;  %v69_v57 = vmul.f32 %v139_v44, %v65_v42 }
  0x3d   :  { %v71_v58 = vadd.f32 %v67_v50, %v51_v49  ;;  %v72_v59 = vadd.f32 %v68_v53, %v52_v52  ;;  %v90_v60 = vmul.f32 %v147_v45, %v86_v43 }
  0x3e   :  { %v91_v61 = vadd.f32 %v87_v48, %v70_v54  ;;  %v73_v62 = vadd.f32 %v69_v57, %v53_v56 }
  0x3f   :  { %v92_v63 = vadd.f32 %v88_v51, %v71_v58  ;;  %v93_v0 = vadd.f32 %v89_v55, %v72_v59 }
  0x40   :  { %96 = vst [vmem:[%s238_s4] sm:$0xff] %v91_v61  ;;  %v94_v1 = vadd.f32 %v90_v60, %v73_v62  ;;  %v100_v2 = vmul.f32 %v91_v61, %v49_v41 }
  0x41   :  { %97 = vst [vmem:[%s238_s4 + $0x8] sm:$0xff] %v92_v63  ;;  %98 = vst [vmem:[%s238_s4 + $0x10] sm:$0xff] %v93_v0  ;;  %v101_v3 = vmul.f32 %v92_v63, %v49_v41  ;;  %v102_v4 = vmul.f32 %v93_v0, %v49_v41 }
  0x42   :  { %99 = vst [vmem:[%s238_s4 + $0x18] sm:$0xff] %v94_v1  ;;  %104 = vst [vmem:[%s239_s5] sm:$0xff] %v100_v2  ;;  %v103_v5 = vmul.f32 %v94_v1, %v49_v41 }
  0x43   :  { %105 = vst [vmem:[%s239_s5 + $0x8] sm:$0xff] %v101_v3  ;;  %106 = vst [vmem:[%s239_s5 + $0x10] sm:$0xff] %v102_v4 }
  0x44   :  { %107 = vst [vmem:[%s239_s5 + $0x18] sm:$0xff] %v103_v5 }

// kernel: pose_so_decoder_forward.36
= control target key start
LH: loop header
LB: loop body
LE: loop exit
PB: predicated region body
PF: predicated region fallthrough
CT: control target
= control target key end

     0   :  { %v123_v0 = vmov 0.0   ;;  %vm124_vm0 = vmmov 0   ;;  %v125_v2 = vmov 0   ;;  %vm50_vm1 = vcmask 261120   ;;  %s167_s1 = inlined_call_operand.vmem [shape: bf16[32,128], index: 1, kind: input, shape index: {}]   ;;  %s168_s2 = inlined_call_operand.vmem [shape: f32[16,1], index: 2, kind: input, shape index: {}]   ;;  %s169_s0 = inlined_call_operand.vmem [shape: bf16[16,32], index: 0, kind: input, shape index: {}]   ;;  %s170_s3 = inlined_call_operand.vmem [shape: f32[16,128], index: 3, kind: output, shape index: {}]  }
   0x1   :  { %108 = vmatprep.subr.bf16.mxu0 %v123_v0  ;;  %v120_v1 = vld [vmem:[%s167_s1] sm:$0xff]   ;;  %112 = vmatprep.mubr.msk.bf16.mxu0 %vm124_vm0, %v123_v0  ;;  %v121_v3 = vld [vmem:[%s167_s1 + $0x8] sm:$0xff]  }
   0x2   :  { %119 = vset.pattern.permute.xlu0 %v125_v2  ;;  %109 = vmatpush3.bf16.msra.mxu0 %v120_v1  ;;  %v21_v4 = vld [vmem:[%s168_s2] sm:$0xff]  ;;  %v22_v6 = vld [vmem:[%s168_s2 + $0x8] sm:$0xff] }
   0x3   :  { %110 = vmatprep.subr.bf16.mxu0 %v123_v0  ;;  %25 = vperm.xlu0 %119, %v21_v4   ;;  %v122_v5 = vld [vmem:[%s169_s0] sm:$0xff]  }
   0x6   :  { %111 = vmatpush3.bf16.msra.mxu0 %v121_v3 }
   0x7   :  { %30 = vperm.xlu0 %119, %v22_v6  }
   0x9   :  { %113 = vmatmul.mubr.msk.bf16.vlgmr.msra.gmra.mrb[0].mxu0 %vm50_vm1, %v122_v5 }
  0x82   :  { %v26_v7 = vpop.permute.xlu0 %25 }
  0x86   :  { %v31_v11 = vpop.permute.xlu0 %30 }
  0xdc   :  { %v88_v8 = vpop.f32.mrb[0].mxu0 }
  0xdd   :  { %v89_v9 = vadd.f32 %v88_v8, %v26_v7  ;;  %v114_v10 = vpop.f32.mrb[1].mxu0 }
  0xde   :  { %v91_v12 = vpop.f32.mrb[2].mxu0 }
  0xdf   :  { %95 = vst [vmem:[%s170_s3] sm:$0xff] %v89_v9  ;;  %v92_v13 = vadd.f32 %v91_v12, %v31_v11  ;;  %v115_v14 = vpop.f32.mrb[3].mxu0 }
  0xe1   :  { %96 = vst [vmem:[%s170_s3 + $0x8] sm:$0xff] %v92_v13 }

// kernel: pose_so_decoder_forward.37
= control target key start
LH: loop header
LB: loop body
LE: loop exit
PB: predicated region body
PF: predicated region fallthrough
CT: control target
= control target key end

     0   :  { %v363_v1 = vmov 0.0   ;;  %vm364_vm0 = vmmov 0   ;;  %v365_v3 = vmov 0   ;;  %vm190_vm1 = vcmask 261120   ;;  %s461_s1 = inlined_call_operand.vmem [shape: bf16[288,128], index: 1, kind: input, shape index: {}]   ;;  %s462_s0 = inlined_call_operand.vmem [shape: bf16[16,288], index: 0, kind: input, shape index: {}]   ;;  %s463_s2 = inlined_call_operand.vmem [shape: f32[16,1], index: 2, kind: input, shape index: {}]   ;;  %s464_s3 = inlined_call_operand.vmem [shape: f32[16,128], index: 3, kind: output, shape index: {}]  }
   0x1   :  { %v341_v0 = vld [vmem:[%s461_s1 + $0x40] sm:$0xff]   ;;  %329 = vmatprep.subr.bf16.mxu1 %v363_v1  ;;  %333 = vmatprep.mubr.msk.bf16.mxu1 %vm364_vm0, %v363_v1  ;;  %v343_v4 = vld [vmem:[%s461_s1 + $0x48] sm:$0xff]   ;;  %v345_v6 = vld [vmem:[%s461_s1 + $0x50] sm:$0xff]  }
   0x2   :  { %v342_v2 = vld [vmem:[%s461_s1] sm:$0xff]   ;;  %340 = vset.pattern.permute.xlu0 %v365_v3  ;;  %304 = vmatprep.subr.bf16.mxu0 %v341_v0  ;;  %v344_v5 = vld [vmem:[%s461_s1 + $0x8] sm:$0xff]   ;;  %v346_v7 = vld [vmem:[%s461_s1 + $0x10] sm:$0xff]  }
   0x3   :  { %305 = vmatpush3.bf16.msra.mxu0 %v342_v2  ;;  %v347_v8 = vld [vmem:[%s461_s1 + $0x58] sm:$0xff]   ;;  %v349_v10 = vld [vmem:[%s461_s1 + $0x60] sm:$0xff]   ;;  %v351_v13 = vld [vmem:[%s461_s1 + $0x68] sm:$0xff]  }
   0x4   :  { %306 = vmatprep.subr.bf16.mxu0 %v343_v4  ;;  %v348_v9 = vld [vmem:[%s461_s1 + $0x18] sm:$0xff]   ;;  %v355_v11 = vld [vmem:[%s461_s1 + $0x80] sm:$0xff]   ;;  %v352_v14 = vld [vmem:[%s461_s1 + $0x28] sm:$0xff]  }
   0x5   :  { %v350_v12 = vld [vmem:[%s461_s1 + $0x20] sm:$0xff]   ;;  %330 = vmatpush3.bf16.msra.mxu1 %v355_v11  ;;  %v361_v16 = vld [vmem:[%s461_s1 + $0x88] sm:$0xff]   ;;  %v353_v17 = vld [vmem:[%s461_s1 + $0x70] sm:$0xff]  }
   0x6   :  { %331 = vmatprep.subr.bf16.mxu1 %v363_v1  ;;  %v360_v15 = vld [vmem:[%s462_s0 + $0x4] ss:$12 sps:$4 sm:$0xff]   ;;  %v362_v18 = vld [vmem:[%s462_s0 + $0x8] ss:$12 sps:$4 sm:$0xff]   ;;  %v356_v22 = vld [vmem:[%s461_s1 + $0x78] sm:$0xff]  }
   0x7   :  { %307 = vmatpush3.bf16.msra.mxu0 %v344_v5  ;;  %226 = vmatprep.mubr.bf16.mxu0 %v360_v15  ;;  %v55_v19 = vld [vmem:[%s463_s2] sm:$0xff]  ;;  %v56_v20 = vld [vmem:[%s463_s2 + $0x8] sm:$0xff]  ;;  %v354_v21 = vld [vmem:[%s461_s1 + $0x30] sm:$0xff]  }
   0x8   :  { %308 = vmatprep.subr.bf16.mxu0 %v345_v6  ;;  %59 = vperm.xlu0 %340, %v55_v19   ;;  %v357_v23 = vld [vmem:[%s461_s1 + $0x38] sm:$0xff]   ;;  %v358_v24 = vld [vmem:[%s462_s0] ss:$12 sps:$4 sm:$0xff]  }
   0x9   :  { %332 = vmatpush3.bf16.msra.mxu1 %v361_v16 }
   0xb   :  { %309 = vmatpush3.bf16.msra.mxu0 %v346_v7 }
   0xc   :  { %310 = vmatprep.subr.bf16.mxu0 %v347_v8  ;;  %334 = vmatmul.mubr.msk.bf16.vlgmr.msra.gmra.mrb[0].mxu1 %vm190_vm1, %v362_v18 }
   0xd   :  { %64 = vperm.xlu0 %340, %v56_v20  }
   0xf   :  { %311 = vmatpush3.bf16.msra.mxu0 %v348_v9 }
  0x10   :  { %312 = vmatprep.subr.bf16.mxu0 %v349_v10 }
  0x13   :  { %313 = vmatpush3.bf16.msra.mxu0 %v350_v12 }
  0x14   :  { %314 = vmatprep.subr.bf16.mxu0 %v351_v13 }
  0x17   :  { %315 = vmatpush3.bf16.msra.mxu0 %v352_v14 }
  0x18   :  { %316 = vmatprep.subr.bf16.mxu0 %v353_v17 }
  0x1b   :  { %317 = vmatpush3.bf16.msra.mxu0 %v354_v21 }
  0x1c   :  { %318 = vmatprep.subr.bf16.mxu0 %v356_v22 }
  0x1f   :  { %319 = vmatpush3.bf16.msra.mxu0 %v357_v23 }
  0x22   :  { %227 = vmatmul.mubr.bf16.vlgmr.msra.gmra.mrb[0].mxu0 %v358_v24 }
  0x87   :  { %v60_v29 = vpop.permute.xlu0 %59 }
  0x8c   :  { %v65_v37 = vpop.permute.xlu0 %64 }
  0xdf   :  { %v269_v25 = vpop.f32.mrb[0].mxu1 }
  0xe0   :  { %v335_v26 = vpop.f32.mrb[1].mxu1 }
  0xe1   :  { %v272_v27 = vpop.f32.mrb[2].mxu1 }
  0xe2   :  { %v336_v28 = vpop.f32.mrb[3].mxu1 }
  0xf5   :  { %v320_v30 = vpop.f32.mrb[0].mxu0 }
  0xf6   :  { %v321_v31 = vpop.f32.mrb[1].mxu0 }
  0xf7   :  { %v322_v32 = vadd.f32 %v321_v31, %v320_v30  ;;  %v323_v33 = vpop.f32.mrb[2].mxu0 }
  0xf8   :  { %v324_v34 = vpop.f32.mrb[3].mxu0 }
  0xf9   :  { %v229_v35 = vadd.f32 %v322_v32, %v60_v29  ;;  %v325_v36 = vadd.f32 %v324_v34, %v323_v33 }
  0xfb   :  { %v270_v38 = vadd.f32 %v269_v25, %v229_v35  ;;  %v232_v39 = vadd.f32 %v325_v36, %v65_v37 }
  0xfd   :  { %276 = vst [vmem:[%s464_s3] sm:$0xff] %v270_v38  ;;  %v273_v40 = vadd.f32 %v272_v27, %v232_v39 }
  0xff   :  { %277 = vst [vmem:[%s464_s3 + $0x8] sm:$0xff] %v273_v40 }

// kernel: pose_so_decoder_forward.38
= control target key start
LH: loop header
LB: loop body
LE: loop exit
PB: predicated region body
PF: predicated region fallthrough
CT: control target
= control target key end

     0   :  { %v200_v0 = vmov 0   ;;  %vm113_vm0 = vcmask 130048   ;;  %s274_s1 = inlined_call_operand.vmem [shape: bf16[144,128], index: 1, kind: input, shape index: {}]   ;;  %s275_s0 = inlined_call_operand.vmem [shape: bf16[16,144], index: 0, kind: input, shape index: {}]   ;;  %s276_s2 = inlined_call_operand.vmem [shape: f32[16,1], index: 2, kind: input, shape index: {}]   ;;  %s277_s3 = inlined_call_operand.vmem [shape: bf16[16,128], index: 3, kind: input, shape index: {}]   ;;  %s278_s4 = inlined_call_operand.vmem [shape: f32[16,128], index: 4, kind: output, shape index: {}]  }
   0x1   :  { %117 = vmatprep.subr.bf16.mxu0 %v200_v0  ;;  %v188_v1 = vld [vmem:[%s274_s1] sm:$0xff]   ;;  %187 = vset.pattern.permute.xlu0 %v200_v0  ;;  %v189_v2 = vld [vmem:[%s274_s1 + $0x8] sm:$0xff]   ;;  %v190_v3 = vld [vmem:[%s274_s1 + $0x10] sm:$0xff]  }
   0x2   :  { %118 = vmatpush1.bf16.msra.mxu0 %v188_v1  ;;  %v191_v4 = vld [vmem:[%s274_s1 + $0x18] sm:$0xff]   ;;  %v199_v5 = vld [vmem:[%s275_s0 + $0x4] ss:$8 sps:$4 sm:$0xff]   ;;  %v194_v10 = vld [vmem:[%s274_s1 + $0x30] sm:$0xff]  }
   0x3   :  { %119 = vmatprep.subr.bf16.mxu0 %v200_v0  ;;  %v38_v6 = vld [vmem:[%s276_s2] sm:$0xff]  ;;  %181 = vmatprep.mubr.msk.bf16.mxu0 %vm113_vm0, %v199_v5  ;;  %v39_v7 = vld [vmem:[%s276_s2 + $0x8] sm:$0xff]  ;;  %v195_v11 = vld [vmem:[%s274_s1 + $0x38] sm:$0xff]  }
   0x4   :  { %42 = vperm.xlu0 %187, %v38_v6   ;;  %v192_v8 = vld [vmem:[%s274_s1 + $0x20] sm:$0xff]   ;;  %v193_v9 = vld [vmem:[%s274_s1 + $0x28] sm:$0xff]  }
   0x5   :  { %v196_v12 = vld [vmem:[%s274_s1 + $0x40] sm:$0xff]  }
   0x6   :  { %120 = vmatpush1.bf16.msra.mxu0 %v189_v2  ;;  %v197_v13 = vld [vmem:[%s275_s0] ss:$8 sps:$4 sm:$0xff]  }
   0x7   :  { %121 = vmatprep.subr.bf16.mxu0 %v200_v0  ;;  %v183_v15 = vld [vmem:[%s277_s3] sm:$0xff]  }
   0x8   :  { %47 = vperm.xlu0 %187, %v39_v7   ;;  %v184_v16 = vunpack.c.l.bf16 %v183_v15  ;;  %v185_v20 = vunpack.c.h.bf16 %v183_v15 }
   0xa   :  { %122 = vmatpush1.bf16.msra.mxu0 %v190_v3 }
   0xb   :  { %123 = vmatprep.subr.bf16.mxu0 %v200_v0 }
   0xe   :  { %124 = vmatpush1.bf16.msra.mxu0 %v191_v4 }
   0xf   :  { %125 = vmatprep.subr.bf16.mxu0 %v200_v0 }
  0x12   :  { %126 = vmatpush1.bf16.msra.mxu0 %v192_v8 }
  0x13   :  { %127 = vmatprep.subr.bf16.mxu0 %v200_v0 }
  0x16   :  { %128 = vmatpush1.bf16.msra.mxu0 %v193_v9 }
  0x17   :  { %129 = vmatprep.subr.bf16.mxu0 %v200_v0 }
  0x1a   :  { %130 = vmatpush1.bf16.msra.mxu0 %v194_v10 }
  0x1b   :  { %131 = vmatprep.subr.bf16.mxu0 %v200_v0 }
  0x1e   :  { %132 = vmatpush1.bf16.msra.mxu0 %v195_v11 }
  0x1f   :  { %133 = vmatprep.subr.bf16.mxu0 %v200_v0 }
  0x22   :  { %134 = vmatpush1.bf16.msra.mxu0 %v196_v12 }
  0x25   :  { %150 = vmatmul.mubr.bf16.vlgmr.msra.gmra.mrb[0].mxu0 %v197_v13 }
  0x83   :  { %v43_v14 = vpop.permute.xlu0 %42 }
  0x87   :  { %v48_v21 = vpop.permute.xlu0 %47 }
  0xf8   :  { %v151_v17 = vpop.f32.mrb[0].mxu0 }
  0xf9   :  { %v152_v18 = vadd.f32 %v151_v17, %v43_v14  ;;  %v153_v19 = vpop.f32.mrb[1].mxu0 }
  0xfa   :  { %v154_v22 = vpop.f32.mrb[2].mxu0 }
  0xfb   :  { %v162_v23 = vadd.f32 %v184_v16, %v152_v18  ;;  %v155_v24 = vadd.f32 %v154_v22, %v48_v21  ;;  %v156_v25 = vpop.f32.mrb[3].mxu0 }
  0xfd   :  { %164 = vst [vmem:[%s278_s4] sm:$0xff] %v162_v23  ;;  %v163_v26 = vadd.f32 %v185_v20, %v155_v24 }
  0xff   :  { %165 = vst [vmem:[%s278_s4 + $0x8] sm:$0xff] %v163_v26 }

// kernel: pose_so_decoder_forward.39
= control target key start
LH: loop header
LB: loop body
LE: loop exit
PB: predicated region body
PF: predicated region fallthrough
CT: control target
= control target key end

     0   :  { %v174_v0 = vmov 0   ;;  %vm100_vm0 = vcmask 130048   ;;  %s231_s1 = inlined_call_operand.vmem [shape: bf16[144,128], index: 1, kind: input, shape index: {}]   ;;  %s232_s0 = inlined_call_operand.vmem [shape: bf16[8,144], index: 0, kind: input, shape index: {}]   ;;  %s233_s2 = inlined_call_operand.vmem [shape: f32[8,1], index: 2, kind: input, shape index: {}]   ;;  %s234_s3 = inlined_call_operand.vmem [shape: f32[8,128], index: 3, kind: output, shape index: {}]  }
   0x1   :  { %104 = vmatprep.subr.bf16.mxu0 %v174_v0  ;;  %v163_v1 = vld [vmem:[%s231_s1] sm:$0xff]   ;;  %162 = vset.pattern.permute.xlu0 %v174_v0  ;;  %v164_v2 = vld [vmem:[%s231_s1 + $0x8] sm:$0xff]   ;;  %v165_v3 = vld [vmem:[%s231_s1 + $0x10] sm:$0xff]  }
   0x2   :  { %105 = vmatpush1.bf16.msra.mxu0 %v163_v1  ;;  %v15_v4 = vld [vmem:[%s232_s0] sm:$0xff]  ;;  %v166_v6 = vld [vmem:[%s231_s1 + $0x18] sm:$0xff]   ;;  %v168_v9 = vld [vmem:[%s231_s1 + $0x28] sm:$0xff]  }
   0x3   :  { %106 = vmatprep.subr.bf16.mxu0 %v174_v0  ;;  %v34_v5 = vld [vmem:[%s233_s2] sm:$0xff]  ;;  %v150_v7 = vcombine.high %v15_v4, %v15_v4  ;;  %v169_v10 = vld [vmem:[%s231_s1 + $0x30] sm:$0xff]   ;;  %v170_v11 = vld [vmem:[%s231_s1 + $0x38] sm:$0xff]   ;;  %v149_v13 = vcombine.low %v15_v4, %v15_v4 }
   0x4   :  { %37 = vperm.xlu0 %162, %v34_v5   ;;  %v167_v8 = vld [vmem:[%s231_s1 + $0x20] sm:$0xff]  }
   0x5   :  { %160 = vmatprep.mubr.msk.bf16.mxu0 %vm100_vm0, %v150_v7  ;;  %v171_v12 = vld [vmem:[%s231_s1 + $0x40] sm:$0xff]  }
   0x6   :  { %107 = vmatpush1.bf16.msra.mxu0 %v164_v2 }
   0x7   :  { %108 = vmatprep.subr.bf16.mxu0 %v174_v0 }
   0xa   :  { %109 = vmatpush1.bf16.msra.mxu0 %v165_v3 }
   0xb   :  { %110 = vmatprep.subr.bf16.mxu0 %v174_v0 }
   0xe   :  { %111 = vmatpush1.bf16.msra.mxu0 %v166_v6 }
   0xf   :  { %112 = vmatprep.subr.bf16.mxu0 %v174_v0 }
  0x12   :  { %113 = vmatpush1.bf16.msra.mxu0 %v167_v8 }
  0x13   :  { %114 = vmatprep.subr.bf16.mxu0 %v174_v0 }
  0x16   :  { %115 = vmatpush1.bf16.msra.mxu0 %v168_v9 }
  0x17   :  { %116 = vmatprep.subr.bf16.mxu0 %v174_v0 }
  0x1a   :  { %117 = vmatpush1.bf16.msra.mxu0 %v169_v10 }
  0x1b   :  { %118 = vmatprep.subr.bf16.mxu0 %v174_v0 }
  0x1e   :  { %119 = vmatpush1.bf16.msra.mxu0 %v170_v11 }
  0x1f   :  { %120 = vmatprep.subr.bf16.mxu0 %v174_v0 }
  0x22   :  { %121 = vmatpush1.bf16.msra.mxu0 %v171_v12 }
  0x25   :  { %137 = vmatmul.mubr.bf16.vlgmr.msra.gmra.mrb[0].mxu0 %v149_v13 }
  0x83   :  { %v38_v14 = vpop.permute.xlu0 %37 }
  0xf8   :  { %v138_v15 = vpop.f32.mrb[0].mxu0 }
  0xf9   :  { %v139_v16 = vadd.f32 %v138_v15, %v38_v14  ;;  %v140_v17 = vpop.f32.mrb[1].mxu0 }
  0xfa   :  { %v141_v18 = vpop.f32.mrb[2].mxu0 }
  0xfb   :  { %144 = vst [vmem:[%s234_s3] sm:$0xff] %v139_v16  ;;  %v142_v19 = vpop.f32.mrb[3].mxu0 }

// kernel: pose_so_decoder_forward.40
= control target key start
LH: loop header
LB: loop body
LE: loop exit
PB: predicated region body
PF: predicated region fallthrough
CT: control target
= control target key end

     0   :  { %vm18_vm0 = vcmask 1042432   ;;  %v42_v18 = vlaneseq  ;;  %s168_s0 = inlined_call_operand.vmem [shape: f32[3,128], index: 0, kind: input, shape index: {}]   ;;  %s169_s1 = inlined_call_operand.vmem [shape: bf16[16,128], index: 1, kind: input, shape index: {}]   ;;  %s170_s2 = inlined_call_operand.vmem [shape: bf16[2,16,128], index: 2, kind: input, shape index: {}]   ;;  %s171_s3 = inlined_call_operand.vmem [shape: f32[3,128], index: 3, kind: output, shape index: {0}]   ;;  %s172_s4 = inlined_call_operand.vmem [shape: f32[16,128], index: 4, kind: output, shape index: {1}]   ;;  %s173_s5 = inlined_call_operand.vmem [shape: f32[16,128], index: 5, kind: output, shape index: {2}]  }
   0x1   :  { %v17_v0 = vld [vmem:[%s168_s0] sm:$0x7]  ;;  %v106_v22 = vld [vmem:[%s170_s2 + $0x8] sm:$0xff]  }
   0x2   :  { %v19_v1 = vsel %vm18_vm0, %v17_v0, -inf  ;;  %v43_v19 = vshrl.u32 %v42_v18, 7  ;;  %v95_v20 = vld [vmem:[%s169_s1] sm:$0xff]   ;;  %v104_v30 = vunpack.c.l.bf16 %v106_v22  ;;  %v105_v33 = vunpack.c.h.bf16 %v106_v22 }
   0x3   :  { %v20_v2 = vrot.slane %v19_v1, 4  ;;  %v99_v21 = vld [vmem:[%s170_s2] sm:$0xff]   ;;  %v96_v27 = vunpack.c.l.bf16 %v95_v20  ;;  %v97_v31 = vunpack.c.h.bf16 %v95_v20 }
   0x4   :  { %v44_v23 = vsub.s32 0, %v43_v19  ;;  %v54_v24 = vsub.s32 1, %v43_v19  ;;  %v67_v25 = vsub.s32 2, %v43_v19  ;;  %v100_v29 = vunpack.c.l.bf16 %v99_v21 }
   0x5   :  { %v21_v3 = vmax.f32 %v19_v1, %v20_v2  ;;  %v101_v32 = vunpack.c.h.bf16 %v99_v21 }
   0x7   :  { %v22_v4 = vrot.slane %v21_v3, 2 }
   0x9   :  { %v23_v5 = vmax.f32 %v21_v3, %v22_v4 }
   0xb   :  { %v24_v6 = vrot.slane %v23_v5, 1 }
   0xd   :  { %v25_v7 = vmax.f32 %v23_v5, %v24_v6 }
   0xf   :  { %v26_v8 = vsub.f32 %v17_v0, %v25_v7 }
  0x11   :  { %v27_v9 = vmul.f32 1.442695, %v26_v8 }
  0x13   :  { %107 = vpow2.f32 %v27_v9 }
  0x1d   :  { %v108_v10 = vpop.eup %107 }
  0x1e   :  { %v29_v11 = vsel %vm18_vm0, %v108_v10, 0.0 }
  0x1f   :  { %v30_v12 = vrot.slane %v29_v11, 4 }
  0x21   :  { %v31_v13 = vadd.f32 %v30_v12, %v29_v11 }
  0x23   :  { %v32_v14 = vrot.slane %v31_v13, 2 }
  0x25   :  { %v33_v15 = vadd.f32 %v32_v14, %v31_v13 }
  0x27   :  { %v34_v16 = vrot.slane %v33_v15, 1 }
  0x29   :  { %v35_v17 = vadd.f32 %v34_v16, %v33_v15 }
  0x2b   :  { %109 = vrcp.f32 %v35_v17 }
  0x35   :  { %v110_v26 = vpop.eup %109 }
  0x36   :  { %v37_v28 = vmul.f32 %v110_v26, %v108_v10 }
  0x38   :  { %73 = vst [vmem:[%s171_s3] sm:$0x7] %v37_v28  ;;  %v45_v34 = vrot.slane %v37_v28, %v44_v23  ;;  %v55_v35 = vrot.slane %v37_v28, %v54_v24  ;;  %v68_v36 = vrot.slane %v37_v28, %v67_v25 }
  0x3a   :  { %v46_v37 = vmul.f32 %v96_v27, %v45_v34  ;;  %v56_v38 = vmul.f32 %v100_v29, %v55_v35  ;;  %v69_v39 = vmul.f32 %v104_v30, %v68_v36  ;;  %v47_v40 = vmul.f32 %v97_v31, %v45_v34 }
  0x3b   :  { %v57_v41 = vmul.f32 %v101_v32, %v55_v35  ;;  %v70_v42 = vmul.f32 %v105_v33, %v68_v36 }
  0x3c   :  { %v58_v43 = vadd.f32 %v56_v38, %v46_v37 }
  0x3d   :  { %v59_v44 = vadd.f32 %v57_v41, %v47_v40 }
  0x3e   :  { %v71_v45 = vadd.f32 %v69_v39, %v58_v43 }
  0x3f   :  { %v72_v46 = vadd.f32 %v70_v42, %v59_v44 }
  0x40   :  { %74 = vst [vmem:[%s172_s4] sm:$0xff] %v71_v45  ;;  %v76_v47 = vmul.f32 %v71_v45, %v45_v34 }
  0x41   :  { %75 = vst [vmem:[%s172_s4 + $0x8] sm:$0xff] %v72_v46  ;;  %v77_v48 = vmul.f32 %v72_v46, %v45_v34 }
  0x42   :  { %78 = vst [vmem:[%s173_s5] sm:$0xff] %v76_v47 }
  0x43   :  { %79 = vst [vmem:[%s173_s5 + $0x8] sm:$0xff] %v77_v48 }

// kernel: pose_so_decoder_forward.44
= control target key start
LH: loop header
LB: loop body
LE: loop exit
PB: predicated region body
PF: predicated region fallthrough
CT: control target
= control target key end

     0   :  { %v436_v1 = vmov 0   ;;  %vm244_vm0 = vcmask 130048   ;;  %s583_s1 = inlined_call_operand.vmem [shape: bf16[144,512], index: 1, kind: input, shape index: {}]   ;;  %s584_s0 = inlined_call_operand.vmem [shape: bf16[8,144], index: 0, kind: input, shape index: {}]   ;;  %s585_s2 = inlined_call_operand.vmem [shape: f32[8,1], index: 2, kind: input, shape index: {}]   ;;  %s586_s3 = inlined_call_operand.vmem [shape: f32[8,512], index: 3, kind: output, shape index: {}]  }
   0x1   :  { %v380_v0 = vld [vmem:[%s583_s1 + $0x4] ss:$16 sps:$4 sm:$0xff]   ;;  %379 = vset.pattern.permute.xlu0 %v436_v1  ;;  %v382_v2 = vld [vmem:[%s583_s1 + $0xc] ss:$16 sps:$4 sm:$0xff]   ;;  %v384_v3 = vld [vmem:[%s583_s1] ss:$16 sps:$4 sm:$0xff]  }
   0x2   :  { %248 = vmatprep.subr.bf16.mxu0 %v380_v0  ;;  %v385_v4 = vld [vmem:[%s583_s1 + $0x8] ss:$16 sps:$4 sm:$0xff]   ;;  %289 = vmatprep.subr.bf16.mxu1 %v382_v2  ;;  %v386_v5 = vld [vmem:[%s583_s1 + $0x24] ss:$16 sps:$4 sm:$0xff]   ;;  %v388_v6 = vld [vmem:[%s583_s1 + $0x2c] ss:$16 sps:$4 sm:$0xff]  }
   0x3   :  { %249 = vmatpush1.bf16.msra.mxu0 %v384_v3  ;;  %290 = vmatpush1.bf16.msra.mxu1 %v385_v4  ;;  %v390_v7 = vld [vmem:[%s583_s1 + $0x20] ss:$16 sps:$4 sm:$0xff]   ;;  %v391_v8 = vld [vmem:[%s583_s1 + $0x28] ss:$16 sps:$4 sm:$0xff]   ;;  %v392_v9 = vld [vmem:[%s583_s1 + $0x44] ss:$16 sps:$4 sm:$0xff]  }
   0x4   :  { %250 = vmatprep.subr.bf16.mxu0 %v386_v5  ;;  %291 = vmatprep.subr.bf16.mxu1 %v388_v6  ;;  %v394_v10 = vld [vmem:[%s583_s1 + $0x4c] ss:$16 sps:$4 sm:$0xff]   ;;  %v396_v11 = vld [vmem:[%s583_s1 + $0x40] ss:$16 sps:$4 sm:$0xff]   ;;  %v397_v12 = vld [vmem:[%s583_s1 + $0x48] ss:$16 sps:$4 sm:$0xff]  }
   0x5   :  { %v398_v13 = vld [vmem:[%s583_s1 + $0x64] ss:$16 sps:$4 sm:$0xff]   ;;  %v400_v14 = vld [vmem:[%s583_s1 + $0x6c] ss:$16 sps:$4 sm:$0xff]   ;;  %v402_v15 = vld [vmem:[%s583_s1 + $0x60] ss:$16 sps:$4 sm:$0xff]  }
   0x6   :  { %v403_v16 = vld [vmem:[%s583_s1 + $0x68] ss:$16 sps:$4 sm:$0xff]   ;;  %v404_v17 = vld [vmem:[%s583_s1 + $0x84] ss:$16 sps:$4 sm:$0xff]   ;;  %v406_v18 = vld [vmem:[%s583_s1 + $0x8c] ss:$16 sps:$4 sm:$0xff]  }
   0x7   :  { %251 = vmatpush1.bf16.msra.mxu0 %v390_v7  ;;  %292 = vmatpush1.bf16.msra.mxu1 %v391_v8  ;;  %v408_v19 = vld [vmem:[%s583_s1 + $0x80] ss:$16 sps:$4 sm:$0xff]   ;;  %v409_v20 = vld [vmem:[%s583_s1 + $0x88] ss:$16 sps:$4 sm:$0xff]   ;;  %v410_v21 = vld [vmem:[%s583_s1 + $0xa4] ss:$16 sps:$4 sm:$0xff]  }
   0x8   :  { %252 = vmatprep.subr.bf16.mxu0 %v392_v9  ;;  %293 = vmatprep.subr.bf16.mxu1 %v394_v10  ;;  %v412_v22 = vld [vmem:[%s583_s1 + $0xac] ss:$16 sps:$4 sm:$0xff]   ;;  %v414_v23 = vld [vmem:[%s583_s1 + $0xa0] ss:$16 sps:$4 sm:$0xff]   ;;  %v415_v24 = vld [vmem:[%s583_s1 + $0xa8] ss:$16 sps:$4 sm:$0xff]  }
   0x9   :  { %v416_v25 = vld [vmem:[%s583_s1 + $0xc4] ss:$16 sps:$4 sm:$0xff]   ;;  %v418_v26 = vld [vmem:[%s583_s1 + $0xcc] ss:$16 sps:$4 sm:$0xff]   ;;  %v420_v27 = vld [vmem:[%s583_s1 + $0xc0] ss:$16 sps:$4 sm:$0xff]  }
   0xa   :  { %v421_v28 = vld [vmem:[%s583_s1 + $0xc8] ss:$16 sps:$4 sm:$0xff]   ;;  %v15_v29 = vld [vmem:[%s584_s0] sm:$0xff]  ;;  %v424_v32 = vld [vmem:[%s583_s1 + $0xec] ss:$16 sps:$4 sm:$0xff]  }
   0xb   :  { %253 = vmatpush1.bf16.msra.mxu0 %v396_v11  ;;  %294 = vmatpush1.bf16.msra.mxu1 %v397_v12  ;;  %v52_v30 = vld [vmem:[%s585_s2] sm:$0xff]  ;;  %v339_v33 = vcombine.high %v15_v29, %v15_v29  ;;  %v427_v35 = vld [vmem:[%s583_s1 + $0xe8] ss:$16 sps:$4 sm:$0xff]   ;;  %v430_v37 = vld [vmem:[%s583_s1 + $0x10c] ss:$16 sps:$4 sm:$0xff]   ;;  %v338_v40 = vcombine.low %v15_v29, %v15_v29 }
   0xc   :  { %254 = vmatprep.subr.bf16.mxu0 %v398_v13  ;;  %295 = vmatprep.subr.bf16.mxu1 %v400_v14  ;;  %v422_v31 = vld [vmem:[%s583_s1 + $0xe4] ss:$16 sps:$4 sm:$0xff]   ;;  %v426_v34 = vld [vmem:[%s583_s1 + $0xe0] ss:$16 sps:$4 sm:$0xff]   ;;  %v433_v39 = vld [vmem:[%s583_s1 + $0x108] ss:$16 sps:$4 sm:$0xff]  }
   0xd   :  { %55 = vperm.xlu0 %379, %v52_v30   ;;  %376 = vmatprep.mubr.msk.bf16.mxu0 %vm244_vm0, %v339_v33  ;;  %v428_v36 = vld [vmem:[%s583_s1 + $0x104] ss:$16 sps:$4 sm:$0xff]   ;;  %v432_v38 = vld [vmem:[%s583_s1 + $0x100] ss:$16 sps:$4 sm:$0xff]  }
   0xe   :  { %377 = vmatprep.mubr.msk.bf16.mxu1 %vm244_vm0, %v339_v33 }
   0xf   :  { %255 = vmatpush1.bf16.msra.mxu0 %v402_v15  ;;  %296 = vmatpush1.bf16.msra.mxu1 %v403_v16 }
  0x10   :  { %256 = vmatprep.subr.bf16.mxu0 %v404_v17  ;;  %297 = vmatprep.subr.bf16.mxu1 %v406_v18 }
  0x13   :  { %257 = vmatpush1.bf16.msra.mxu0 %v408_v19  ;;  %298 = vmatpush1.bf16.msra.mxu1 %v409_v20 }
  0x14   :  { %258 = vmatprep.subr.bf16.mxu0 %v410_v21  ;;  %299 = vmatprep.subr.bf16.mxu1 %v412_v22 }
  0x17   :  { %259 = vmatpush1.bf16.msra.mxu0 %v414_v23  ;;  %300 = vmatpush1.bf16.msra.mxu1 %v415_v24 }
  0x18   :  { %260 = vmatprep.subr.bf16.mxu0 %v416_v25  ;;  %301 = vmatprep.subr.bf16.mxu1 %v418_v26 }
  0x1b   :  { %261 = vmatpush1.bf16.msra.mxu0 %v420_v27  ;;  %302 = vmatpush1.bf16.msra.mxu1 %v421_v28 }
  0x1c   :  { %262 = vmatprep.subr.bf16.mxu0 %v422_v31  ;;  %303 = vmatprep.subr.bf16.mxu1 %v424_v32 }
  0x1f   :  { %263 = vmatpush1.bf16.msra.mxu0 %v426_v34  ;;  %304 = vmatpush1.bf16.msra.mxu1 %v427_v35 }
  0x20   :  { %264 = vmatprep.subr.bf16.mxu0 %v428_v36  ;;  %305 = vmatprep.subr.bf16.mxu1 %v430_v37 }
  0x23   :  { %265 = vmatpush1.bf16.msra.mxu0 %v432_v38  ;;  %306 = vmatpush1.bf16.msra.mxu1 %v433_v39 }
  0x26   :  { %281 = vmatmul.mubr.bf16.vlgmr.msra.gmra.mrb[0].mxu0 %v338_v40  ;;  %322 = vmatmul.mubr.bf16.vlgmr.msra.gmra.mrb[0].mxu1 %v338_v40 }
  0x8c   :  { %v56_v41 = vpop.permute.xlu0 %55 }
  0xf9   :  { %v282_v42 = vpop.f32.mrb[0].mxu0  ;;  %v323_v43 = vpop.f32.mrb[0].mxu1 }
  0xfa   :  { %v283_v44 = vadd.f32 %v282_v42, %v56_v41  ;;  %v324_v45 = vadd.f32 %v323_v43, %v56_v41  ;;  %v284_v46 = vpop.f32.mrb[1].mxu0  ;;  %v325_v47 = vpop.f32.mrb[1].mxu1 }
  0xfb   :  { %v285_v48 = vadd.f32 %v284_v46, %v56_v41  ;;  %v326_v49 = vadd.f32 %v325_v47, %v56_v41  ;;  %v286_v50 = vpop.f32.mrb[2].mxu0  ;;  %v327_v51 = vpop.f32.mrb[2].mxu1 }
  0xfc   :  { %330 = vst [vmem:[%s586_s3] sm:$0xff] %v283_v44  ;;  %332 = vst [vmem:[%s586_s3 + $0x10] sm:$0xff] %v324_v45  ;;  %v287_v52 = vpop.f32.mrb[3].mxu0  ;;  %v328_v53 = vpop.f32.mrb[3].mxu1 }
  0xfd   :  { %331 = vst [vmem:[%s586_s3 + $0x8] sm:$0xff] %v285_v48  ;;  %333 = vst [vmem:[%s586_s3 + $0x18] sm:$0xff] %v326_v49 }

// kernel: pose_so_decoder_forward.43
= control target key start
LH: loop header
LB: loop body
LE: loop exit
PB: predicated region body
PF: predicated region fallthrough
CT: control target
= control target key end

     0   :  { %v94_v0 = vmov 0.0   ;;  %vm95_vm0 = vmmov 0   ;;  %v96_v2 = vmov 0   ;;  %vm30_vm1 = vcmask 130048   ;;  %s129_s1 = inlined_call_operand.vmem [shape: bf16[16,128], index: 1, kind: input, shape index: {}]   ;;  %s130_s0 = inlined_call_operand.vmem [shape: bf16[8,16], index: 0, kind: input, shape index: {}]   ;;  %s131_s2 = inlined_call_operand.vmem [shape: f32[8,1], index: 2, kind: input, shape index: {}]   ;;  %s132_s3 = inlined_call_operand.vmem [shape: f32[8,128], index: 3, kind: output, shape index: {}]  }
   0x1   :  { %83 = vmatprep.subr.bf16.mxu0 %v94_v0  ;;  %v93_v1 = vld [vmem:[%s129_s1] sm:$0xff]   ;;  %85 = vmatprep.mubr.msk.bf16.mxu0 %vm95_vm0, %v94_v0 }
   0x2   :  { %92 = vset.pattern.permute.xlu0 %v96_v2  ;;  %v18_v3 = vld [vmem:[%s131_s2] sm:$0xff]  ;;  %84 = vmatpush3.bf16.msra.mxu0 %v93_v1 }
   0x3   :  { %v15_v4 = vld [vmem:[%s130_s0] sm:$0xf]  ;;  %21 = vperm.xlu0 %92, %v18_v3  }
   0x5   :  { %86 = vmatmul.mubr.msk.bf16.vlgmr.msra.gmra.mrb[0].mxu0 %vm30_vm1, %v15_v4 }
  0x82   :  { %v22_v5 = vpop.permute.xlu0 %21 }
  0xd8   :  { %v68_v6 = vpop.f32.mrb[0].mxu0 }
  0xd9   :  { %v69_v7 = vadd.f32 %v68_v6, %v22_v5  ;;  %v87_v8 = vpop.f32.mrb[1].mxu0 }
  0xda   :  { %v71_v9 = vpop.f32.mrb[2].mxu0 }
  0xdb   :  { %74 = vst [vmem:[%s132_s3] sm:$0xff] %v69_v7  ;;  %v88_v10 = vpop.f32.mrb[3].mxu0 }

// kernel: pose_so_decoder_forward.45
= control target key start
LH: loop header
LB: loop body
LE: loop exit
PB: predicated region body
PF: predicated region fallthrough
CT: control target
= control target key end

     0   :  { %v304_v1 = vmov 0   ;;  %vm137_vm0 = vcmask 1043456   ;;  %vm133_vm1 = vcmask 588800   ;;  %s408_s1 = inlined_call_operand.vmem [shape: bf16[72,512], index: 1, kind: input, shape index: {}]   ;;  %s409_s2 = inlined_call_operand.vmem [shape: f32[8,1], index: 2, kind: input, shape index: {}]   ;;  %s410_s0 = inlined_call_operand.vmem [shape: bf16[8,72], index: 0, kind: input, shape index: {}]   ;;  %s411_s3 = inlined_call_operand.vmem [shape: bf16[8,512], index: 3, kind: input, shape index: {}]   ;;  %s412_s4 = inlined_call_operand.vmem [shape: f32[8,512], index: 4, kind: output, shape index: {}]  }
   0x1   :  { %v276_v0 = vld [vmem:[%s408_s1 + $0x4] ss:$16 sps:$4 sm:$0xff]   ;;  %182 = vmatprep.mubr.bf16.mxu0 %v304_v1  ;;  %223 = vmatprep.mubr.bf16.mxu1 %v304_v1  ;;  %v278_v2 = vld [vmem:[%s408_s1 + $0xc] ss:$16 sps:$4 sm:$0xff]   ;;  %v280_v3 = vld [vmem:[%s408_s1] ss:$16 sps:$4 sm:$0xff]  }
   0x2   :  { %275 = vset.pattern.permute.xlu0 %v304_v1  ;;  %150 = vmatprep.subr.bf16.mxu0 %v276_v0  ;;  %v281_v4 = vld [vmem:[%s408_s1 + $0x8] ss:$16 sps:$4 sm:$0xff]   ;;  %v282_v5 = vld [vmem:[%s408_s1 + $0x24] ss:$16 sps:$4 sm:$0xff]   ;;  %v284_v6 = vld [vmem:[%s408_s1 + $0x2c] ss:$16 sps:$4 sm:$0xff]  }
   0x3   :  { %191 = vmatprep.subr.bf16.mxu1 %v278_v2  ;;  %151 = vmatpush1.bf16.msra.mxu0 %v280_v3  ;;  %v286_v7 = vld [vmem:[%s408_s1 + $0x20] ss:$16 sps:$4 sm:$0xff]   ;;  %v287_v8 = vld [vmem:[%s408_s1 + $0x28] ss:$16 sps:$4 sm:$0xff]   ;;  %v288_v9 = vld [vmem:[%s408_s1 + $0x44] ss:$16 sps:$4 sm:$0xff]  }
   0x4   :  { %192 = vmatpush1.bf16.msra.mxu1 %v281_v4  ;;  %152 = vmatprep.subr.bf16.mxu0 %v282_v5  ;;  %v290_v10 = vld [vmem:[%s408_s1 + $0x4c] ss:$16 sps:$4 sm:$0xff]   ;;  %v292_v11 = vld [vmem:[%s408_s1 + $0x40] ss:$16 sps:$4 sm:$0xff]   ;;  %v293_v12 = vld [vmem:[%s408_s1 + $0x48] ss:$16 sps:$4 sm:$0xff]  }
   0x5   :  { %193 = vmatprep.subr.bf16.mxu1 %v284_v6  ;;  %v294_v13 = vld [vmem:[%s408_s1 + $0x64] ss:$16 sps:$4 sm:$0xff]   ;;  %v296_v14 = vld [vmem:[%s408_s1 + $0x6c] ss:$16 sps:$4 sm:$0xff]   ;;  %v298_v18 = vld [vmem:[%s408_s1 + $0x60] ss:$16 sps:$4 sm:$0xff]  }
   0x6   :  { %v35_v15 = vld [vmem:[%s408_s1 + $0x80] sm:$0xff]  ;;  %v36_v16 = vld [vmem:[%s408_s1 + $0x88] sm:$0xff] }
   0x7   :  { %153 = vmatpush1.bf16.msra.mxu0 %v286_v7  ;;  %v37_v17 = vld [vmem:[%s409_s2] sm:$0xff]  ;;  %v299_v19 = vld [vmem:[%s408_s1 + $0x68] ss:$16 sps:$4 sm:$0xff]   ;;  %v267_v20 = vcombine.high %v35_v15, %v35_v15  ;;  %v269_v21 = vcombine.high %v36_v16, %v36_v16  ;;  %v266_v22 = vcombine.low %v35_v15, %v35_v15  ;;  %v268_v23 = vcombine.low %v36_v16, %v36_v16 }
   0x8   :  { %194 = vmatpush1.bf16.msra.mxu1 %v287_v8  ;;  %154 = vmatprep.subr.bf16.mxu0 %v288_v9  ;;  %v18_v26 = vld [vmem:[%s410_s0] sm:$0xf]  ;;  %v233_v28 = vld [vmem:[%s411_s3 + $0x8] sm:$0xff] }
   0x9   :  { %195 = vmatprep.subr.bf16.mxu1 %v290_v10  ;;  %40 = vperm.xlu0 %275, %v37_v17   ;;  %v139_v24 = vsel %vm137_vm0, %v266_v22, 0  ;;  %v145_v25 = vsel %vm137_vm0, %v268_v23, 0  ;;  %v232_v27 = vld [vmem:[%s411_s3] sm:$0xff]  ;;  %v236_v31 = vunpack.c.l.bf16 %v233_v28  ;;  %v237_v35 = vunpack.c.h.bf16 %v233_v28 }
   0xa   :  { %v234_v30 = vunpack.c.l.bf16 %v232_v27  ;;  %v235_v34 = vunpack.c.h.bf16 %v232_v27 }
   0xb   :  { %155 = vmatpush1.bf16.msra.mxu0 %v292_v11 }
   0xc   :  { %196 = vmatpush1.bf16.msra.mxu1 %v293_v12  ;;  %156 = vmatprep.subr.bf16.mxu0 %v294_v13 }
   0xd   :  { %197 = vmatprep.subr.bf16.mxu1 %v296_v14 }
   0xf   :  { %157 = vmatpush1.bf16.msra.mxu0 %v298_v18 }
  0x10   :  { %198 = vmatpush1.bf16.msra.mxu1 %v299_v19  ;;  %270 = vmatprep.subr.msk.bf16.mxu0 %vm137_vm0, %v267_v20 }
  0x11   :  { %272 = vmatprep.subr.msk.bf16.mxu1 %vm137_vm0, %v269_v21 }
  0x13   :  { %159 = vmatpush1.bf16.msra.mxu0 %v139_v24 }
  0x14   :  { %200 = vmatpush1.bf16.msra.mxu1 %v145_v25 }
  0x16   :  { %271 = vmatmul.mubr.msk.bf16.vlgmr.msra.gmra.mrb[0].mxu0 %vm133_vm1, %v18_v26 }
  0x17   :  { %273 = vmatmul.mubr.msk.bf16.vlgmr.msra.gmra.mrb[0].mxu1 %vm133_vm1, %v18_v26 }
  0x88   :  { %v41_v29 = vpop.permute.xlu0 %40 }
  0xe9   :  { %v184_v32 = vpop.f32.mrb[0].mxu0 }
  0xea   :  { %v225_v33 = vpop.f32.mrb[0].mxu1  ;;  %v185_v36 = vadd.f32 %v184_v32, %v41_v29  ;;  %v186_v38 = vpop.f32.mrb[1].mxu0 }
  0xeb   :  { %v226_v37 = vadd.f32 %v225_v33, %v41_v29  ;;  %v227_v39 = vpop.f32.mrb[1].mxu1  ;;  %v187_v40 = vadd.f32 %v186_v38, %v41_v29  ;;  %v188_v42 = vpop.f32.mrb[2].mxu0 }
  0xec   :  { %v228_v41 = vadd.f32 %v227_v39, %v41_v29  ;;  %v229_v43 = vpop.f32.mrb[2].mxu1  ;;  %v238_v44 = vadd.f32 %v234_v30, %v185_v36  ;;  %v189_v46 = vpop.f32.mrb[3].mxu0 }
  0xed   :  { %v240_v45 = vadd.f32 %v236_v31, %v226_v37  ;;  %v230_v47 = vpop.f32.mrb[3].mxu1  ;;  %v239_v48 = vadd.f32 %v235_v34, %v187_v40 }
  0xee   :  { %v241_v49 = vadd.f32 %v237_v35, %v228_v41  ;;  %242 = vst [vmem:[%s412_s4] sm:$0xff] %v238_v44 }
  0xef   :  { %244 = vst [vmem:[%s412_s4 + $0x10] sm:$0xff] %v240_v45  ;;  %243 = vst [vmem:[%s412_s4 + $0x8] sm:$0xff] %v239_v48 }
  0xf0   :  { %245 = vst [vmem:[%s412_s4 + $0x18] sm:$0xff] %v241_v49 }

// kernel: pose_so_decoder_forward.49
= control target key start
LH: loop header
LB: loop body
LE: loop exit
PB: predicated region body
PF: predicated region fallthrough
CT: control target
= control target key end

     0   :  { %v969_v3 = vmov 0   ;;  %vm458_vm0 = vcmask 1043456   ;;  %vm454_vm1 = vcmask 588800   ;;  %s1303_s1 = inlined_call_operand.vmem [shape: bf16[72,2048], index: 1, kind: input, shape index: {}]   ;;  %s1304_s0 = inlined_call_operand.vmem [shape: bf16[8,72], index: 0, kind: input, shape index: {}]   ;;  %s1305_s2 = inlined_call_operand.vmem [shape: f32[8,1], index: 2, kind: input, shape index: {}]   ;;  %s1306_s3 = inlined_call_operand.vmem [shape: f32[8,2048], index: 3, kind: output, shape index: {}]  }
   0x1   :  { %v16_v0 = vld [vmem:[%s1303_s1] sm:$0xff]  ;;  %v17_v2 = vld [vmem:[%s1303_s1 + $0x8] sm:$0xff]  ;;  %539 = vmatprep.mubr.bf16.mxu0 %v969_v3  ;;  %580 = vmatprep.mubr.bf16.mxu1 %v969_v3  ;;  %v18_v39 = vld [vmem:[%s1303_s1 + $0x10] sm:$0xff] }
   0x2   :  { %v24_v1 = vld [vmem:[%s1303_s1 + $0x40] sm:$0xff]  ;;  %v25_v5 = vld [vmem:[%s1303_s1 + $0x48] sm:$0xff]  ;;  %952 = vset.pattern.permute.xlu0 %v969_v3  ;;  %v26_v40 = vld [vmem:[%s1303_s1 + $0x50] sm:$0xff] }
   0x3   :  { %v856_v4 = vcombine.high %v16_v0, %v24_v1  ;;  %v855_v6 = vcombine.low %v16_v0, %v24_v1  ;;  %v32_v7 = vld [vmem:[%s1303_s1 + $0x80] sm:$0xff]  ;;  %v858_v9 = vcombine.high %v17_v2, %v25_v5  ;;  %v857_v10 = vcombine.low %v17_v2, %v25_v5  ;;  %v33_v12 = vld [vmem:[%s1303_s1 + $0x88] sm:$0xff]  ;;  %v19_v41 = vld [vmem:[%s1303_s1 + $0x18] sm:$0xff] }
   0x4   :  { %v40_v8 = vld [vmem:[%s1303_s1 + $0xc0] sm:$0xff]  ;;  %v41_v13 = vld [vmem:[%s1303_s1 + $0xc8] sm:$0xff]  ;;  %v27_v42 = vld [vmem:[%s1303_s1 + $0x58] sm:$0xff]  ;;  %v860_v44 = vcombine.high %v18_v39, %v26_v40  ;;  %v859_v52 = vcombine.low %v18_v39, %v26_v40 }
   0x5   :  { %v872_v11 = vcombine.high %v32_v7, %v40_v8  ;;  %v48_v14 = vld [vmem:[%s1303_s1 + $0x100] sm:$0xff]  ;;  %507 = vmatprep.subr.bf16.mxu0 %v856_v4  ;;  %v874_v15 = vcombine.high %v33_v12, %v41_v13  ;;  %v49_v17 = vld [vmem:[%s1303_s1 + $0x108] sm:$0xff]  ;;  %548 = vmatprep.subr.bf16.mxu1 %v858_v9  ;;  %v871_v19 = vcombine.low %v32_v7, %v40_v8  ;;  %v34_v47 = vld [vmem:[%s1303_s1 + $0x90] sm:$0xff] }
   0x6   :  { %v56_v16 = vld [vmem:[%s1303_s1 + $0x140] sm:$0xff]  ;;  %v57_v18 = vld [vmem:[%s1303_s1 + $0x148] sm:$0xff]  ;;  %508 = vmatpush1.bf16.msra.mxu0 %v855_v6  ;;  %549 = vmatpush1.bf16.msra.mxu1 %v857_v10  ;;  %v873_v20 = vcombine.low %v33_v12, %v41_v13  ;;  %v862_v46 = vcombine.high %v19_v41, %v27_v42  ;;  %v42_v48 = vld [vmem:[%s1303_s1 + $0xd0] sm:$0xff]  ;;  %v861_v53 = vcombine.low %v19_v41, %v27_v42 }
   0x7   :  { %509 = vmatprep.subr.bf16.mxu0 %v872_v11  ;;  %v888_v21 = vcombine.high %v48_v14, %v56_v16  ;;  %550 = vmatprep.subr.bf16.mxu1 %v874_v15  ;;  %v890_v22 = vcombine.high %v49_v17, %v57_v18  ;;  %v64_v23 = vld [vmem:[%s1303_s1 + $0x180] sm:$0xff]  ;;  %v65_v25 = vld [vmem:[%s1303_s1 + $0x188] sm:$0xff]  ;;  %v887_v27 = vcombine.low %v48_v14, %v56_v16  ;;  %v35_v49 = vld [vmem:[%s1303_s1 + $0x98] sm:$0xff] }
   0x8   :  { %v72_v24 = vld [vmem:[%s1303_s1 + $0x1c0] sm:$0xff]  ;;  %v73_v26 = vld [vmem:[%s1303_s1 + $0x1c8] sm:$0xff]  ;;  %v889_v28 = vcombine.low %v49_v17, %v57_v18  ;;  %v43_v50 = vld [vmem:[%s1303_s1 + $0xd8] sm:$0xff]  ;;  %v876_v54 = vcombine.high %v34_v47, %v42_v48  ;;  %v875_v60 = vcombine.low %v34_v47, %v42_v48 }
   0x9   :  { %v904_v29 = vcombine.high %v64_v23, %v72_v24  ;;  %v906_v30 = vcombine.high %v65_v25, %v73_v26  ;;  %v80_v31 = vld [vmem:[%s1303_s1 + $0x200] sm:$0xff]  ;;  %v81_v32 = vld [vmem:[%s1303_s1 + $0x208] sm:$0xff]  ;;  %v903_v33 = vcombine.low %v64_v23, %v72_v24  ;;  %v905_v34 = vcombine.low %v65_v25, %v73_v26  ;;  %v50_v56 = vld [vmem:[%s1303_s1 + $0x110] sm:$0xff] }
   0xa   :  { %510 = vmatpush1.bf16.msra.mxu0 %v871_v19  ;;  %551 = vmatpush1.bf16.msra.mxu1 %v873_v20  ;;  %v920_v35 = vcombine.high %v80_v31, %v80_v31  ;;  %v919_v36 = vcombine.low %v80_v31, %v80_v31  ;;  %v922_v37 = vcombine.high %v81_v32, %v81_v32  ;;  %v1078_v51 = vld [vmem:[%s1304_s0] sm:$0xf]  ;;  %v58_v57 = vld [vmem:[%s1303_s1 + $0x150] sm:$0xff]  ;;  %v51_v58 = vld [vmem:[%s1303_s1 + $0x118] sm:$0xff] }
   0xb   :  { %511 = vmatprep.subr.bf16.mxu0 %v888_v21  ;;  %552 = vmatprep.subr.bf16.mxu1 %v890_v22  ;;  %v921_v38 = vcombine.low %v81_v32, %v81_v32  ;;  %v878_v55 = vcombine.high %v35_v49, %v43_v50  ;;  %v59_v59 = vld [vmem:[%s1303_s1 + $0x158] sm:$0xff]  ;;  %v88_v61 = vld [vmem:[%s1305_s2] sm:$0xff]  ;;  %v877_v62 = vcombine.low %v35_v49, %v43_v50  ;;  %v66_v1 = vld [vmem:[%s1303_s1 + $0x190] sm:$0xff] }
   0xc   :  { %v460_v43 = vsel %vm458_vm0, %v919_v36, 0  ;;  %v892_v63 = vcombine.high %v50_v56, %v58_v57  ;;  %v894_v0 = vcombine.high %v51_v58, %v59_v59  ;;  %v74_v2 = vld [vmem:[%s1303_s1 + $0x1d0] sm:$0xff]  ;;  %v67_v4 = vld [vmem:[%s1303_s1 + $0x198] sm:$0xff]  ;;  %91 = vperm.xlu0 %952, %v88_v61   ;;  %v891_v6 = vcombine.low %v50_v56, %v58_v57  ;;  %v20_v18 = vld [vmem:[%s1303_s1 + $0x20] sm:$0xff] }
   0xd   :  { %v466_v45 = vsel %vm458_vm0, %v921_v38, 0  ;;  %v75_v5 = vld [vmem:[%s1303_s1 + $0x1d8] sm:$0xff]  ;;  %v893_v7 = vcombine.low %v51_v58, %v59_v59  ;;  %v908_v8 = vcombine.high %v66_v1, %v74_v2  ;;  %v82_v10 = vld [vmem:[%s1303_s1 + $0x210] sm:$0xff]  ;;  %v907_v12 = vcombine.low %v66_v1, %v74_v2  ;;  %v28_v19 = vld [vmem:[%s1303_s1 + $0x60] sm:$0xff] }
   0xe   :  { %512 = vmatpush1.bf16.msra.mxu0 %v887_v27  ;;  %553 = vmatpush1.bf16.msra.mxu1 %v889_v28  ;;  %v910_v9 = vcombine.high %v67_v4, %v75_v5  ;;  %v83_v11 = vld [vmem:[%s1303_s1 + $0x218] sm:$0xff]  ;;  %v909_v13 = vcombine.low %v67_v4, %v75_v5  ;;  %v924_v14 = vcombine.high %v82_v10, %v82_v10  ;;  %v21_v20 = vld [vmem:[%s1303_s1 + $0x28] sm:$0xff]  ;;  %v36_v26 = vld [vmem:[%s1303_s1 + $0xa0] sm:$0xff] }
   0xf   :  { %513 = vmatprep.subr.bf16.mxu0 %v904_v29  ;;  %554 = vmatprep.subr.bf16.mxu1 %v906_v30  ;;  %v923_v15 = vcombine.low %v82_v10, %v82_v10  ;;  %v926_v16 = vcombine.high %v83_v11, %v83_v11  ;;  %v925_v17 = vcombine.low %v83_v11, %v83_v11  ;;  %v29_v21 = vld [vmem:[%s1303_s1 + $0x68] sm:$0xff]  ;;  %v44_v27 = vld [vmem:[%s1303_s1 + $0xe0] sm:$0xff]  ;;  %v22_v59 = vld [vmem:[%s1303_s1 + $0x30] sm:$0xff] }
  0x10   :  { %v864_v23 = vcombine.high %v20_v18, %v28_v19  ;;  %v866_v25 = vcombine.high %v21_v20, %v29_v21  ;;  %v37_v28 = vld [vmem:[%s1303_s1 + $0xa8] sm:$0xff]  ;;  %v863_v30 = vcombine.low %v20_v18, %v28_v19  ;;  %v865_v31 = vcombine.low %v21_v20, %v29_v21  ;;  %v68_v42 = vld [vmem:[%s1303_s1 + $0x1a0] sm:$0xff]  ;;  %v23_v61 = vld [vmem:[%s1303_s1 + $0x38] sm:$0xff] }
  0x11   :  { %v472_v22 = vsel %vm458_vm0, %v923_v15, 0  ;;  %v478_v24 = vsel %vm458_vm0, %v925_v17, 0  ;;  %v45_v29 = vld [vmem:[%s1303_s1 + $0xe8] sm:$0xff]  ;;  %v880_v32 = vcombine.high %v36_v26, %v44_v27  ;;  %v879_v38 = vcombine.low %v36_v26, %v44_v27  ;;  %v84_v50 = vld [vmem:[%s1303_s1 + $0x220] sm:$0xff]  ;;  %v38_v4 = vld [vmem:[%s1303_s1 + $0xb0] sm:$0xff] }
  0x12   :  { %514 = vmatpush1.bf16.msra.mxu0 %v903_v33  ;;  %555 = vmatpush1.bf16.msra.mxu1 %v905_v34  ;;  %v882_v33 = vcombine.high %v37_v28, %v45_v29  ;;  %v52_v34 = vld [vmem:[%s1303_s1 + $0x120] sm:$0xff]  ;;  %v53_v36 = vld [vmem:[%s1303_s1 + $0x128] sm:$0xff]  ;;  %v881_v39 = vcombine.low %v37_v28, %v45_v29  ;;  %v927_v56 = vcombine.low %v84_v50, %v84_v50  ;;  %v46_v5 = vld [vmem:[%s1303_s1 + $0xf0] sm:$0xff] }
  0x13   :  { %935 = vmatprep.subr.msk.bf16.mxu0 %vm458_vm0, %v920_v35  ;;  %937 = vmatprep.subr.msk.bf16.mxu1 %vm458_vm0, %v922_v37  ;;  %v60_v35 = vld [vmem:[%s1303_s1 + $0x160] sm:$0xff]  ;;  %v61_v37 = vld [vmem:[%s1303_s1 + $0x168] sm:$0xff]  ;;  %v884_v10 = vcombine.high %v38_v4, %v46_v5  ;;  %v63_v15 = vld [vmem:[%s1303_s1 + $0x178] sm:$0xff] }
  0x14   :  { %v896_v40 = vcombine.high %v52_v34, %v60_v35  ;;  %v898_v41 = vcombine.high %v53_v36, %v61_v37  ;;  %v897_v47 = vcombine.low %v53_v36, %v61_v37  ;;  %v70_v20 = vld [vmem:[%s1303_s1 + $0x1b0] sm:$0xff]  ;;  %v87_v29 = vld [vmem:[%s1303_s1 + $0x238] sm:$0xff] }
  0x15   :  { %v78_v21 = vld [vmem:[%s1303_s1 + $0x1f0] sm:$0xff] }
  0x16   :  { %516 = vmatpush1.bf16.msra.mxu0 %v460_v43  ;;  %557 = vmatpush1.bf16.msra.mxu1 %v466_v45  ;;  %v76_v43 = vld [vmem:[%s1303_s1 + $0x1e0] sm:$0xff]  ;;  %v77_v45 = vld [vmem:[%s1303_s1 + $0x1e8] sm:$0xff]  ;;  %v916_v26 = vcombine.high %v70_v20, %v78_v21  ;;  %v86_v28 = vld [vmem:[%s1303_s1 + $0x230] sm:$0xff] }
  0x17   :  { %589 = vmatprep.subr.bf16.mxu0 %v860_v44  ;;  %630 = vmatprep.subr.bf16.mxu1 %v862_v46  ;;  %v69_v44 = vld [vmem:[%s1303_s1 + $0x1a8] sm:$0xff]  ;;  %v895_v46 = vcombine.low %v52_v34, %v60_v35  ;;  %v912_v48 = vcombine.high %v68_v42, %v76_v43  ;;  %v933_v34 = vcombine.low %v87_v29, %v87_v29 }
  0x18   :  { %v914_v49 = vcombine.high %v69_v44, %v77_v45 }
  0x19   :  { %936 = vmatmul.mubr.msk.bf16.vlgmr.msra.gmra.mrb[0].mxu0 %vm454_vm1, %v1078_v51  ;;  %938 = vmatmul.mubr.msk.bf16.vlgmr.msra.gmra.mrb[0].mxu1 %vm454_vm1, %v1078_v51  ;;  %v502_v36 = vsel %vm458_vm0, %v933_v34, 0 }
  0x1a   :  { %590 = vmatpush1.bf16.msra.mxu0 %v859_v52  ;;  %631 = vmatpush1.bf16.msra.mxu1 %v861_v53  ;;  %v85_v52 = vld [vmem:[%s1303_s1 + $0x228] sm:$0xff]  ;;  %v911_v53 = vcombine.low %v68_v42, %v76_v43 }
  0x1b   :  { %591 = vmatprep.subr.bf16.mxu0 %v876_v54  ;;  %632 = vmatprep.subr.bf16.mxu1 %v878_v55  ;;  %v913_v54 = vcombine.low %v69_v44, %v77_v45  ;;  %v928_v55 = vcombine.high %v84_v50, %v84_v50  ;;  %v930_v57 = vcombine.high %v85_v52, %v85_v52 }
  0x1c   :  { %621 = vmatprep.mubr.bf16.mxu0 %v969_v3  ;;  %662 = vmatprep.mubr.bf16.mxu1 %v969_v3  ;;  %v929_v58 = vcombine.low %v85_v52, %v85_v52 }
  0x1e   :  { %592 = vmatpush1.bf16.msra.mxu0 %v875_v60  ;;  %633 = vmatpush1.bf16.msra.mxu1 %v877_v62  ;;  %v30_v60 = vld [vmem:[%s1303_s1 + $0x70] sm:$0xff]  ;;  %v31_v62 = vld [vmem:[%s1303_s1 + $0x78] sm:$0xff]  ;;  %v490_v1 = vsel %vm458_vm0, %v929_v58, 0 }
  0x1f   :  { %593 = vmatprep.subr.bf16.mxu0 %v892_v63  ;;  %634 = vmatprep.subr.bf16.mxu1 %v894_v0  ;;  %v484_v63 = vsel %vm458_vm0, %v927_v56, 0  ;;  %v868_v0 = vcombine.high %v22_v59, %v30_v60  ;;  %v870_v2 = vcombine.high %v23_v61, %v31_v62 }
  0x22   :  { %594 = vmatpush1.bf16.msra.mxu0 %v891_v6  ;;  %635 = vmatpush1.bf16.msra.mxu1 %v893_v7  ;;  %v39_v6 = vld [vmem:[%s1303_s1 + $0xb8] sm:$0xff] }
  0x23   :  { %595 = vmatprep.subr.bf16.mxu0 %v908_v8  ;;  %636 = vmatprep.subr.bf16.mxu1 %v910_v9  ;;  %v47_v7 = vld [vmem:[%s1303_s1 + $0xf8] sm:$0xff]  ;;  %v867_v8 = vcombine.low %v22_v59, %v30_v60  ;;  %v869_v9 = vcombine.low %v23_v61, %v31_v62 }
  0x24   :  { %v886_v11 = vcombine.high %v39_v6, %v47_v7  ;;  %v885_v17 = vcombine.low %v39_v6, %v47_v7 }
  0x26   :  { %596 = vmatpush1.bf16.msra.mxu0 %v907_v12  ;;  %637 = vmatpush1.bf16.msra.mxu1 %v909_v13  ;;  %v54_v12 = vld [vmem:[%s1303_s1 + $0x130] sm:$0xff] }
  0x27   :  { %939 = vmatprep.subr.msk.bf16.mxu0 %vm458_vm0, %v924_v14  ;;  %941 = vmatprep.subr.msk.bf16.mxu1 %vm458_vm0, %v926_v16  ;;  %v62_v13 = vld [vmem:[%s1303_s1 + $0x170] sm:$0xff]  ;;  %v55_v14 = vld [vmem:[%s1303_s1 + $0x138] sm:$0xff]  ;;  %v883_v16 = vcombine.low %v38_v4, %v46_v5 }
  0x28   :  { %v900_v18 = vcombine.high %v54_v12, %v62_v13  ;;  %v902_v19 = vcombine.high %v55_v14, %v63_v15 }
  0x2a   :  { %598 = vmatpush1.bf16.msra.mxu0 %v472_v22  ;;  %639 = vmatpush1.bf16.msra.mxu1 %v478_v24  ;;  %v71_v22 = vld [vmem:[%s1303_s1 + $0x1b8] sm:$0xff]  ;;  %v899_v24 = vcombine.low %v54_v12, %v62_v13 }
  0x2b   :  { %671 = vmatprep.subr.bf16.mxu0 %v864_v23  ;;  %712 = vmatprep.subr.bf16.mxu1 %v866_v25  ;;  %v79_v23 = vld [vmem:[%s1303_s1 + $0x1f8] sm:$0xff]  ;;  %v901_v25 = vcombine.low %v55_v14, %v63_v15 }
  0x2c   :  { %v918_v27 = vcombine.high %v71_v22, %v79_v23 }
  0x2d   :  { %940 = vmatmul.mubr.msk.bf16.vlgmr.msra.gmra.mrb[4].mxu0 %vm454_vm1, %v1078_v51  ;;  %942 = vmatmul.mubr.msk.bf16.vlgmr.msra.gmra.mrb[4].mxu1 %vm454_vm1, %v1078_v51 }
  0x2e   :  { %672 = vmatpush1.bf16.msra.mxu0 %v863_v30  ;;  %713 = vmatpush1.bf16.msra.mxu1 %v865_v31  ;;  %v915_v30 = vcombine.low %v70_v20, %v78_v21  ;;  %v932_v31 = vcombine.high %v86_v28, %v86_v28 }
  0x2f   :  { %673 = vmatprep.subr.bf16.mxu0 %v880_v32  ;;  %714 = vmatprep.subr.bf16.mxu1 %v882_v33  ;;  %v931_v32 = vcombine.low %v86_v28, %v86_v28  ;;  %v934_v33 = vcombine.high %v87_v29, %v87_v29 }
  0x30   :  { %703 = vmatprep.mubr.bf16.mxu0 %v969_v3  ;;  %744 = vmatprep.mubr.bf16.mxu1 %v969_v3 }
  0x31   :  { %v496_v35 = vsel %vm458_vm0, %v931_v32, 0 }
  0x32   :  { %674 = vmatpush1.bf16.msra.mxu0 %v879_v38  ;;  %715 = vmatpush1.bf16.msra.mxu1 %v881_v39 }
  0x33   :  { %675 = vmatprep.subr.bf16.mxu0 %v896_v40  ;;  %716 = vmatprep.subr.bf16.mxu1 %v898_v41 }
  0x36   :  { %676 = vmatpush1.bf16.msra.mxu0 %v895_v46  ;;  %717 = vmatpush1.bf16.msra.mxu1 %v897_v47 }
  0x37   :  { %677 = vmatprep.subr.bf16.mxu0 %v912_v48  ;;  %718 = vmatprep.subr.bf16.mxu1 %v914_v49 }
  0x3a   :  { %678 = vmatpush1.bf16.msra.mxu0 %v911_v53  ;;  %719 = vmatpush1.bf16.msra.mxu1 %v913_v54 }
  0x3b   :  { %943 = vmatprep.subr.msk.bf16.mxu0 %vm458_vm0, %v928_v55  ;;  %945 = vmatprep.subr.msk.bf16.mxu1 %vm458_vm0, %v930_v57 }
  0x3e   :  { %680 = vmatpush1.bf16.msra.mxu0 %v484_v63  ;;  %721 = vmatpush1.bf16.msra.mxu1 %v490_v1 }
  0x3f   :  { %753 = vmatprep.subr.bf16.mxu0 %v868_v0  ;;  %794 = vmatprep.subr.bf16.mxu1 %v870_v2 }
  0x41   :  { %944 = vmatmul.mubr.msk.bf16.vlgmr.msra.gmra.mrb[8].mxu0 %vm454_vm1, %v1078_v51  ;;  %946 = vmatmul.mubr.msk.bf16.vlgmr.msra.gmra.mrb[8].mxu1 %vm454_vm1, %v1078_v51 }
  0x42   :  { %754 = vmatpush1.bf16.msra.mxu0 %v867_v8  ;;  %795 = vmatpush1.bf16.msra.mxu1 %v869_v9 }
  0x43   :  { %755 = vmatprep.subr.bf16.mxu0 %v884_v10  ;;  %796 = vmatprep.subr.bf16.mxu1 %v886_v11 }
  0x44   :  { %785 = vmatprep.mubr.bf16.mxu0 %v969_v3  ;;  %826 = vmatprep.mubr.bf16.mxu1 %v969_v3  ;;  %v917_v3 = vcombine.low %v71_v22, %v79_v23 }
  0x46   :  { %756 = vmatpush1.bf16.msra.mxu0 %v883_v16  ;;  %797 = vmatpush1.bf16.msra.mxu1 %v885_v17 }
  0x47   :  { %757 = vmatprep.subr.bf16.mxu0 %v900_v18  ;;  %798 = vmatprep.subr.bf16.mxu1 %v902_v19 }
  0x4a   :  { %758 = vmatpush1.bf16.msra.mxu0 %v899_v24  ;;  %799 = vmatpush1.bf16.msra.mxu1 %v901_v25 }
  0x4b   :  { %759 = vmatprep.subr.bf16.mxu0 %v916_v26  ;;  %800 = vmatprep.subr.bf16.mxu1 %v918_v27 }
  0x4e   :  { %760 = vmatpush1.bf16.msra.mxu0 %v915_v30  ;;  %801 = vmatpush1.bf16.msra.mxu1 %v917_v3 }
  0x4f   :  { %947 = vmatprep.subr.msk.bf16.mxu0 %vm458_vm0, %v932_v31  ;;  %949 = vmatprep.subr.msk.bf16.mxu1 %vm458_vm0, %v934_v33 }
  0x52   :  { %762 = vmatpush1.bf16.msra.mxu0 %v496_v35  ;;  %803 = vmatpush1.bf16.msra.mxu1 %v502_v36 }
  0x55   :  { %948 = vmatmul.mubr.msk.bf16.vlgmr.msra.gmra.mrb[12].mxu0 %vm454_vm1, %v1078_v51  ;;  %950 = vmatmul.mubr.msk.bf16.vlgmr.msra.gmra.mrb[12].mxu1 %vm454_vm1, %v1078_v51 }
  0x8b   :  { %v92_v37 = vpop.permute.xlu0 %91 }
  0xec   :  { %v541_v38 = vpop.f32.mrb[0].mxu0  ;;  %v582_v39 = vpop.f32.mrb[0].mxu1 }
  0xed   :  { %v542_v40 = vadd.f32 %v541_v38, %v92_v37  ;;  %v543_v41 = vpop.f32.mrb[1].mxu0  ;;  %v583_v42 = vadd.f32 %v582_v39, %v92_v37  ;;  %v584_v44 = vpop.f32.mrb[1].mxu1 }
  0xee   :  { %v544_v43 = vadd.f32 %v543_v41, %v92_v37  ;;  %v545_v45 = vpop.f32.mrb[2].mxu0  ;;  %v585_v46 = vadd.f32 %v584_v44, %v92_v37  ;;  %v586_v47 = vpop.f32.mrb[2].mxu1 }
  0xef   :  { %835 = vst [vmem:[%s1306_s3] sm:$0xff] %v542_v40  ;;  %v546_v48 = vpop.f32.mrb[3].mxu0  ;;  %837 = vst [vmem:[%s1306_s3 + $0x10] sm:$0xff] %v583_v42  ;;  %v587_v51 = vpop.f32.mrb[3].mxu1 }
  0xf0   :  { %836 = vst [vmem:[%s1306_s3 + $0x8] sm:$0xff] %v544_v43  ;;  %838 = vst [vmem:[%s1306_s3 + $0x18] sm:$0xff] %v585_v46 }
 0x100   :  { %v623_v49 = vpop.f32.mrb[4].mxu0  ;;  %v664_v52 = vpop.f32.mrb[4].mxu1 }
 0x101   :  { %v624_v50 = vadd.f32 %v623_v49, %v92_v37  ;;  %v625_v53 = vpop.f32.mrb[5].mxu0  ;;  %v665_v54 = vadd.f32 %v664_v52, %v92_v37  ;;  %v666_v56 = vpop.f32.mrb[5].mxu1 }
 0x102   :  { %v626_v55 = vadd.f32 %v625_v53, %v92_v37  ;;  %v627_v57 = vpop.f32.mrb[6].mxu0  ;;  %v667_v58 = vadd.f32 %v666_v56, %v92_v37  ;;  %v668_v59 = vpop.f32.mrb[6].mxu1 }
 0x103   :  { %839 = vst [vmem:[%s1306_s3 + $0x20] sm:$0xff] %v624_v50  ;;  %v628_v60 = vpop.f32.mrb[7].mxu0  ;;  %841 = vst [vmem:[%s1306_s3 + $0x30] sm:$0xff] %v665_v54  ;;  %v669_v61 = vpop.f32.mrb[7].mxu1 }
 0x104   :  { %840 = vst [vmem:[%s1306_s3 + $0x28] sm:$0xff] %v626_v55  ;;  %842 = vst [vmem:[%s1306_s3 + $0x38] sm:$0xff] %v667_v58 }
 0x114   :  { %v705_v62 = vpop.f32.mrb[8].mxu0  ;;  %v746_v0 = vpop.f32.mrb[8].mxu1 }
 0x115   :  { %v706_v63 = vadd.f32 %v705_v62, %v92_v37  ;;  %v707_v1 = vpop.f32.mrb[9].mxu0  ;;  %v747_v2 = vadd.f32 %v746_v0, %v92_v37  ;;  %v748_v5 = vpop.f32.mrb[9].mxu1 }
 0x116   :  { %v708_v4 = vadd.f32 %v707_v1, %v92_v37  ;;  %v709_v6 = vpop.f32.mrb[10].mxu0  ;;  %v749_v7 = vadd.f32 %v748_v5, %v92_v37  ;;  %v750_v8 = vpop.f32.mrb[10].mxu1 }
 0x117   :  { %843 = vst [vmem:[%s1306_s3 + $0x40] sm:$0xff] %v706_v63  ;;  %v710_v9 = vpop.f32.mrb[11].mxu0  ;;  %845 = vst [vmem:[%s1306_s3 + $0x50] sm:$0xff] %v747_v2  ;;  %v751_v10 = vpop.f32.mrb[11].mxu1 }
 0x118   :  { %844 = vst [vmem:[%s1306_s3 + $0x48] sm:$0xff] %v708_v4  ;;  %846 = vst [vmem:[%s1306_s3 + $0x58] sm:$0xff] %v749_v7 }
 0x128   :  { %v787_v11 = vpop.f32.mrb[12].mxu0  ;;  %v828_v13 = vpop.f32.mrb[12].mxu1 }
 0x129   :  { %v788_v12 = vadd.f32 %v787_v11, %v92_v37  ;;  %v789_v14 = vpop.f32.mrb[13].mxu0  ;;  %v829_v15 = vadd.f32 %v828_v13, %v92_v37  ;;  %v830_v17 = vpop.f32.mrb[13].mxu1 }
 0x12a   :  { %v790_v16 = vadd.f32 %v789_v14, %v92_v37  ;;  %v791_v18 = vpop.f32.mrb[14].mxu0  ;;  %v831_v19 = vadd.f32 %v830_v17, %v92_v37  ;;  %v832_v20 = vpop.f32.mrb[14].mxu1 }
 0x12b   :  { %847 = vst [vmem:[%s1306_s3 + $0x60] sm:$0xff] %v788_v12  ;;  %v792_v21 = vpop.f32.mrb[15].mxu0  ;;  %849 = vst [vmem:[%s1306_s3 + $0x70] sm:$0xff] %v829_v15  ;;  %v833_v22 = vpop.f32.mrb[15].mxu1 }
 0x12c   :  { %848 = vst [vmem:[%s1306_s3 + $0x68] sm:$0xff] %v790_v16  ;;  %850 = vst [vmem:[%s1306_s3 + $0x78] sm:$0xff] %v831_v19 }

// kernel: pose_so_decoder_forward.48
= control target key start
LH: loop header
LB: loop body
LE: loop exit
PB: predicated region body
PF: predicated region fallthrough
CT: control target
= control target key end

     0   :  { %vm38_vm0 = vcmask 1043456   ;;  %v155_v2 = vmov 0   ;;  %vm34_vm1 = vcmask 64512   ;;  %s204_s1 = inlined_call_operand.vmem [shape: bf16[8,512], index: 1, kind: input, shape index: {}]   ;;  %s205_s2 = inlined_call_operand.vmem [shape: f32[8,1], index: 2, kind: input, shape index: {}]   ;;  %s206_s0 = inlined_call_operand.vmem [shape: bf16[8,8], index: 0, kind: input, shape index: {}]   ;;  %s207_s3 = inlined_call_operand.vmem [shape: f32[8,512], index: 3, kind: output, shape index: {}]  }
   0x1   :  { %v16_v0 = vld [vmem:[%s204_s1] sm:$0xff]  ;;  %v17_v1 = vld [vmem:[%s204_s1 + $0x8] sm:$0xff]  ;;  %83 = vmatprep.mubr.bf16.mxu0 %v155_v2  ;;  %124 = vmatprep.mubr.bf16.mxu1 %v155_v2 }
   0x2   :  { %v142_v3 = vcombine.high %v16_v0, %v16_v0  ;;  %v144_v4 = vcombine.high %v17_v1, %v17_v1  ;;  %v141_v5 = vcombine.low %v16_v0, %v16_v0  ;;  %v143_v6 = vcombine.low %v17_v1, %v17_v1  ;;  %150 = vset.pattern.permute.xlu0 %v155_v2  ;;  %v18_v7 = vld [vmem:[%s205_s2] sm:$0xff] }
   0x3   :  { %21 = vperm.xlu0 %150, %v18_v7   ;;  %v15_v10 = vld [vmem:[%s206_s0] sm:$0xf] }
   0x4   :  { %145 = vmatprep.subr.msk.bf16.mxu0 %vm38_vm0, %v142_v3  ;;  %147 = vmatprep.subr.msk.bf16.mxu1 %vm38_vm0, %v144_v4  ;;  %v40_v8 = vsel %vm38_vm0, %v141_v5, 0  ;;  %v46_v9 = vsel %vm38_vm0, %v143_v6, 0 }
   0x5   :  { %52 = vmatpush1.bf16.msra.mxu0 %v40_v8  ;;  %93 = vmatpush1.bf16.msra.mxu1 %v46_v9 }
   0x8   :  { %146 = vmatmul.mubr.msk.bf16.vlgmr.msra.gmra.mrb[0].mxu0 %vm34_vm1, %v15_v10  ;;  %148 = vmatmul.mubr.msk.bf16.vlgmr.msra.gmra.mrb[0].mxu1 %vm34_vm1, %v15_v10 }
  0x82   :  { %v22_v11 = vpop.permute.xlu0 %21 }
  0xdb   :  { %v85_v12 = vpop.f32.mrb[0].mxu0  ;;  %v126_v13 = vpop.f32.mrb[0].mxu1 }
  0xdc   :  { %v86_v14 = vadd.f32 %v85_v12, %v22_v11  ;;  %v127_v15 = vadd.f32 %v126_v13, %v22_v11  ;;  %v87_v16 = vpop.f32.mrb[1].mxu0  ;;  %v128_v17 = vpop.f32.mrb[1].mxu1 }
  0xdd   :  { %v88_v18 = vadd.f32 %v87_v16, %v22_v11  ;;  %v129_v19 = vadd.f32 %v128_v17, %v22_v11  ;;  %v89_v20 = vpop.f32.mrb[2].mxu0  ;;  %v130_v21 = vpop.f32.mrb[2].mxu1 }
  0xde   :  { %133 = vst [vmem:[%s207_s3] sm:$0xff] %v86_v14  ;;  %135 = vst [vmem:[%s207_s3 + $0x10] sm:$0xff] %v127_v15  ;;  %v90_v22 = vpop.f32.mrb[3].mxu0  ;;  %v131_v23 = vpop.f32.mrb[3].mxu1 }
  0xdf   :  { %134 = vst [vmem:[%s207_s3 + $0x8] sm:$0xff] %v88_v18  ;;  %136 = vst [vmem:[%s207_s3 + $0x18] sm:$0xff] %v129_v19 }

// kernel: pose_so_decoder_forward.50
= control target key start
LH: loop header
LB: loop body
LE: loop exit
PB: predicated region body
PF: predicated region fallthrough
CT: control target
= control target key end

     0   :  { %v1012_v3 = vmov 0   ;;  %vm461_vm0 = vcmask 1043456   ;;  %vm457_vm1 = vcmask 588800   ;;  %s1393_s1 = inlined_call_operand.vmem [shape: bf16[72,2048], index: 1, kind: input, shape index: {}]   ;;  %s1394_s0 = inlined_call_operand.vmem [shape: bf16[8,72], index: 0, kind: input, shape index: {}]   ;;  %s1395_s2 = inlined_call_operand.vmem [shape: f32[8,1], index: 2, kind: input, shape index: {}]   ;;  %s1396_s3 = inlined_call_operand.vmem [shape: bf16[8,2048], index: 3, kind: input, shape index: {}]   ;;  %s1397_s4 = inlined_call_operand.vmem [shape: f32[8,2048], index: 4, kind: output, shape index: {}]  }
   0x1   :  { %v19_v0 = vld [vmem:[%s1393_s1] sm:$0xff]  ;;  %v20_v2 = vld [vmem:[%s1393_s1 + $0x8] sm:$0xff]  ;;  %542 = vmatprep.mubr.bf16.mxu0 %v1012_v3  ;;  %583 = vmatprep.mubr.bf16.mxu1 %v1012_v3  ;;  %v21_v39 = vld [vmem:[%s1393_s1 + $0x10] sm:$0xff] }
   0x2   :  { %v27_v1 = vld [vmem:[%s1393_s1 + $0x40] sm:$0xff]  ;;  %v28_v5 = vld [vmem:[%s1393_s1 + $0x48] sm:$0xff]  ;;  %995 = vset.pattern.permute.xlu0 %v1012_v3  ;;  %v29_v40 = vld [vmem:[%s1393_s1 + $0x50] sm:$0xff] }
   0x3   :  { %v899_v4 = vcombine.high %v19_v0, %v27_v1  ;;  %v898_v6 = vcombine.low %v19_v0, %v27_v1  ;;  %v35_v7 = vld [vmem:[%s1393_s1 + $0x80] sm:$0xff]  ;;  %v901_v9 = vcombine.high %v20_v2, %v28_v5  ;;  %v900_v10 = vcombine.low %v20_v2, %v28_v5  ;;  %v36_v12 = vld [vmem:[%s1393_s1 + $0x88] sm:$0xff]  ;;  %v22_v41 = vld [vmem:[%s1393_s1 + $0x18] sm:$0xff] }
   0x4   :  { %v43_v8 = vld [vmem:[%s1393_s1 + $0xc0] sm:$0xff]  ;;  %v44_v13 = vld [vmem:[%s1393_s1 + $0xc8] sm:$0xff]  ;;  %v30_v42 = vld [vmem:[%s1393_s1 + $0x58] sm:$0xff]  ;;  %v903_v44 = vcombine.high %v21_v39, %v29_v40  ;;  %v902_v52 = vcombine.low %v21_v39, %v29_v40 }
   0x5   :  { %v915_v11 = vcombine.high %v35_v7, %v43_v8  ;;  %v51_v14 = vld [vmem:[%s1393_s1 + $0x100] sm:$0xff]  ;;  %510 = vmatprep.subr.bf16.mxu0 %v899_v4  ;;  %v917_v15 = vcombine.high %v36_v12, %v44_v13  ;;  %v52_v17 = vld [vmem:[%s1393_s1 + $0x108] sm:$0xff]  ;;  %551 = vmatprep.subr.bf16.mxu1 %v901_v9  ;;  %v914_v19 = vcombine.low %v35_v7, %v43_v8  ;;  %v37_v47 = vld [vmem:[%s1393_s1 + $0x90] sm:$0xff] }
   0x6   :  { %v59_v16 = vld [vmem:[%s1393_s1 + $0x140] sm:$0xff]  ;;  %v60_v18 = vld [vmem:[%s1393_s1 + $0x148] sm:$0xff]  ;;  %511 = vmatpush1.bf16.msra.mxu0 %v898_v6  ;;  %552 = vmatpush1.bf16.msra.mxu1 %v900_v10  ;;  %v916_v20 = vcombine.low %v36_v12, %v44_v13  ;;  %v905_v46 = vcombine.high %v22_v41, %v30_v42  ;;  %v45_v48 = vld [vmem:[%s1393_s1 + $0xd0] sm:$0xff]  ;;  %v904_v53 = vcombine.low %v22_v41, %v30_v42 }
   0x7   :  { %512 = vmatprep.subr.bf16.mxu0 %v915_v11  ;;  %v931_v21 = vcombine.high %v51_v14, %v59_v16  ;;  %553 = vmatprep.subr.bf16.mxu1 %v917_v15  ;;  %v933_v22 = vcombine.high %v52_v17, %v60_v18  ;;  %v67_v23 = vld [vmem:[%s1393_s1 + $0x180] sm:$0xff]  ;;  %v68_v25 = vld [vmem:[%s1393_s1 + $0x188] sm:$0xff]  ;;  %v930_v27 = vcombine.low %v51_v14, %v59_v16  ;;  %v38_v49 = vld [vmem:[%s1393_s1 + $0x98] sm:$0xff] }
   0x8   :  { %v75_v24 = vld [vmem:[%s1393_s1 + $0x1c0] sm:$0xff]  ;;  %v76_v26 = vld [vmem:[%s1393_s1 + $0x1c8] sm:$0xff]  ;;  %v932_v28 = vcombine.low %v52_v17, %v60_v18  ;;  %v46_v50 = vld [vmem:[%s1393_s1 + $0xd8] sm:$0xff]  ;;  %v919_v54 = vcombine.high %v37_v47, %v45_v48  ;;  %v918_v60 = vcombine.low %v37_v47, %v45_v48 }
   0x9   :  { %v947_v29 = vcombine.high %v67_v23, %v75_v24  ;;  %v949_v30 = vcombine.high %v68_v25, %v76_v26  ;;  %v83_v31 = vld [vmem:[%s1393_s1 + $0x200] sm:$0xff]  ;;  %v84_v32 = vld [vmem:[%s1393_s1 + $0x208] sm:$0xff]  ;;  %v946_v33 = vcombine.low %v67_v23, %v75_v24  ;;  %v948_v34 = vcombine.low %v68_v25, %v76_v26  ;;  %v53_v56 = vld [vmem:[%s1393_s1 + $0x110] sm:$0xff] }
   0xa   :  { %513 = vmatpush1.bf16.msra.mxu0 %v914_v19  ;;  %554 = vmatpush1.bf16.msra.mxu1 %v916_v20  ;;  %v963_v35 = vcombine.high %v83_v31, %v83_v31  ;;  %v962_v36 = vcombine.low %v83_v31, %v83_v31  ;;  %v965_v37 = vcombine.high %v84_v32, %v84_v32  ;;  %v1126_v51 = vld [vmem:[%s1394_s0] sm:$0xf]  ;;  %v61_v57 = vld [vmem:[%s1393_s1 + $0x150] sm:$0xff]  ;;  %v54_v58 = vld [vmem:[%s1393_s1 + $0x118] sm:$0xff] }
   0xb   :  { %514 = vmatprep.subr.bf16.mxu0 %v931_v21  ;;  %555 = vmatprep.subr.bf16.mxu1 %v933_v22  ;;  %v964_v38 = vcombine.low %v84_v32, %v84_v32  ;;  %v921_v55 = vcombine.high %v38_v49, %v46_v50  ;;  %v62_v59 = vld [vmem:[%s1393_s1 + $0x158] sm:$0xff]  ;;  %v91_v61 = vld [vmem:[%s1395_s2] sm:$0xff]  ;;  %v920_v62 = vcombine.low %v38_v49, %v46_v50  ;;  %v69_v1 = vld [vmem:[%s1393_s1 + $0x190] sm:$0xff] }
   0xc   :  { %v463_v43 = vsel %vm461_vm0, %v962_v36, 0  ;;  %v935_v63 = vcombine.high %v53_v56, %v61_v57  ;;  %v937_v0 = vcombine.high %v54_v58, %v62_v59  ;;  %v77_v2 = vld [vmem:[%s1393_s1 + $0x1d0] sm:$0xff]  ;;  %v70_v4 = vld [vmem:[%s1393_s1 + $0x198] sm:$0xff]  ;;  %94 = vperm.xlu0 %995, %v91_v61   ;;  %v934_v6 = vcombine.low %v53_v56, %v61_v57  ;;  %v23_v18 = vld [vmem:[%s1393_s1 + $0x20] sm:$0xff] }
   0xd   :  { %v469_v45 = vsel %vm461_vm0, %v964_v38, 0  ;;  %v78_v5 = vld [vmem:[%s1393_s1 + $0x1d8] sm:$0xff]  ;;  %v936_v7 = vcombine.low %v54_v58, %v62_v59  ;;  %v951_v8 = vcombine.high %v69_v1, %v77_v2  ;;  %v85_v10 = vld [vmem:[%s1393_s1 + $0x210] sm:$0xff]  ;;  %v950_v12 = vcombine.low %v69_v1, %v77_v2  ;;  %v31_v19 = vld [vmem:[%s1393_s1 + $0x60] sm:$0xff] }
   0xe   :  { %515 = vmatpush1.bf16.msra.mxu0 %v930_v27  ;;  %556 = vmatpush1.bf16.msra.mxu1 %v932_v28  ;;  %v953_v9 = vcombine.high %v70_v4, %v78_v5  ;;  %v86_v11 = vld [vmem:[%s1393_s1 + $0x218] sm:$0xff]  ;;  %v952_v13 = vcombine.low %v70_v4, %v78_v5  ;;  %v967_v14 = vcombine.high %v85_v10, %v85_v10  ;;  %v24_v20 = vld [vmem:[%s1393_s1 + $0x28] sm:$0xff]  ;;  %v39_v26 = vld [vmem:[%s1393_s1 + $0xa0] sm:$0xff] }
   0xf   :  { %516 = vmatprep.subr.bf16.mxu0 %v947_v29  ;;  %557 = vmatprep.subr.bf16.mxu1 %v949_v30  ;;  %v966_v15 = vcombine.low %v85_v10, %v85_v10  ;;  %v969_v16 = vcombine.high %v86_v11, %v86_v11  ;;  %v968_v17 = vcombine.low %v86_v11, %v86_v11  ;;  %v32_v21 = vld [vmem:[%s1393_s1 + $0x68] sm:$0xff]  ;;  %v47_v27 = vld [vmem:[%s1393_s1 + $0xe0] sm:$0xff]  ;;  %v25_v59 = vld [vmem:[%s1393_s1 + $0x30] sm:$0xff] }
  0x10   :  { %v907_v23 = vcombine.high %v23_v18, %v31_v19  ;;  %v909_v25 = vcombine.high %v24_v20, %v32_v21  ;;  %v40_v28 = vld [vmem:[%s1393_s1 + $0xa8] sm:$0xff]  ;;  %v906_v30 = vcombine.low %v23_v18, %v31_v19  ;;  %v908_v31 = vcombine.low %v24_v20, %v32_v21  ;;  %v71_v42 = vld [vmem:[%s1393_s1 + $0x1a0] sm:$0xff]  ;;  %v26_v61 = vld [vmem:[%s1393_s1 + $0x38] sm:$0xff] }
  0x11   :  { %v475_v22 = vsel %vm461_vm0, %v966_v15, 0  ;;  %v481_v24 = vsel %vm461_vm0, %v968_v17, 0  ;;  %v48_v29 = vld [vmem:[%s1393_s1 + $0xe8] sm:$0xff]  ;;  %v923_v32 = vcombine.high %v39_v26, %v47_v27  ;;  %v922_v38 = vcombine.low %v39_v26, %v47_v27  ;;  %v87_v50 = vld [vmem:[%s1393_s1 + $0x220] sm:$0xff]  ;;  %v41_v4 = vld [vmem:[%s1393_s1 + $0xb0] sm:$0xff] }
  0x12   :  { %517 = vmatpush1.bf16.msra.mxu0 %v946_v33  ;;  %558 = vmatpush1.bf16.msra.mxu1 %v948_v34  ;;  %v925_v33 = vcombine.high %v40_v28, %v48_v29  ;;  %v55_v34 = vld [vmem:[%s1393_s1 + $0x120] sm:$0xff]  ;;  %v56_v36 = vld [vmem:[%s1393_s1 + $0x128] sm:$0xff]  ;;  %v924_v39 = vcombine.low %v40_v28, %v48_v29  ;;  %v970_v56 = vcombine.low %v87_v50, %v87_v50  ;;  %v49_v5 = vld [vmem:[%s1393_s1 + $0xf0] sm:$0xff] }
  0x13   :  { %978 = vmatprep.subr.msk.bf16.mxu0 %vm461_vm0, %v963_v35  ;;  %980 = vmatprep.subr.msk.bf16.mxu1 %vm461_vm0, %v965_v37  ;;  %v63_v35 = vld [vmem:[%s1393_s1 + $0x160] sm:$0xff]  ;;  %v64_v37 = vld [vmem:[%s1393_s1 + $0x168] sm:$0xff]  ;;  %v927_v10 = vcombine.high %v41_v4, %v49_v5  ;;  %v66_v15 = vld [vmem:[%s1393_s1 + $0x178] sm:$0xff] }
  0x14   :  { %v939_v40 = vcombine.high %v55_v34, %v63_v35  ;;  %v941_v41 = vcombine.high %v56_v36, %v64_v37  ;;  %v940_v47 = vcombine.low %v56_v36, %v64_v37  ;;  %v73_v20 = vld [vmem:[%s1393_s1 + $0x1b0] sm:$0xff]  ;;  %v90_v29 = vld [vmem:[%s1393_s1 + $0x238] sm:$0xff]  ;;  %v838_v37 = vld [vmem:[%s1396_s3] sm:$0xff] }
  0x15   :  { %v81_v21 = vld [vmem:[%s1393_s1 + $0x1f0] sm:$0xff] }
  0x16   :  { %519 = vmatpush1.bf16.msra.mxu0 %v463_v43  ;;  %560 = vmatpush1.bf16.msra.mxu1 %v469_v45  ;;  %v79_v43 = vld [vmem:[%s1393_s1 + $0x1e0] sm:$0xff]  ;;  %v80_v45 = vld [vmem:[%s1393_s1 + $0x1e8] sm:$0xff]  ;;  %v959_v26 = vcombine.high %v73_v20, %v81_v21  ;;  %v89_v28 = vld [vmem:[%s1393_s1 + $0x230] sm:$0xff] }
  0x17   :  { %592 = vmatprep.subr.bf16.mxu0 %v903_v44  ;;  %633 = vmatprep.subr.bf16.mxu1 %v905_v46  ;;  %v72_v44 = vld [vmem:[%s1393_s1 + $0x1a8] sm:$0xff]  ;;  %v938_v46 = vcombine.low %v55_v34, %v63_v35  ;;  %v955_v48 = vcombine.high %v71_v42, %v79_v43  ;;  %v976_v34 = vcombine.low %v90_v29, %v90_v29 }
  0x18   :  { %v957_v49 = vcombine.high %v72_v44, %v80_v45 }
  0x19   :  { %979 = vmatmul.mubr.msk.bf16.vlgmr.msra.gmra.mrb[0].mxu0 %vm457_vm1, %v1126_v51  ;;  %981 = vmatmul.mubr.msk.bf16.vlgmr.msra.gmra.mrb[0].mxu1 %vm457_vm1, %v1126_v51  ;;  %v505_v36 = vsel %vm461_vm0, %v976_v34, 0 }
  0x1a   :  { %593 = vmatpush1.bf16.msra.mxu0 %v902_v52  ;;  %634 = vmatpush1.bf16.msra.mxu1 %v904_v53  ;;  %v88_v52 = vld [vmem:[%s1393_s1 + $0x228] sm:$0xff]  ;;  %v954_v53 = vcombine.low %v71_v42, %v79_v43  ;;  %v847_v42 = vunpack.c.h.bf16 %v838_v37 }
  0x1b   :  { %594 = vmatprep.subr.bf16.mxu0 %v919_v54  ;;  %635 = vmatprep.subr.bf16.mxu1 %v921_v55  ;;  %v956_v54 = vcombine.low %v72_v44, %v80_v45  ;;  %v971_v55 = vcombine.high %v87_v50, %v87_v50  ;;  %v973_v57 = vcombine.high %v88_v52, %v88_v52 }
  0x1c   :  { %624 = vmatprep.mubr.bf16.mxu0 %v1012_v3  ;;  %665 = vmatprep.mubr.bf16.mxu1 %v1012_v3  ;;  %v972_v58 = vcombine.low %v88_v52, %v88_v52 }
  0x1e   :  { %595 = vmatpush1.bf16.msra.mxu0 %v918_v60  ;;  %636 = vmatpush1.bf16.msra.mxu1 %v920_v62  ;;  %v33_v60 = vld [vmem:[%s1393_s1 + $0x70] sm:$0xff]  ;;  %v34_v62 = vld [vmem:[%s1393_s1 + $0x78] sm:$0xff]  ;;  %v493_v1 = vsel %vm461_vm0, %v972_v58, 0 }
  0x1f   :  { %596 = vmatprep.subr.bf16.mxu0 %v935_v63  ;;  %637 = vmatprep.subr.bf16.mxu1 %v937_v0  ;;  %v487_v63 = vsel %vm461_vm0, %v970_v56, 0  ;;  %v911_v0 = vcombine.high %v25_v59, %v33_v60  ;;  %v913_v2 = vcombine.high %v26_v61, %v34_v62 }
  0x22   :  { %597 = vmatpush1.bf16.msra.mxu0 %v934_v6  ;;  %638 = vmatpush1.bf16.msra.mxu1 %v936_v7  ;;  %v42_v6 = vld [vmem:[%s1393_s1 + $0xb8] sm:$0xff] }
  0x23   :  { %598 = vmatprep.subr.bf16.mxu0 %v951_v8  ;;  %639 = vmatprep.subr.bf16.mxu1 %v953_v9  ;;  %v50_v7 = vld [vmem:[%s1393_s1 + $0xf8] sm:$0xff]  ;;  %v910_v8 = vcombine.low %v25_v59, %v33_v60  ;;  %v912_v9 = vcombine.low %v26_v61, %v34_v62  ;;  %v840_v60 = vld [vmem:[%s1396_s3 + $0x10] sm:$0xff] }
  0x24   :  { %v929_v11 = vcombine.high %v42_v6, %v50_v7  ;;  %v928_v17 = vcombine.low %v42_v6, %v50_v7  ;;  %v841_v61 = vld [vmem:[%s1396_s3 + $0x18] sm:$0xff]  ;;  %v850_v62 = vunpack.c.l.bf16 %v840_v60 }
  0x25   :  { %v853_v6 = vunpack.c.h.bf16 %v841_v61 }
  0x26   :  { %599 = vmatpush1.bf16.msra.mxu0 %v950_v12  ;;  %640 = vmatpush1.bf16.msra.mxu1 %v952_v13  ;;  %v57_v12 = vld [vmem:[%s1393_s1 + $0x130] sm:$0xff] }
  0x27   :  { %982 = vmatprep.subr.msk.bf16.mxu0 %vm461_vm0, %v967_v14  ;;  %984 = vmatprep.subr.msk.bf16.mxu1 %vm461_vm0, %v969_v16  ;;  %v65_v13 = vld [vmem:[%s1393_s1 + $0x170] sm:$0xff]  ;;  %v58_v14 = vld [vmem:[%s1393_s1 + $0x138] sm:$0xff]  ;;  %v926_v16 = vcombine.low %v41_v4, %v49_v5 }
  0x28   :  { %v943_v18 = vcombine.high %v57_v12, %v65_v13  ;;  %v945_v19 = vcombine.high %v58_v14, %v66_v15 }
  0x2a   :  { %601 = vmatpush1.bf16.msra.mxu0 %v475_v22  ;;  %642 = vmatpush1.bf16.msra.mxu1 %v481_v24  ;;  %v74_v22 = vld [vmem:[%s1393_s1 + $0x1b8] sm:$0xff]  ;;  %v942_v24 = vcombine.low %v57_v12, %v65_v13 }
  0x2b   :  { %674 = vmatprep.subr.bf16.mxu0 %v907_v23  ;;  %715 = vmatprep.subr.bf16.mxu1 %v909_v25  ;;  %v82_v23 = vld [vmem:[%s1393_s1 + $0x1f8] sm:$0xff]  ;;  %v944_v25 = vcombine.low %v58_v14, %v66_v15 }
  0x2c   :  { %v961_v27 = vcombine.high %v74_v22, %v82_v23 }
  0x2d   :  { %983 = vmatmul.mubr.msk.bf16.vlgmr.msra.gmra.mrb[4].mxu0 %vm457_vm1, %v1126_v51  ;;  %985 = vmatmul.mubr.msk.bf16.vlgmr.msra.gmra.mrb[4].mxu1 %vm457_vm1, %v1126_v51 }
  0x2e   :  { %675 = vmatpush1.bf16.msra.mxu0 %v906_v30  ;;  %716 = vmatpush1.bf16.msra.mxu1 %v908_v31  ;;  %v958_v30 = vcombine.low %v73_v20, %v81_v21  ;;  %v975_v31 = vcombine.high %v89_v28, %v89_v28  ;;  %v843_v20 = vld [vmem:[%s1396_s3 + $0x28] sm:$0xff] }
  0x2f   :  { %676 = vmatprep.subr.bf16.mxu0 %v923_v32  ;;  %717 = vmatprep.subr.bf16.mxu1 %v925_v33  ;;  %v974_v32 = vcombine.low %v89_v28, %v89_v28  ;;  %v977_v33 = vcombine.high %v90_v29, %v90_v29  ;;  %v857_v28 = vunpack.c.h.bf16 %v843_v20 }
  0x30   :  { %706 = vmatprep.mubr.bf16.mxu0 %v1012_v3  ;;  %747 = vmatprep.mubr.bf16.mxu1 %v1012_v3 }
  0x31   :  { %v499_v35 = vsel %vm461_vm0, %v974_v32, 0 }
  0x32   :  { %677 = vmatpush1.bf16.msra.mxu0 %v922_v38  ;;  %718 = vmatpush1.bf16.msra.mxu1 %v924_v39  ;;  %v839_v38 = vld [vmem:[%s1396_s3 + $0x8] sm:$0xff] }
  0x33   :  { %678 = vmatprep.subr.bf16.mxu0 %v939_v40  ;;  %719 = vmatprep.subr.bf16.mxu1 %v941_v41  ;;  %v846_v40 = vunpack.c.l.bf16 %v838_v37  ;;  %v848_v43 = vunpack.c.l.bf16 %v839_v38 }
  0x36   :  { %679 = vmatpush1.bf16.msra.mxu0 %v938_v46  ;;  %720 = vmatpush1.bf16.msra.mxu1 %v940_v47  ;;  %v849_v47 = vunpack.c.h.bf16 %v839_v38 }
  0x37   :  { %680 = vmatprep.subr.bf16.mxu0 %v955_v48  ;;  %721 = vmatprep.subr.bf16.mxu1 %v957_v49 }
  0x3a   :  { %681 = vmatpush1.bf16.msra.mxu0 %v954_v53  ;;  %722 = vmatpush1.bf16.msra.mxu1 %v956_v54 }
  0x3b   :  { %986 = vmatprep.subr.msk.bf16.mxu0 %vm461_vm0, %v971_v55  ;;  %988 = vmatprep.subr.msk.bf16.mxu1 %vm461_vm0, %v973_v57 }
  0x3e   :  { %683 = vmatpush1.bf16.msra.mxu0 %v487_v63  ;;  %724 = vmatpush1.bf16.msra.mxu1 %v493_v1  ;;  %v851_v1 = vunpack.c.h.bf16 %v840_v60 }
  0x3f   :  { %756 = vmatprep.subr.bf16.mxu0 %v911_v0  ;;  %797 = vmatprep.subr.bf16.mxu1 %v913_v2  ;;  %v852_v0 = vunpack.c.l.bf16 %v841_v61 }
  0x41   :  { %987 = vmatmul.mubr.msk.bf16.vlgmr.msra.gmra.mrb[8].mxu0 %vm457_vm1, %v1126_v51  ;;  %989 = vmatmul.mubr.msk.bf16.vlgmr.msra.gmra.mrb[8].mxu1 %vm457_vm1, %v1126_v51 }
  0x42   :  { %757 = vmatpush1.bf16.msra.mxu0 %v910_v8  ;;  %798 = vmatpush1.bf16.msra.mxu1 %v912_v9 }
  0x43   :  { %758 = vmatprep.subr.bf16.mxu0 %v927_v10  ;;  %799 = vmatprep.subr.bf16.mxu1 %v929_v11 }
  0x44   :  { %788 = vmatprep.mubr.bf16.mxu0 %v1012_v3  ;;  %829 = vmatprep.mubr.bf16.mxu1 %v1012_v3  ;;  %v960_v3 = vcombine.low %v74_v22, %v82_v23  ;;  %v856_v23 = vunpack.c.l.bf16 %v843_v20 }
  0x46   :  { %759 = vmatpush1.bf16.msra.mxu0 %v926_v16  ;;  %800 = vmatpush1.bf16.msra.mxu1 %v928_v17 }
  0x47   :  { %760 = vmatprep.subr.bf16.mxu0 %v943_v18  ;;  %801 = vmatprep.subr.bf16.mxu1 %v945_v19  ;;  %v842_v19 = vld [vmem:[%s1396_s3 + $0x20] sm:$0xff] }
  0x48   :  { %v854_v21 = vunpack.c.l.bf16 %v842_v19 }
  0x4a   :  { %761 = vmatpush1.bf16.msra.mxu0 %v942_v24  ;;  %802 = vmatpush1.bf16.msra.mxu1 %v944_v25  ;;  %v855_v24 = vunpack.c.h.bf16 %v842_v19 }
  0x4b   :  { %762 = vmatprep.subr.bf16.mxu0 %v959_v26  ;;  %803 = vmatprep.subr.bf16.mxu1 %v961_v27 }
  0x4e   :  { %763 = vmatpush1.bf16.msra.mxu0 %v958_v30  ;;  %804 = vmatpush1.bf16.msra.mxu1 %v960_v3 }
  0x4f   :  { %990 = vmatprep.subr.msk.bf16.mxu0 %vm461_vm0, %v975_v31  ;;  %992 = vmatprep.subr.msk.bf16.mxu1 %vm461_vm0, %v977_v33 }
  0x52   :  { %765 = vmatpush1.bf16.msra.mxu0 %v499_v35  ;;  %806 = vmatpush1.bf16.msra.mxu1 %v505_v36 }
  0x55   :  { %991 = vmatmul.mubr.msk.bf16.vlgmr.msra.gmra.mrb[12].mxu0 %vm457_vm1, %v1126_v51  ;;  %993 = vmatmul.mubr.msk.bf16.vlgmr.msra.gmra.mrb[12].mxu1 %vm457_vm1, %v1126_v51 }
  0x8b   :  { %v1309_v39 = vpop.permute.xlu0 %94 }
  0xec   :  { %v544_v41 = vpop.f32.mrb[0].mxu0  ;;  %v585_v44 = vpop.f32.mrb[0].mxu1 }
  0xed   :  { %v545_v45 = vadd.f32 %v544_v41, %v1309_v39  ;;  %v546_v46 = vpop.f32.mrb[1].mxu0  ;;  %v586_v48 = vadd.f32 %v585_v44, %v1309_v39  ;;  %v587_v49 = vpop.f32.mrb[1].mxu1  ;;  %v844_v41 = vld [vmem:[%s1396_s3 + $0x30] sm:$0xff] }
  0xee   :  { %v547_v51 = vadd.f32 %v546_v46, %v1309_v39  ;;  %v548_v50 = vpop.f32.mrb[2].mxu0  ;;  %v588_v53 = vadd.f32 %v587_v49, %v1309_v39  ;;  %v589_v54 = vpop.f32.mrb[2].mxu1  ;;  %v859_v46 = vunpack.c.h.bf16 %v844_v41 }
  0xef   :  { %v862_v52 = vadd.f32 %v846_v40, %v545_v45  ;;  %v549_v55 = vpop.f32.mrb[3].mxu0  ;;  %v864_v57 = vadd.f32 %v848_v43, %v586_v48  ;;  %v590_v58 = vpop.f32.mrb[3].mxu1  ;;  %v858_v43 = vunpack.c.l.bf16 %v844_v41 }
  0xf0   :  { %v863_v56 = vadd.f32 %v847_v42, %v547_v51  ;;  %v865_v59 = vadd.f32 %v849_v47, %v588_v53  ;;  %v845_v42 = vld [vmem:[%s1396_s3 + $0x38] sm:$0xff] }
  0xf1   :  { %878 = vst [vmem:[%s1397_s4] sm:$0xff] %v862_v52  ;;  %880 = vst [vmem:[%s1397_s4 + $0x10] sm:$0xff] %v864_v57  ;;  %v860_v45 = vunpack.c.l.bf16 %v845_v42  ;;  %v861_v49 = vunpack.c.h.bf16 %v845_v42 }
  0xf2   :  { %879 = vst [vmem:[%s1397_s4 + $0x8] sm:$0xff] %v863_v56  ;;  %881 = vst [vmem:[%s1397_s4 + $0x18] sm:$0xff] %v865_v59 }
 0x100   :  { %v626_v63 = vpop.f32.mrb[4].mxu0  ;;  %v667_v4 = vpop.f32.mrb[4].mxu1 }
 0x101   :  { %v627_v2 = vadd.f32 %v626_v63, %v1309_v39  ;;  %v628_v5 = vpop.f32.mrb[5].mxu0  ;;  %v668_v7 = vadd.f32 %v667_v4, %v1309_v39  ;;  %v669_v9 = vpop.f32.mrb[5].mxu1 }
 0x102   :  { %v629_v8 = vadd.f32 %v628_v5, %v1309_v39  ;;  %v630_v10 = vpop.f32.mrb[6].mxu0  ;;  %v670_v12 = vadd.f32 %v669_v9, %v1309_v39  ;;  %v671_v13 = vpop.f32.mrb[6].mxu1 }
 0x103   :  { %v866_v11 = vadd.f32 %v850_v62, %v627_v2  ;;  %v631_v14 = vpop.f32.mrb[7].mxu0  ;;  %v868_v15 = vadd.f32 %v852_v0, %v668_v7  ;;  %v672_v17 = vpop.f32.mrb[7].mxu1 }
 0x104   :  { %v867_v16 = vadd.f32 %v851_v1, %v629_v8  ;;  %v869_v18 = vadd.f32 %v853_v6, %v670_v12 }
 0x105   :  { %882 = vst [vmem:[%s1397_s4 + $0x20] sm:$0xff] %v866_v11  ;;  %884 = vst [vmem:[%s1397_s4 + $0x30] sm:$0xff] %v868_v15 }
 0x106   :  { %883 = vst [vmem:[%s1397_s4 + $0x28] sm:$0xff] %v867_v16  ;;  %885 = vst [vmem:[%s1397_s4 + $0x38] sm:$0xff] %v869_v18 }
 0x114   :  { %v708_v22 = vpop.f32.mrb[8].mxu0  ;;  %v749_v26 = vpop.f32.mrb[8].mxu1 }
 0x115   :  { %v709_v25 = vadd.f32 %v708_v22, %v1309_v39  ;;  %v710_v27 = vpop.f32.mrb[9].mxu0  ;;  %v750_v29 = vadd.f32 %v749_v26, %v1309_v39  ;;  %v751_v3 = vpop.f32.mrb[9].mxu1 }
 0x116   :  { %v711_v30 = vadd.f32 %v710_v27, %v1309_v39  ;;  %v712_v31 = vpop.f32.mrb[10].mxu0  ;;  %v752_v33 = vadd.f32 %v751_v3, %v1309_v39  ;;  %v753_v34 = vpop.f32.mrb[10].mxu1 }
 0x117   :  { %v870_v32 = vadd.f32 %v854_v21, %v709_v25  ;;  %v713_v35 = vpop.f32.mrb[11].mxu0  ;;  %v872_v36 = vadd.f32 %v856_v23, %v750_v29  ;;  %v754_v38 = vpop.f32.mrb[11].mxu1 }
 0x118   :  { %v871_v37 = vadd.f32 %v855_v24, %v711_v30  ;;  %v873_v40 = vadd.f32 %v857_v28, %v752_v33 }
 0x119   :  { %886 = vst [vmem:[%s1397_s4 + $0x40] sm:$0xff] %v870_v32  ;;  %888 = vst [vmem:[%s1397_s4 + $0x50] sm:$0xff] %v872_v36 }
 0x11a   :  { %887 = vst [vmem:[%s1397_s4 + $0x48] sm:$0xff] %v871_v37  ;;  %889 = vst [vmem:[%s1397_s4 + $0x58] sm:$0xff] %v873_v40 }
 0x128   :  { %v790_v44 = vpop.f32.mrb[12].mxu0  ;;  %v831_v51 = vpop.f32.mrb[12].mxu1 }
 0x129   :  { %v791_v47 = vadd.f32 %v790_v44, %v1309_v39  ;;  %v792_v48 = vpop.f32.mrb[13].mxu0  ;;  %v832_v50 = vadd.f32 %v831_v51, %v1309_v39  ;;  %v833_v53 = vpop.f32.mrb[13].mxu1 }
 0x12a   :  { %v793_v52 = vadd.f32 %v792_v48, %v1309_v39  ;;  %v794_v54 = vpop.f32.mrb[14].mxu0  ;;  %v834_v56 = vadd.f32 %v833_v53, %v1309_v39  ;;  %v835_v57 = vpop.f32.mrb[14].mxu1 }
 0x12b   :  { %v874_v55 = vadd.f32 %v858_v43, %v791_v47  ;;  %v795_v58 = vpop.f32.mrb[15].mxu0  ;;  %v876_v59 = vadd.f32 %v860_v45, %v832_v50  ;;  %v836_v61 = vpop.f32.mrb[15].mxu1 }
 0x12c   :  { %v875_v60 = vadd.f32 %v859_v46, %v793_v52  ;;  %v877_v62 = vadd.f32 %v861_v49, %v834_v56 }
 0x12d   :  { %890 = vst [vmem:[%s1397_s4 + $0x60] sm:$0xff] %v874_v55  ;;  %892 = vst [vmem:[%s1397_s4 + $0x70] sm:$0xff] %v876_v59 }
 0x12e   :  { %891 = vst [vmem:[%s1397_s4 + $0x68] sm:$0xff] %v875_v60  ;;  %893 = vst [vmem:[%s1397_s4 + $0x78] sm:$0xff] %v877_v62 }

// kernel: pose_so_decoder_forward.51
= control target key start
LH: loop header
LB: loop body
LE: loop exit
PB: predicated region body
PF: predicated region fallthrough
CT: control target
= control target key end

     0   :  { %v1017_v3 = vmov 0   ;;  %vm458_vm0 = vcmask 1043456   ;;  %vm454_vm1 = vcmask 588800   ;;  %s1369_s1 = inlined_call_operand.vmem [shape: bf16[72,2048], index: 1, kind: input, shape index: {}]   ;;  %s1370_s0 = inlined_call_operand.vmem [shape: bf16[8,72], index: 0, kind: input, shape index: {}]   ;;  %s1371_s2 = inlined_call_operand.vmem [shape: f32[8,1], index: 2, kind: input, shape index: {}]   ;;  %s1372_s3 = inlined_call_operand.vmem [shape: f32[8,2048], index: 3, kind: output, shape index: {}]  }
   0x1   :  { %v16_v0 = vld [vmem:[%s1369_s1] sm:$0xff]  ;;  %v17_v2 = vld [vmem:[%s1369_s1 + $0x8] sm:$0xff]  ;;  %539 = vmatprep.mubr.bf16.mxu0 %v1017_v3  ;;  %580 = vmatprep.mubr.bf16.mxu1 %v1017_v3  ;;  %v18_v39 = vld [vmem:[%s1369_s1 + $0x10] sm:$0xff] }
   0x2   :  { %v24_v1 = vld [vmem:[%s1369_s1 + $0x40] sm:$0xff]  ;;  %v25_v5 = vld [vmem:[%s1369_s1 + $0x48] sm:$0xff]  ;;  %968 = vset.pattern.permute.xlu0 %v1017_v3  ;;  %v26_v40 = vld [vmem:[%s1369_s1 + $0x50] sm:$0xff] }
   0x3   :  { %v872_v4 = vcombine.high %v16_v0, %v24_v1  ;;  %v871_v6 = vcombine.low %v16_v0, %v24_v1  ;;  %v32_v7 = vld [vmem:[%s1369_s1 + $0x80] sm:$0xff]  ;;  %v874_v9 = vcombine.high %v17_v2, %v25_v5  ;;  %v873_v10 = vcombine.low %v17_v2, %v25_v5  ;;  %v33_v12 = vld [vmem:[%s1369_s1 + $0x88] sm:$0xff]  ;;  %v19_v41 = vld [vmem:[%s1369_s1 + $0x18] sm:$0xff] }
   0x4   :  { %v40_v8 = vld [vmem:[%s1369_s1 + $0xc0] sm:$0xff]  ;;  %v41_v13 = vld [vmem:[%s1369_s1 + $0xc8] sm:$0xff]  ;;  %v27_v42 = vld [vmem:[%s1369_s1 + $0x58] sm:$0xff]  ;;  %v876_v44 = vcombine.high %v18_v39, %v26_v40  ;;  %v875_v52 = vcombine.low %v18_v39, %v26_v40 }
   0x5   :  { %v888_v11 = vcombine.high %v32_v7, %v40_v8  ;;  %v48_v14 = vld [vmem:[%s1369_s1 + $0x100] sm:$0xff]  ;;  %507 = vmatprep.subr.bf16.mxu0 %v872_v4  ;;  %v890_v15 = vcombine.high %v33_v12, %v41_v13  ;;  %v49_v17 = vld [vmem:[%s1369_s1 + $0x108] sm:$0xff]  ;;  %548 = vmatprep.subr.bf16.mxu1 %v874_v9  ;;  %v887_v19 = vcombine.low %v32_v7, %v40_v8  ;;  %v34_v47 = vld [vmem:[%s1369_s1 + $0x90] sm:$0xff] }
   0x6   :  { %v56_v16 = vld [vmem:[%s1369_s1 + $0x140] sm:$0xff]  ;;  %v57_v18 = vld [vmem:[%s1369_s1 + $0x148] sm:$0xff]  ;;  %508 = vmatpush1.bf16.msra.mxu0 %v871_v6  ;;  %549 = vmatpush1.bf16.msra.mxu1 %v873_v10  ;;  %v889_v20 = vcombine.low %v33_v12, %v41_v13  ;;  %v878_v46 = vcombine.high %v19_v41, %v27_v42  ;;  %v42_v48 = vld [vmem:[%s1369_s1 + $0xd0] sm:$0xff]  ;;  %v877_v53 = vcombine.low %v19_v41, %v27_v42 }
   0x7   :  { %509 = vmatprep.subr.bf16.mxu0 %v888_v11  ;;  %v904_v21 = vcombine.high %v48_v14, %v56_v16  ;;  %550 = vmatprep.subr.bf16.mxu1 %v890_v15  ;;  %v906_v22 = vcombine.high %v49_v17, %v57_v18  ;;  %v64_v23 = vld [vmem:[%s1369_s1 + $0x180] sm:$0xff]  ;;  %v65_v25 = vld [vmem:[%s1369_s1 + $0x188] sm:$0xff]  ;;  %v903_v27 = vcombine.low %v48_v14, %v56_v16  ;;  %v35_v49 = vld [vmem:[%s1369_s1 + $0x98] sm:$0xff] }
   0x8   :  { %v72_v24 = vld [vmem:[%s1369_s1 + $0x1c0] sm:$0xff]  ;;  %v73_v26 = vld [vmem:[%s1369_s1 + $0x1c8] sm:$0xff]  ;;  %v905_v28 = vcombine.low %v49_v17, %v57_v18  ;;  %v43_v50 = vld [vmem:[%s1369_s1 + $0xd8] sm:$0xff]  ;;  %v892_v54 = vcombine.high %v34_v47, %v42_v48  ;;  %v891_v60 = vcombine.low %v34_v47, %v42_v48 }
   0x9   :  { %v920_v29 = vcombine.high %v64_v23, %v72_v24  ;;  %v922_v30 = vcombine.high %v65_v25, %v73_v26  ;;  %v80_v31 = vld [vmem:[%s1369_s1 + $0x200] sm:$0xff]  ;;  %v81_v32 = vld [vmem:[%s1369_s1 + $0x208] sm:$0xff]  ;;  %v919_v33 = vcombine.low %v64_v23, %v72_v24  ;;  %v921_v34 = vcombine.low %v65_v25, %v73_v26  ;;  %v50_v56 = vld [vmem:[%s1369_s1 + $0x110] sm:$0xff] }
   0xa   :  { %510 = vmatpush1.bf16.msra.mxu0 %v887_v19  ;;  %551 = vmatpush1.bf16.msra.mxu1 %v889_v20  ;;  %v936_v35 = vcombine.high %v80_v31, %v80_v31  ;;  %v935_v36 = vcombine.low %v80_v31, %v80_v31  ;;  %v938_v37 = vcombine.high %v81_v32, %v81_v32  ;;  %v1126_v51 = vld [vmem:[%s1370_s0] sm:$0xf]  ;;  %v58_v57 = vld [vmem:[%s1369_s1 + $0x150] sm:$0xff]  ;;  %v51_v58 = vld [vmem:[%s1369_s1 + $0x118] sm:$0xff] }
   0xb   :  { %511 = vmatprep.subr.bf16.mxu0 %v904_v21  ;;  %552 = vmatprep.subr.bf16.mxu1 %v906_v22  ;;  %v937_v38 = vcombine.low %v81_v32, %v81_v32  ;;  %v894_v55 = vcombine.high %v35_v49, %v43_v50  ;;  %v59_v59 = vld [vmem:[%s1369_s1 + $0x158] sm:$0xff]  ;;  %v88_v61 = vld [vmem:[%s1371_s2] sm:$0xff]  ;;  %v893_v62 = vcombine.low %v35_v49, %v43_v50  ;;  %v66_v1 = vld [vmem:[%s1369_s1 + $0x190] sm:$0xff] }
   0xc   :  { %v460_v43 = vsel %vm458_vm0, %v935_v36, 0  ;;  %v908_v63 = vcombine.high %v50_v56, %v58_v57  ;;  %v910_v0 = vcombine.high %v51_v58, %v59_v59  ;;  %v74_v2 = vld [vmem:[%s1369_s1 + $0x1d0] sm:$0xff]  ;;  %v67_v4 = vld [vmem:[%s1369_s1 + $0x198] sm:$0xff]  ;;  %91 = vperm.xlu0 %968, %v88_v61   ;;  %v907_v6 = vcombine.low %v50_v56, %v58_v57  ;;  %v20_v18 = vld [vmem:[%s1369_s1 + $0x20] sm:$0xff] }
   0xd   :  { %v466_v45 = vsel %vm458_vm0, %v937_v38, 0  ;;  %v75_v5 = vld [vmem:[%s1369_s1 + $0x1d8] sm:$0xff]  ;;  %v909_v7 = vcombine.low %v51_v58, %v59_v59  ;;  %v924_v8 = vcombine.high %v66_v1, %v74_v2  ;;  %v82_v10 = vld [vmem:[%s1369_s1 + $0x210] sm:$0xff]  ;;  %v923_v12 = vcombine.low %v66_v1, %v74_v2  ;;  %v28_v19 = vld [vmem:[%s1369_s1 + $0x60] sm:$0xff] }
   0xe   :  { %512 = vmatpush1.bf16.msra.mxu0 %v903_v27  ;;  %553 = vmatpush1.bf16.msra.mxu1 %v905_v28  ;;  %v926_v9 = vcombine.high %v67_v4, %v75_v5  ;;  %v83_v11 = vld [vmem:[%s1369_s1 + $0x218] sm:$0xff]  ;;  %v925_v13 = vcombine.low %v67_v4, %v75_v5  ;;  %v940_v14 = vcombine.high %v82_v10, %v82_v10  ;;  %v21_v20 = vld [vmem:[%s1369_s1 + $0x28] sm:$0xff]  ;;  %v36_v26 = vld [vmem:[%s1369_s1 + $0xa0] sm:$0xff] }
   0xf   :  { %513 = vmatprep.subr.bf16.mxu0 %v920_v29  ;;  %554 = vmatprep.subr.bf16.mxu1 %v922_v30  ;;  %v939_v15 = vcombine.low %v82_v10, %v82_v10  ;;  %v942_v16 = vcombine.high %v83_v11, %v83_v11  ;;  %v941_v17 = vcombine.low %v83_v11, %v83_v11  ;;  %v29_v21 = vld [vmem:[%s1369_s1 + $0x68] sm:$0xff]  ;;  %v44_v27 = vld [vmem:[%s1369_s1 + $0xe0] sm:$0xff]  ;;  %v22_v59 = vld [vmem:[%s1369_s1 + $0x30] sm:$0xff] }
  0x10   :  { %v880_v23 = vcombine.high %v20_v18, %v28_v19  ;;  %v882_v25 = vcombine.high %v21_v20, %v29_v21  ;;  %v37_v28 = vld [vmem:[%s1369_s1 + $0xa8] sm:$0xff]  ;;  %v879_v30 = vcombine.low %v20_v18, %v28_v19  ;;  %v881_v31 = vcombine.low %v21_v20, %v29_v21  ;;  %v68_v42 = vld [vmem:[%s1369_s1 + $0x1a0] sm:$0xff]  ;;  %v23_v61 = vld [vmem:[%s1369_s1 + $0x38] sm:$0xff] }
  0x11   :  { %v472_v22 = vsel %vm458_vm0, %v939_v15, 0  ;;  %v478_v24 = vsel %vm458_vm0, %v941_v17, 0  ;;  %v45_v29 = vld [vmem:[%s1369_s1 + $0xe8] sm:$0xff]  ;;  %v896_v32 = vcombine.high %v36_v26, %v44_v27  ;;  %v895_v38 = vcombine.low %v36_v26, %v44_v27  ;;  %v84_v50 = vld [vmem:[%s1369_s1 + $0x220] sm:$0xff]  ;;  %v38_v4 = vld [vmem:[%s1369_s1 + $0xb0] sm:$0xff] }
  0x12   :  { %514 = vmatpush1.bf16.msra.mxu0 %v919_v33  ;;  %555 = vmatpush1.bf16.msra.mxu1 %v921_v34  ;;  %v898_v33 = vcombine.high %v37_v28, %v45_v29  ;;  %v52_v34 = vld [vmem:[%s1369_s1 + $0x120] sm:$0xff]  ;;  %v53_v36 = vld [vmem:[%s1369_s1 + $0x128] sm:$0xff]  ;;  %v897_v39 = vcombine.low %v37_v28, %v45_v29  ;;  %v943_v56 = vcombine.low %v84_v50, %v84_v50  ;;  %v46_v5 = vld [vmem:[%s1369_s1 + $0xf0] sm:$0xff] }
  0x13   :  { %951 = vmatprep.subr.msk.bf16.mxu0 %vm458_vm0, %v936_v35  ;;  %953 = vmatprep.subr.msk.bf16.mxu1 %vm458_vm0, %v938_v37  ;;  %v60_v35 = vld [vmem:[%s1369_s1 + $0x160] sm:$0xff]  ;;  %v61_v37 = vld [vmem:[%s1369_s1 + $0x168] sm:$0xff]  ;;  %v900_v10 = vcombine.high %v38_v4, %v46_v5  ;;  %v63_v15 = vld [vmem:[%s1369_s1 + $0x178] sm:$0xff] }
  0x14   :  { %v912_v40 = vcombine.high %v52_v34, %v60_v35  ;;  %v914_v41 = vcombine.high %v53_v36, %v61_v37  ;;  %v913_v47 = vcombine.low %v53_v36, %v61_v37  ;;  %v70_v20 = vld [vmem:[%s1369_s1 + $0x1b0] sm:$0xff]  ;;  %v87_v29 = vld [vmem:[%s1369_s1 + $0x238] sm:$0xff] }
  0x15   :  { %v78_v21 = vld [vmem:[%s1369_s1 + $0x1f0] sm:$0xff] }
  0x16   :  { %516 = vmatpush1.bf16.msra.mxu0 %v460_v43  ;;  %557 = vmatpush1.bf16.msra.mxu1 %v466_v45  ;;  %v76_v43 = vld [vmem:[%s1369_s1 + $0x1e0] sm:$0xff]  ;;  %v77_v45 = vld [vmem:[%s1369_s1 + $0x1e8] sm:$0xff]  ;;  %v932_v26 = vcombine.high %v70_v20, %v78_v21  ;;  %v86_v28 = vld [vmem:[%s1369_s1 + $0x230] sm:$0xff] }
  0x17   :  { %589 = vmatprep.subr.bf16.mxu0 %v876_v44  ;;  %630 = vmatprep.subr.bf16.mxu1 %v878_v46  ;;  %v69_v44 = vld [vmem:[%s1369_s1 + $0x1a8] sm:$0xff]  ;;  %v911_v46 = vcombine.low %v52_v34, %v60_v35  ;;  %v928_v48 = vcombine.high %v68_v42, %v76_v43  ;;  %v949_v34 = vcombine.low %v87_v29, %v87_v29 }
  0x18   :  { %v930_v49 = vcombine.high %v69_v44, %v77_v45 }
  0x19   :  { %952 = vmatmul.mubr.msk.bf16.vlgmr.msra.gmra.mrb[0].mxu0 %vm454_vm1, %v1126_v51  ;;  %954 = vmatmul.mubr.msk.bf16.vlgmr.msra.gmra.mrb[0].mxu1 %vm454_vm1, %v1126_v51  ;;  %v502_v36 = vsel %vm458_vm0, %v949_v34, 0 }
  0x1a   :  { %590 = vmatpush1.bf16.msra.mxu0 %v875_v52  ;;  %631 = vmatpush1.bf16.msra.mxu1 %v877_v53  ;;  %v85_v52 = vld [vmem:[%s1369_s1 + $0x228] sm:$0xff]  ;;  %v927_v53 = vcombine.low %v68_v42, %v76_v43 }
  0x1b   :  { %591 = vmatprep.subr.bf16.mxu0 %v892_v54  ;;  %632 = vmatprep.subr.bf16.mxu1 %v894_v55  ;;  %v929_v54 = vcombine.low %v69_v44, %v77_v45  ;;  %v944_v55 = vcombine.high %v84_v50, %v84_v50  ;;  %v946_v57 = vcombine.high %v85_v52, %v85_v52 }
  0x1c   :  { %621 = vmatprep.mubr.bf16.mxu0 %v1017_v3  ;;  %662 = vmatprep.mubr.bf16.mxu1 %v1017_v3  ;;  %v945_v58 = vcombine.low %v85_v52, %v85_v52 }
  0x1e   :  { %592 = vmatpush1.bf16.msra.mxu0 %v891_v60  ;;  %633 = vmatpush1.bf16.msra.mxu1 %v893_v62  ;;  %v30_v60 = vld [vmem:[%s1369_s1 + $0x70] sm:$0xff]  ;;  %v31_v62 = vld [vmem:[%s1369_s1 + $0x78] sm:$0xff]  ;;  %v490_v1 = vsel %vm458_vm0, %v945_v58, 0 }
  0x1f   :  { %593 = vmatprep.subr.bf16.mxu0 %v908_v63  ;;  %634 = vmatprep.subr.bf16.mxu1 %v910_v0  ;;  %v484_v63 = vsel %vm458_vm0, %v943_v56, 0  ;;  %v884_v0 = vcombine.high %v22_v59, %v30_v60  ;;  %v886_v2 = vcombine.high %v23_v61, %v31_v62 }
  0x22   :  { %594 = vmatpush1.bf16.msra.mxu0 %v907_v6  ;;  %635 = vmatpush1.bf16.msra.mxu1 %v909_v7  ;;  %v39_v6 = vld [vmem:[%s1369_s1 + $0xb8] sm:$0xff] }
  0x23   :  { %595 = vmatprep.subr.bf16.mxu0 %v924_v8  ;;  %636 = vmatprep.subr.bf16.mxu1 %v926_v9  ;;  %v47_v7 = vld [vmem:[%s1369_s1 + $0xf8] sm:$0xff]  ;;  %v883_v8 = vcombine.low %v22_v59, %v30_v60  ;;  %v885_v9 = vcombine.low %v23_v61, %v31_v62 }
  0x24   :  { %v902_v11 = vcombine.high %v39_v6, %v47_v7  ;;  %v901_v17 = vcombine.low %v39_v6, %v47_v7 }
  0x26   :  { %596 = vmatpush1.bf16.msra.mxu0 %v923_v12  ;;  %637 = vmatpush1.bf16.msra.mxu1 %v925_v13  ;;  %v54_v12 = vld [vmem:[%s1369_s1 + $0x130] sm:$0xff] }
  0x27   :  { %955 = vmatprep.subr.msk.bf16.mxu0 %vm458_vm0, %v940_v14  ;;  %957 = vmatprep.subr.msk.bf16.mxu1 %vm458_vm0, %v942_v16  ;;  %v62_v13 = vld [vmem:[%s1369_s1 + $0x170] sm:$0xff]  ;;  %v55_v14 = vld [vmem:[%s1369_s1 + $0x138] sm:$0xff]  ;;  %v899_v16 = vcombine.low %v38_v4, %v46_v5 }
  0x28   :  { %v916_v18 = vcombine.high %v54_v12, %v62_v13  ;;  %v918_v19 = vcombine.high %v55_v14, %v63_v15 }
  0x2a   :  { %598 = vmatpush1.bf16.msra.mxu0 %v472_v22  ;;  %639 = vmatpush1.bf16.msra.mxu1 %v478_v24  ;;  %v71_v22 = vld [vmem:[%s1369_s1 + $0x1b8] sm:$0xff]  ;;  %v915_v24 = vcombine.low %v54_v12, %v62_v13 }
  0x2b   :  { %671 = vmatprep.subr.bf16.mxu0 %v880_v23  ;;  %712 = vmatprep.subr.bf16.mxu1 %v882_v25  ;;  %v79_v23 = vld [vmem:[%s1369_s1 + $0x1f8] sm:$0xff]  ;;  %v917_v25 = vcombine.low %v55_v14, %v63_v15 }
  0x2c   :  { %v934_v27 = vcombine.high %v71_v22, %v79_v23 }
  0x2d   :  { %956 = vmatmul.mubr.msk.bf16.vlgmr.msra.gmra.mrb[4].mxu0 %vm454_vm1, %v1126_v51  ;;  %958 = vmatmul.mubr.msk.bf16.vlgmr.msra.gmra.mrb[4].mxu1 %vm454_vm1, %v1126_v51 }
  0x2e   :  { %672 = vmatpush1.bf16.msra.mxu0 %v879_v30  ;;  %713 = vmatpush1.bf16.msra.mxu1 %v881_v31  ;;  %v931_v30 = vcombine.low %v70_v20, %v78_v21  ;;  %v948_v31 = vcombine.high %v86_v28, %v86_v28 }
  0x2f   :  { %673 = vmatprep.subr.bf16.mxu0 %v896_v32  ;;  %714 = vmatprep.subr.bf16.mxu1 %v898_v33  ;;  %v947_v32 = vcombine.low %v86_v28, %v86_v28  ;;  %v950_v33 = vcombine.high %v87_v29, %v87_v29 }
  0x30   :  { %703 = vmatprep.mubr.bf16.mxu0 %v1017_v3  ;;  %744 = vmatprep.mubr.bf16.mxu1 %v1017_v3 }
  0x31   :  { %v496_v35 = vsel %vm458_vm0, %v947_v32, 0 }
  0x32   :  { %674 = vmatpush1.bf16.msra.mxu0 %v895_v38  ;;  %715 = vmatpush1.bf16.msra.mxu1 %v897_v39 }
  0x33   :  { %675 = vmatprep.subr.bf16.mxu0 %v912_v40  ;;  %716 = vmatprep.subr.bf16.mxu1 %v914_v41 }
  0x36   :  { %676 = vmatpush1.bf16.msra.mxu0 %v911_v46  ;;  %717 = vmatpush1.bf16.msra.mxu1 %v913_v47 }
  0x37   :  { %677 = vmatprep.subr.bf16.mxu0 %v928_v48  ;;  %718 = vmatprep.subr.bf16.mxu1 %v930_v49 }
  0x3a   :  { %678 = vmatpush1.bf16.msra.mxu0 %v927_v53  ;;  %719 = vmatpush1.bf16.msra.mxu1 %v929_v54 }
  0x3b   :  { %959 = vmatprep.subr.msk.bf16.mxu0 %vm458_vm0, %v944_v55  ;;  %961 = vmatprep.subr.msk.bf16.mxu1 %vm458_vm0, %v946_v57 }
  0x3e   :  { %680 = vmatpush1.bf16.msra.mxu0 %v484_v63  ;;  %721 = vmatpush1.bf16.msra.mxu1 %v490_v1 }
  0x3f   :  { %753 = vmatprep.subr.bf16.mxu0 %v884_v0  ;;  %794 = vmatprep.subr.bf16.mxu1 %v886_v2 }
  0x41   :  { %960 = vmatmul.mubr.msk.bf16.vlgmr.msra.gmra.mrb[8].mxu0 %vm454_vm1, %v1126_v51  ;;  %962 = vmatmul.mubr.msk.bf16.vlgmr.msra.gmra.mrb[8].mxu1 %vm454_vm1, %v1126_v51 }
  0x42   :  { %754 = vmatpush1.bf16.msra.mxu0 %v883_v8  ;;  %795 = vmatpush1.bf16.msra.mxu1 %v885_v9 }
  0x43   :  { %755 = vmatprep.subr.bf16.mxu0 %v900_v10  ;;  %796 = vmatprep.subr.bf16.mxu1 %v902_v11 }
  0x44   :  { %785 = vmatprep.mubr.bf16.mxu0 %v1017_v3  ;;  %826 = vmatprep.mubr.bf16.mxu1 %v1017_v3  ;;  %v933_v3 = vcombine.low %v71_v22, %v79_v23 }
  0x46   :  { %756 = vmatpush1.bf16.msra.mxu0 %v899_v16  ;;  %797 = vmatpush1.bf16.msra.mxu1 %v901_v17 }
  0x47   :  { %757 = vmatprep.subr.bf16.mxu0 %v916_v18  ;;  %798 = vmatprep.subr.bf16.mxu1 %v918_v19 }
  0x4a   :  { %758 = vmatpush1.bf16.msra.mxu0 %v915_v24  ;;  %799 = vmatpush1.bf16.msra.mxu1 %v917_v25 }
  0x4b   :  { %759 = vmatprep.subr.bf16.mxu0 %v932_v26  ;;  %800 = vmatprep.subr.bf16.mxu1 %v934_v27 }
  0x4e   :  { %760 = vmatpush1.bf16.msra.mxu0 %v931_v30  ;;  %801 = vmatpush1.bf16.msra.mxu1 %v933_v3 }
  0x4f   :  { %963 = vmatprep.subr.msk.bf16.mxu0 %vm458_vm0, %v948_v31  ;;  %965 = vmatprep.subr.msk.bf16.mxu1 %vm458_vm0, %v950_v33 }
  0x52   :  { %762 = vmatpush1.bf16.msra.mxu0 %v496_v35  ;;  %803 = vmatpush1.bf16.msra.mxu1 %v502_v36 }
  0x55   :  { %964 = vmatmul.mubr.msk.bf16.vlgmr.msra.gmra.mrb[12].mxu0 %vm454_vm1, %v1126_v51  ;;  %966 = vmatmul.mubr.msk.bf16.vlgmr.msra.gmra.mrb[12].mxu1 %vm454_vm1, %v1126_v51 }
  0x8b   :  { %v1303_v37 = vpop.permute.xlu0 %91 }
  0xec   :  { %v541_v38 = vpop.f32.mrb[0].mxu0  ;;  %v582_v39 = vpop.f32.mrb[0].mxu1 }
  0xed   :  { %v542_v40 = vadd.f32 %v541_v38, %v1303_v37  ;;  %v543_v41 = vpop.f32.mrb[1].mxu0  ;;  %v583_v42 = vadd.f32 %v582_v39, %v1303_v37  ;;  %v584_v44 = vpop.f32.mrb[1].mxu1 }
  0xee   :  { %v544_v43 = vadd.f32 %v543_v41, %v1303_v37  ;;  %v545_v45 = vpop.f32.mrb[2].mxu0  ;;  %v585_v46 = vadd.f32 %v584_v44, %v1303_v37  ;;  %v586_v47 = vpop.f32.mrb[2].mxu1 }
  0xef   :  { %985 = vtanh.f32 %v542_v40  ;;  %v546_v48 = vpop.f32.mrb[3].mxu0  ;;  %v587_v51 = vpop.f32.mrb[3].mxu1 }
  0xf0   :  { %987 = vtanh.f32 %v583_v42 }
  0xf1   :  { %989 = vtanh.f32 %v544_v43 }
  0xf2   :  { %991 = vtanh.f32 %v585_v46 }
  0xf9   :  { %v986_v49 = vpop.eup %985 }
  0xfa   :  { %v988_v50 = vpop.eup %987  ;;  %851 = vst [vmem:[%s1372_s3] sm:$0xff] %v986_v49 }
  0xfb   :  { %v990_v52 = vpop.eup %989  ;;  %853 = vst [vmem:[%s1372_s3 + $0x10] sm:$0xff] %v988_v50 }
  0xfc   :  { %v992_v53 = vpop.eup %991  ;;  %852 = vst [vmem:[%s1372_s3 + $0x8] sm:$0xff] %v990_v52 }
  0xfd   :  { %854 = vst [vmem:[%s1372_s3 + $0x18] sm:$0xff] %v992_v53 }
 0x100   :  { %v623_v54 = vpop.f32.mrb[4].mxu0  ;;  %v664_v56 = vpop.f32.mrb[4].mxu1 }
 0x101   :  { %v624_v55 = vadd.f32 %v623_v54, %v1303_v37  ;;  %v625_v57 = vpop.f32.mrb[5].mxu0  ;;  %v665_v58 = vadd.f32 %v664_v56, %v1303_v37  ;;  %v666_v60 = vpop.f32.mrb[5].mxu1 }
 0x102   :  { %v626_v59 = vadd.f32 %v625_v57, %v1303_v37  ;;  %v627_v61 = vpop.f32.mrb[6].mxu0  ;;  %v667_v62 = vadd.f32 %v666_v60, %v1303_v37  ;;  %v668_v63 = vpop.f32.mrb[6].mxu1 }
 0x103   :  { %993 = vtanh.f32 %v624_v55  ;;  %v628_v0 = vpop.f32.mrb[7].mxu0  ;;  %v669_v1 = vpop.f32.mrb[7].mxu1 }
 0x104   :  { %995 = vtanh.f32 %v665_v58 }
 0x105   :  { %997 = vtanh.f32 %v626_v59 }
 0x106   :  { %999 = vtanh.f32 %v667_v62 }
 0x10d   :  { %v994_v2 = vpop.eup %993 }
 0x10e   :  { %v996_v4 = vpop.eup %995  ;;  %855 = vst [vmem:[%s1372_s3 + $0x20] sm:$0xff] %v994_v2 }
 0x10f   :  { %v998_v5 = vpop.eup %997  ;;  %857 = vst [vmem:[%s1372_s3 + $0x30] sm:$0xff] %v996_v4 }
 0x110   :  { %v1000_v6 = vpop.eup %999  ;;  %856 = vst [vmem:[%s1372_s3 + $0x28] sm:$0xff] %v998_v5 }
 0x111   :  { %858 = vst [vmem:[%s1372_s3 + $0x38] sm:$0xff] %v1000_v6 }
 0x114   :  { %v705_v7 = vpop.f32.mrb[8].mxu0  ;;  %v746_v9 = vpop.f32.mrb[8].mxu1 }
 0x115   :  { %v706_v8 = vadd.f32 %v705_v7, %v1303_v37  ;;  %v707_v10 = vpop.f32.mrb[9].mxu0  ;;  %v747_v11 = vadd.f32 %v746_v9, %v1303_v37  ;;  %v748_v13 = vpop.f32.mrb[9].mxu1 }
 0x116   :  { %v708_v12 = vadd.f32 %v707_v10, %v1303_v37  ;;  %v709_v14 = vpop.f32.mrb[10].mxu0  ;;  %v749_v15 = vadd.f32 %v748_v13, %v1303_v37  ;;  %v750_v16 = vpop.f32.mrb[10].mxu1 }
 0x117   :  { %1001 = vtanh.f32 %v706_v8  ;;  %v710_v17 = vpop.f32.mrb[11].mxu0  ;;  %v751_v18 = vpop.f32.mrb[11].mxu1 }
 0x118   :  { %1003 = vtanh.f32 %v747_v11 }
 0x119   :  { %1005 = vtanh.f32 %v708_v12 }
 0x11a   :  { %1007 = vtanh.f32 %v749_v15 }
 0x121   :  { %v1002_v19 = vpop.eup %1001 }
 0x122   :  { %v1004_v20 = vpop.eup %1003  ;;  %859 = vst [vmem:[%s1372_s3 + $0x40] sm:$0xff] %v1002_v19 }
 0x123   :  { %v1006_v21 = vpop.eup %1005  ;;  %861 = vst [vmem:[%s1372_s3 + $0x50] sm:$0xff] %v1004_v20 }
 0x124   :  { %v1008_v22 = vpop.eup %1007  ;;  %860 = vst [vmem:[%s1372_s3 + $0x48] sm:$0xff] %v1006_v21 }
 0x125   :  { %862 = vst [vmem:[%s1372_s3 + $0x58] sm:$0xff] %v1008_v22 }
 0x128   :  { %v787_v23 = vpop.f32.mrb[12].mxu0  ;;  %v828_v25 = vpop.f32.mrb[12].mxu1 }
 0x129   :  { %v788_v24 = vadd.f32 %v787_v23, %v1303_v37  ;;  %v789_v26 = vpop.f32.mrb[13].mxu0  ;;  %v829_v27 = vadd.f32 %v828_v25, %v1303_v37  ;;  %v830_v29 = vpop.f32.mrb[13].mxu1 }
 0x12a   :  { %v790_v28 = vadd.f32 %v789_v26, %v1303_v37  ;;  %v791_v30 = vpop.f32.mrb[14].mxu0  ;;  %v831_v3 = vadd.f32 %v830_v29, %v1303_v37  ;;  %v832_v31 = vpop.f32.mrb[14].mxu1 }
 0x12b   :  { %1009 = vtanh.f32 %v788_v24  ;;  %v792_v32 = vpop.f32.mrb[15].mxu0  ;;  %v833_v33 = vpop.f32.mrb[15].mxu1 }
 0x12c   :  { %1011 = vtanh.f32 %v829_v27 }
 0x12d   :  { %1013 = vtanh.f32 %v790_v28 }
 0x12e   :  { %1015 = vtanh.f32 %v831_v3 }
 0x135   :  { %v1010_v34 = vpop.eup %1009 }
 0x136   :  { %v1012_v35 = vpop.eup %1011  ;;  %863 = vst [vmem:[%s1372_s3 + $0x60] sm:$0xff] %v1010_v34 }
 0x137   :  { %v1014_v36 = vpop.eup %1013  ;;  %865 = vst [vmem:[%s1372_s3 + $0x70] sm:$0xff] %v1012_v35 }
 0x138   :  { %v1016_v38 = vpop.eup %1015  ;;  %864 = vst [vmem:[%s1372_s3 + $0x68] sm:$0xff] %v1014_v36 }
 0x139   :  { %866 = vst [vmem:[%s1372_s3 + $0x78] sm:$0xff] %v1016_v38 }

</bundles_post_ra>
